<compile_context>
chip_gen: v7x
topology: tpu7x:2x2x1
jax: 0.10.0
libtpu: 0.0.40
codegen_flags: <defaults>
</compile_context>

<pallas_src>
import functools
import math

import jax
import jax.numpy as jnp
from jax.experimental import pallas as pl
from jax.experimental.pallas import tpu as pltpu


_VMEM_LIMIT = 48 * 1024 * 1024   # explicit scoped-VMEM budget (fits v5e/v6e/v7x)
_PAD = 8                         # zero pad at both ends of the flattened spatial dim


# ----------------------------------------------------------------------------
# Tiling helpers
# ----------------------------------------------------------------------------
def _pick_gemm_rows(rows, max_rows=512):
    """Largest row tile <= max_rows dividing `rows` (multiple of 8 when tiled)."""
    if rows <= max_rows:
        return rows
    for t in range(max_rows, 7, -1):
        if rows % t == 0 and t % 8 == 0:
            return t
    return rows


def _pick_conv_rows(H, W, max_rows=512):
    """Image-row tile TH with TH | H, TH*W <= max_rows and TH*W % 8 == 0."""
    if H * W <= max_rows:
        return H
    for th in range(H, 0, -1):
        if H % th == 0 and th * W <= max_rows and (th * W) % 8 == 0:
            return th
    return H


# ----------------------------------------------------------------------------
# Pallas kernels
# ----------------------------------------------------------------------------
def _gemm_kernel(x_ref, w_ref, b_ref, o_ref, *, apply_swish):
    """o = act(x @ w + b).  x:(TR,K), w:(K,Cout) bf16; b:(1,Cout) f32; o:(TR,Cout)."""
    x = x_ref[...].astype(jnp.bfloat16)
    acc = jnp.dot(x, w_ref[...], preferred_element_type=jnp.float32)
    acc = acc + b_ref[...]
    if apply_swish:
        acc = acc * jax.nn.sigmoid(acc)
    o_ref[...] = acc.astype(o_ref.dtype)


def _conv3x3_kernel(x_ref, w_ref, b_ref, *rest, W, apply_swish, has_temb, single_tile):
    """Fused 3x3 conv over one row tile as 9 shifted-slice GEMM taps.

    x_ref : (1, Npad, Cin) bf16 -- whole H-padded, flattened image (resident per batch)
    w_ref : (9, Cin, Cout) bf16 -- taps ordered ky*3 + kx
    b_ref : (1, Cout) f32
    temb  : (1, 1, Cout) f32    -- only present when has_temb
    o_ref : (1, TN, Cout)       -- TN = TH*W output pixels of this row tile
    """
    temb_ref = rest[0] if has_temb else None
    o_ref = rest[-1]
    TN, Cout = o_ref.shape[1], o_ref.shape[2]
    halo = TN + 2 * W + _PAD + 8
    if single_tile:
        win = x_ref[0]                                          # (Npad, Cin) == halo rows
    else:
        base = pl.multiple_of(pl.program_id(1) * TN, 8)
        win = x_ref[0, pl.ds(base, halo), :]
    col = jax.lax.broadcasted_iota(jnp.int32, (TN, 1), 0) % W   # column index of pixel
    acc = jnp.zeros((TN, Cout), jnp.float32)
    for ky in range(3):
        for kx in range(3):
            off = _PAD + ky * W + kx - 1
            patch = win[off:off + TN, :]                        # (TN, Cin) static slice
            if kx == 0:      # left tap: column 0 has no left neighbour
                patch = jnp.where(col > 0, patch, 0)
            elif kx == 2:    # right tap: column W-1 has no right neighbour
                patch = jnp.where(col < W - 1, patch, 0)
            acc = acc + jnp.dot(patch, w_ref[ky * 3 + kx],
                                preferred_element_type=jnp.float32)
    acc = acc + b_ref[...]
    if apply_swish:
        acc = acc * jax.nn.sigmoid(acc)
    if has_temb:
        acc = acc + temb_ref[0]
    o_ref[0] = acc.astype(o_ref.dtype)


def _attn_kernel(x_ref, wqkv_ref, bqkv_ref, wproj_ref, bproj_ref, o_ref, ho_ref,
                 *, n_heads, scale):
    """Per-batch MHSA.  x:(1,N,C) bf16; wqkv:(C,3C); wproj:(C,C); ho scratch (N,C) f32."""
    C = o_ref.shape[2]
    hd = C // n_heads
    x = x_ref[0]                                                         # (N, C) bf16
    qkv = jnp.dot(x, wqkv_ref[...], preferred_element_type=jnp.float32)
    qkv = qkv + bqkv_ref[...]                                            # (N, 3C) f32
    for h in range(n_heads):
        lo = h * hd
        q = (qkv[:, lo:lo + hd] * scale).astype(jnp.bfloat16)
        k = qkv[:, C + lo:C + lo + hd].astype(jnp.bfloat16)
        v = qkv[:, 2 * C + lo:2 * C + lo + hd].astype(jnp.bfloat16)
        s = jax.lax.dot_general(q, k, (((1,), (1,)), ((), ())),          # q @ k^T, no .T
                                preferred_element_type=jnp.float32)
        s = s - jnp.max(s, axis=-1, keepdims=True)
        e = jnp.exp(s)
        p = e * pl.reciprocal(jnp.sum(e, axis=-1, keepdims=True), approx=True)
        ho_ref[:, lo:lo + hd] = jnp.dot(p.astype(jnp.bfloat16), v,
                                        preferred_element_type=jnp.float32)
    o = jnp.dot(ho_ref[...].astype(jnp.bfloat16), wproj_ref[...],
                preferred_element_type=jnp.float32) + bproj_ref[...]
    o_ref[0] = o.astype(o_ref.dtype)


# ----------------------------------------------------------------------------
# Pallas wrappers
# ----------------------------------------------------------------------------
def gemm_bias_act(x, w, b, *, apply_swish=False, out_dtype=jnp.bfloat16):
    """x:(R,K) @ w:(K,Cout) + b -> (R,Cout), optional swish, row-tiled."""
    R, K = x.shape
    Cout = w.shape[1]
    TR = _pick_gemm_rows(R)
    kernel = functools.partial(_gemm_kernel, apply_swish=apply_swish)
    return pl.pallas_call(
        kernel,
        out_shape=jax.ShapeDtypeStruct((R, Cout), out_dtype),
        grid=(R // TR,),
        in_specs=[
            pl.BlockSpec((TR, K), lambda r: (r, 0)),
            pl.BlockSpec((K, Cout), lambda r: (0, 0)),
            pl.BlockSpec((1, Cout), lambda r: (0, 0)),
        ],
        out_specs=pl.BlockSpec((TR, Cout), lambda r: (r, 0)),
        compiler_params=pltpu.CompilerParams(
            dimension_semantics=("parallel",), vmem_limit_bytes=_VMEM_LIMIT),
    )(x, w, b.reshape(1, Cout))


def conv3x3_bias_act(x, H, W, w, b, temb=None, apply_swish=False,
                     out_dtype=jnp.bfloat16):
    """3x3 / pad=1 / stride=1 conv on flattened activations.

    x:(B,H*W,Cin) bf16; w:(9,Cin,Cout) bf16; b:(Cout,) f32; temb:(B,Cout) f32 or None.
    """
    B, N, Cin = x.shape
    Cout = w.shape[2]
    # Zero-pad one row above/below, flatten, pad the flat dim so all 9 shifted windows
    # are in-bounds (~1x extra copy instead of the 9x im2col blow-up).
    xp = jnp.pad(x.reshape(B, H, W, Cin), ((0, 0), (1, 1), (0, 0), (0, 0)))
    xp = jnp.pad(xp.reshape(B, (H + 2) * W, Cin), ((0, 0), (_PAD, _PAD), (0, 0)))
    Npad = xp.shape[1]
    TH = _pick_conv_rows(H, W)
    TN = TH * W
    n_rt = H // TH
    has_temb = temb is not None
    kernel = functools.partial(_conv3x3_kernel, W=W, apply_swish=apply_swish,
                               has_temb=has_temb, single_tile=(n_rt == 1))
    in_specs = [
        pl.BlockSpec((1, Npad, Cin), lambda bi, r: (bi, 0, 0)),   # resident across tiles
        pl.BlockSpec((9, Cin, Cout), lambda bi, r: (0, 0, 0)),
        pl.BlockSpec((1, Cout), lambda bi, r: (0, 0)),
    ]
    args = [xp, w, b.reshape(1, Cout)]
    if has_temb:
        in_specs.append(pl.BlockSpec((1, 1, Cout), lambda bi, r: (bi, 0, 0)))
        args.append(temb.astype(jnp.float32).reshape(B, 1, Cout))
    return pl.pallas_call(
        kernel,
        out_shape=jax.ShapeDtypeStruct((B, N, Cout), out_dtype),
        grid=(B, n_rt),
        in_specs=in_specs,
        out_specs=pl.BlockSpec((1, TN, Cout), lambda bi, r: (bi, r, 0)),
        compiler_params=pltpu.CompilerParams(
            dimension_semantics=("parallel", "parallel"), vmem_limit_bytes=_VMEM_LIMIT),
    )(*args)


def attention(x, p, n_heads, qk_scale=None):
    """x: (B, N, C) -> (B, N, C) self-attention output (before residual add)."""
    B, N, C = x.shape
    hd = C // n_heads
    scale = float(qk_scale) if qk_scale is not None else hd ** -0.5
    kernel = functools.partial(_attn_kernel, n_heads=n_heads, scale=scale)
    return pl.pallas_call(
        kernel,
        out_shape=jax.ShapeDtypeStruct((B, N, C), x.dtype),
        grid=(B,),
        in_specs=[
            pl.BlockSpec((1, N, C), lambda bi: (bi, 0, 0)),
            pl.BlockSpec((C, 3 * C), lambda bi: (0, 0)),
            pl.BlockSpec((1, 3 * C), lambda bi: (0, 0)),
            pl.BlockSpec((C, C), lambda bi: (0, 0)),
            pl.BlockSpec((1, C), lambda bi: (0, 0)),
        ],
        out_specs=pl.BlockSpec((1, N, C), lambda bi: (bi, 0, 0)),
        scratch_shapes=[pltpu.VMEM((N, C), jnp.float32)],
        compiler_params=pltpu.CompilerParams(
            dimension_semantics=("parallel",), vmem_limit_bytes=_VMEM_LIMIT),
    )(x, p['attn_wqkv'], p['attn_bqkv'], p['attn_wproj'], p['attn_bproj'].reshape(1, C))


# ----------------------------------------------------------------------------
# JAX glue (layout plumbing only)
# ----------------------------------------------------------------------------
def maxpool2x2(x, H, W):
    B, _, C = x.shape
    y = x.reshape(B, H // 2, 2, W // 2, 2, C).max(axis=(2, 4))
    return y.reshape(B, (H // 2) * (W // 2), C)


def upsample2x(x, H, W):
    B, _, C = x.shape
    y = jnp.broadcast_to(x.reshape(B, H, 1, W, 1, C), (B, H, 2, W, 2, C))
    return y.reshape(B, (2 * H) * (2 * W), C)


def pos_encoding(t, channels):
    """Matches the PyTorch _pos_encoding: t (B,) -> (B, channels)."""
    t = t[:, None].astype(jnp.float32)
    inv_freq = 1.0 / (10000.0 ** (jnp.arange(0, channels, 2, dtype=jnp.float32) / channels))
    ang = t * inv_freq[None, :]
    return jnp.concatenate([jnp.sin(ang), jnp.cos(ang)], axis=-1)


# ----------------------------------------------------------------------------
# U-Net blocks (built on the Pallas kernels)
# ----------------------------------------------------------------------------
def _block_core(x, H, W, t_emb, p, has_attn, residual, n_heads, qk_scale):
    B, N, Cin = x.shape
    Cout = p['conv1_w'].shape[2]
    # time embedding: swish(Linear(t_emb)) -> (B, Cout), kept f32 for the epilogue add
    temb = gemm_bias_act(t_emb, p['tmlp_w'], p['tmlp_b'],
                         apply_swish=True, out_dtype=jnp.float32)
    # conv1 (3x3) + swish + broadcast time-emb add (fused in the kernel epilogue)
    h = conv3x3_bias_act(x, H, W, p['conv1_w'], p['conv1_b'], temb=temb, apply_swish=True)
    # conv2 (3x3) + swish
    h = conv3x3_bias_act(h, H, W, p['conv2_w'], p['conv2_b'], apply_swish=True)
    if residual:   # 1x1 shortcut projection
        sc = gemm_bias_act(x.reshape(B * N, Cin), p['short_w'], p['short_b'])
        h = h + sc.reshape(B, N, Cout)
    if has_attn:   # residual self-attention over spatial tokens
        h = h + attention(h, p, n_heads, qk_scale)
    return h


# ----------------------------------------------------------------------------
# Parameter init (deterministic, synthetic; weights bf16, biases f32)
# ----------------------------------------------------------------------------
def _linear_init(key, fin, fout):
    kw, kb = jax.random.split(key)
    w = (jax.random.normal(kw, (fin, fout), jnp.float32) / math.sqrt(fin)).astype(jnp.bfloat16)
    b = jax.random.normal(kb, (fout,), jnp.float32) * 0.01
    return w, b


def _conv_init(key, cin, cout):
    kw, kb = jax.random.split(key)
    w = (jax.random.normal(kw, (9, cin, cout), jnp.float32) / math.sqrt(9 * cin)).astype(jnp.bfloat16)
    b = jax.random.normal(kb, (cout,), jnp.float32) * 0.01
    return w, b


def _block_init(key, cin, cout, time_dim):
    ks = jax.random.split(key, 7)
    p = {}
    p['conv1_w'], p['conv1_b'] = _conv_init(ks[0], cin, cout)       # 3x3 conv
    p['conv2_w'], p['conv2_b'] = _conv_init(ks[1], cout, cout)      # 3x3 conv
    p['short_w'], p['short_b'] = _linear_init(ks[2], cin, cout)     # 1x1 shortcut
    p['tmlp_w'], p['tmlp_b'] = _linear_init(ks[3], time_dim, cout)  # time-emb MLP
    p['attn_wqkv'] = (jax.random.normal(ks[4], (cout, 3 * cout), jnp.float32)
                      / math.sqrt(cout)).astype(jnp.bfloat16)       # fused [Wq|Wk|Wv]
    p['attn_bqkv'] = jax.random.normal(ks[5], (1, 3 * cout), jnp.float32) * 0.01
    p['attn_wproj'], p['attn_bproj'] = _linear_init(ks[6], cout, cout)
    return p


def init_unet_params(key, cfg):
    ds = cfg['down_scale']
    keys = jax.random.split(key, 2 * ds + 4)
    it = iter(keys)
    params = {}
    params['conv1_w'], params['conv1_b'] = _conv_init(next(it), cfg['in_chans'], cfg['hidden_dim'])
    dim = cfg['hidden_dim']
    params['down'] = []
    for _ in range(ds):
        params['down'].append(_block_init(next(it), dim, dim * 2, cfg['time_dim']))
        dim *= 2
    params['mid1'] = _block_init(next(it), dim, dim * 2, cfg['time_dim'])
    params['mid2'] = _block_init(next(it), (dim * 2) + dim, dim, cfg['time_dim'])
    dim //= 2
    params['up'] = []
    for _ in range(ds):
        params['up'].append(_block_init(next(it), (dim * 2) + dim, dim, cfg['time_dim']))
        dim //= 2
    params['final_w'], params['final_b'] = _linear_init(next(it), dim * 2, cfg['out_chans'])
    return params


# ----------------------------------------------------------------------------
# Full forward pass
# ----------------------------------------------------------------------------
def unet_attn_forward(params, cfg, x_nchw, t):
    B, Cin, H, W = x_nchw.shape
    nh, qs, res = cfg['n_heads'], cfg['qk_scale'], cfg['residual']
    x = jnp.transpose(x_nchw, (0, 2, 3, 1)).astype(jnp.bfloat16).reshape(B, H * W, Cin)
    t_emb = pos_encoding(t, cfg['time_dim'])                             # (B, time_dim)

    # conv1 = CNNBlock(in_chans, hidden_dim): 3x3 conv + swish
    x = conv3x3_bias_act(x, H, W, params['conv1_w'], params['conv1_b'], apply_swish=True)
    hs = [x]
    for i, p in enumerate(params['down']):
        x = maxpool2x2(x, H, W); H //= 2; W //= 2
        x = _block_core(x, H, W, t_emb, p, cfg['is_attn'][i], True, nh, qs)
        hs.append(x)
    # middle_1 (downsampling mid block)
    x = maxpool2x2(x, H, W); H //= 2; W //= 2
    x = _block_core(x, H, W, t_emb, params['mid1'], cfg['is_attn'][-1], res, nh, qs)
    # middle_2 (upsample + skip concat)
    x = upsample2x(x, H, W); H *= 2; W *= 2
    x = jnp.concatenate([x, hs.pop()], axis=-1)
    x = _block_core(x, H, W, t_emb, params['mid2'], cfg['is_attn'][-1], True, nh, qs)
    for j, p in enumerate(params['up']):
        i = cfg['down_scale'] - 1 - j
        x = upsample2x(x, H, W); H *= 2; W *= 2
        x = jnp.concatenate([x, hs.pop()], axis=-1)
        x = _block_core(x, H, W, t_emb, p, cfg['is_attn'][i], True, nh, qs)

    Bx, N, C = x.shape
    out = gemm_bias_act(x.reshape(Bx * N, C), params['final_w'], params['final_b'],
                        apply_swish=False, out_dtype=jnp.float32)        # final 1x1 conv
    out = out.reshape(B, H, W, cfg['out_chans'])
    return jnp.transpose(out, (0, 3, 1, 2))                              # NHWC -> NCHW


# ----------------------------------------------------------------------------
if __name__ == "__main__":
    cfg = dict(in_chans=3, out_chans=3, hidden_dim=8, time_dim=32,
               n_heads=1, qk_scale=None, is_attn=[True, True, True],
               down_scale=2, residual=True)

    key = jax.random.PRNGKey(0)
    kp, kx, kt = jax.random.split(key, 3)
    params = init_unet_params(kp, cfg)

    B, H, W = 2, 16, 16
    x = jax.random.normal(kx, (B, cfg['in_chans'], H, W), jnp.float32)   # NCHW like PyTorch
    t = jax.random.randint(kt, (B,), 0, 1000).astype(jnp.float32)

    out = unet_attn_forward(params, cfg, x, t)
    out = jax.block_until_ready(out)
    assert out.shape == (B, cfg['out_chans'], H, W), out.shape
    assert bool(jnp.all(jnp.isfinite(out)))
    print("KERNEL_OK")
</pallas_src>

<mosaic_0001>
module attributes {stable_mosaic.version = 11 : i64} {
  func.func @_conv3x3_kernel(%arg0: i32, %arg1: i32, %arg2: memref<1x304x3xbf16, #tpu.memory_space<vmem>>, %arg3: memref<9x3x8xbf16, #tpu.memory_space<vmem>>, %arg4: memref<1x8xf32, #tpu.memory_space<vmem>>, %arg5: memref<1x256x8xbf16, #tpu.memory_space<vmem>>) attributes {dimension_semantics = [#tpu.dimension_semantics<parallel>, #tpu.dimension_semantics<parallel>], iteration_bounds = array<i64: 2, 1>, scalar_prefetch = 0 : i64, scratch_operands = 0 : i64, tpu.core_type = #tpu.core_type<tc>, window_params = [{transform_indices = @transform_0, window_bounds = array<i64: 1, 304, 3>}, {pipeline_mode = #tpu.pipeline_mode<synchronous>, transform_indices = @transform_1, window_bounds = array<i64: 9, 3, 8>}, {pipeline_mode = #tpu.pipeline_mode<synchronous>, transform_indices = @transform_2, window_bounds = array<i64: 1, 8>}, {transform_indices = @transform_3, window_bounds = array<i64: 1, 256, 8>}]} {
    %c0 = arith.constant 0 : index
    %c0_0 = arith.constant 0 : index
    %c0_1 = arith.constant 0 : index
    %0 = vector.load %arg2[%c0, %c0_0, %c0_1] : memref<1x304x3xbf16, #tpu.memory_space<vmem>>, vector<1x304x3xbf16>
    %1 = vector.shape_cast %0 : vector<1x304x3xbf16> to vector<304x3xbf16>
    %2 = tpu.iota {dimensions = array<i32: 0>} : vector<256x1xi32>
    %c16_i32 = arith.constant 16 : i32
    %c0_i32 = arith.constant 0 : i32
    %3 = arith.cmpi eq, %c16_i32, %c0_i32 : i32
    %c1_i32 = arith.constant 1 : i32
    %4 = arith.select %3, %c1_i32, %c16_i32 : i32
    %5 = vector.broadcast %4 : i32 to vector<256x1xi32>
    %6 = arith.remsi %2, %5 : vector<256x1xi32>
    %c0_i32_2 = arith.constant 0 : i32
    %7 = vector.broadcast %c0_i32_2 : i32 to vector<256x1xi32>
    %8 = arith.cmpi ne, %6, %7 : vector<256x1xi32>
    %c0_i32_3 = arith.constant 0 : i32
    %9 = vector.broadcast %c0_i32_3 : i32 to vector<256x1xi32>
    %10 = arith.cmpi slt, %6, %9 : vector<256x1xi32>
    %c0_i32_4 = arith.constant 0 : i32
    %11 = arith.cmpi slt, %4, %c0_i32_4 : i32
    %12 = vector.broadcast %11 : i1 to vector<256x1xi1>
    %13 = vector.broadcast %12 : vector<256x1xi1> to vector<256x1xi1>
    %14 = arith.xori %10, %13 : vector<256x1xi1>
    %15 = arith.andi %14, %8 : vector<256x1xi1>
    %16 = vector.broadcast %4 : i32 to vector<256x1xi32>
    %17 = arith.addi %6, %16 : vector<256x1xi32>
    %18 = arith.select %15, %17, %6 : vector<256x1xi1>, vector<256x1xi32>
    %cst = arith.constant 0.000000e+00 : f32
    %19 = vector.broadcast %cst : f32 to vector<256x8xf32>
    %20 = vector.extract_strided_slice %1 {offsets = [7, 0], sizes = [256, 3], strides = [1, 1]} : vector<304x3xbf16> to vector<256x3xbf16>
    %c0_i32_5 = arith.constant 0 : i32
    %21 = vector.broadcast %c0_i32_5 : i32 to vector<256x1xi32>
    %22 = arith.cmpi sgt, %18, %21 : vector<256x1xi32>
    %c0_i32_6 = arith.constant 0 : i32
    %23 = arith.sitofp %c0_i32_6 : i32 to bf16
    %24 = vector.shape_cast %22 : vector<256x1xi1> to vector<256x1xi1>
    %25 = vector.broadcast %24 : vector<256x1xi1> to vector<256x3xi1>
    %26 = vector.broadcast %23 : bf16 to vector<256x3xbf16>
    %27 = arith.select %25, %20, %26 : vector<256x3xi1>, vector<256x3xbf16>
    %c0_7 = arith.constant 0 : index
    %c0_8 = arith.constant 0 : index
    %c0_9 = arith.constant 0 : index
    %28 = vector.load %arg3[%c0_7, %c0_8, %c0_9] : memref<9x3x8xbf16, #tpu.memory_space<vmem>>, vector<1x3x8xbf16>
    %29 = vector.shape_cast %28 : vector<1x3x8xbf16> to vector<3x8xbf16>
    %cst_10 = arith.constant dense<0.000000e+00> : vector<256x8xf32>
    %30 = tpu.matmul %27, %29, %cst_10 {dimension_numbers = #tpu.dot_dimension_numbers<[1], [0], [0], [1], [0, 0, 1, 1], [], []>} : vector<256x3xbf16>, vector<3x8xbf16>, vector<256x8xf32> -> vector<256x8xf32>
    %31 = arith.addf %19, %30 : vector<256x8xf32>
    %32 = vector.extract_strided_slice %1 {offsets = [8, 0], sizes = [256, 3], strides = [1, 1]} : vector<304x3xbf16> to vector<256x3xbf16>
    %c1 = arith.constant 1 : index
    %c0_11 = arith.constant 0 : index
    %c0_12 = arith.constant 0 : index
    %33 = vector.load %arg3[%c1, %c0_11, %c0_12] : memref<9x3x8xbf16, #tpu.memory_space<vmem>>, vector<1x3x8xbf16>
    %34 = vector.shape_cast %33 : vector<1x3x8xbf16> to vector<3x8xbf16>
    %cst_13 = arith.constant dense<0.000000e+00> : vector<256x8xf32>
    %35 = tpu.matmul %32, %34, %cst_13 {dimension_numbers = #tpu.dot_dimension_numbers<[1], [0], [0], [1], [0, 0, 1, 1], [], []>} : vector<256x3xbf16>, vector<3x8xbf16>, vector<256x8xf32> -> vector<256x8xf32>
    %36 = arith.addf %31, %35 : vector<256x8xf32>
    %37 = vector.extract_strided_slice %1 {offsets = [9, 0], sizes = [256, 3], strides = [1, 1]} : vector<304x3xbf16> to vector<256x3xbf16>
    %c15_i32 = arith.constant 15 : i32
    %38 = vector.broadcast %c15_i32 : i32 to vector<256x1xi32>
    %39 = arith.cmpi slt, %18, %38 : vector<256x1xi32>
    %c0_i32_14 = arith.constant 0 : i32
    %40 = arith.sitofp %c0_i32_14 : i32 to bf16
    %41 = vector.shape_cast %39 : vector<256x1xi1> to vector<256x1xi1>
    %42 = vector.broadcast %41 : vector<256x1xi1> to vector<256x3xi1>
    %43 = vector.broadcast %40 : bf16 to vector<256x3xbf16>
    %44 = arith.select %42, %37, %43 : vector<256x3xi1>, vector<256x3xbf16>
    %c2 = arith.constant 2 : index
    %c0_15 = arith.constant 0 : index
    %c0_16 = arith.constant 0 : index
    %45 = vector.load %arg3[%c2, %c0_15, %c0_16] : memref<9x3x8xbf16, #tpu.memory_space<vmem>>, vector<1x3x8xbf16>
    %46 = vector.shape_cast %45 : vector<1x3x8xbf16> to vector<3x8xbf16>
    %cst_17 = arith.constant dense<0.000000e+00> : vector<256x8xf32>
    %47 = tpu.matmul %44, %46, %cst_17 {dimension_numbers = #tpu.dot_dimension_numbers<[1], [0], [0], [1], [0, 0, 1, 1], [], []>} : vector<256x3xbf16>, vector<3x8xbf16>, vector<256x8xf32> -> vector<256x8xf32>
    %48 = arith.addf %36, %47 : vector<256x8xf32>
    %49 = vector.extract_strided_slice %1 {offsets = [23, 0], sizes = [256, 3], strides = [1, 1]} : vector<304x3xbf16> to vector<256x3xbf16>
    %c0_i32_18 = arith.constant 0 : i32
    %50 = vector.broadcast %c0_i32_18 : i32 to vector<256x1xi32>
    %51 = arith.cmpi sgt, %18, %50 : vector<256x1xi32>
    %c0_i32_19 = arith.constant 0 : i32
    %52 = arith.sitofp %c0_i32_19 : i32 to bf16
    %53 = vector.shape_cast %51 : vector<256x1xi1> to vector<256x1xi1>
    %54 = vector.broadcast %53 : vector<256x1xi1> to vector<256x3xi1>
    %55 = vector.broadcast %52 : bf16 to vector<256x3xbf16>
    %56 = arith.select %54, %49, %55 : vector<256x3xi1>, vector<256x3xbf16>
    %c3 = arith.constant 3 : index
    %c0_20 = arith.constant 0 : index
    %c0_21 = arith.constant 0 : index
    %57 = vector.load %arg3[%c3, %c0_20, %c0_21] : memref<9x3x8xbf16, #tpu.memory_space<vmem>>, vector<1x3x8xbf16>
    %58 = vector.shape_cast %57 : vector<1x3x8xbf16> to vector<3x8xbf16>
    %cst_22 = arith.constant dense<0.000000e+00> : vector<256x8xf32>
    %59 = tpu.matmul %56, %58, %cst_22 {dimension_numbers = #tpu.dot_dimension_numbers<[1], [0], [0], [1], [0, 0, 1, 1], [], []>} : vector<256x3xbf16>, vector<3x8xbf16>, vector<256x8xf32> -> vector<256x8xf32>
    %60 = arith.addf %48, %59 : vector<256x8xf32>
    %61 = vector.extract_strided_slice %1 {offsets = [24, 0], sizes = [256, 3], strides = [1, 1]} : vector<304x3xbf16> to vector<256x3xbf16>
    %c4 = arith.constant 4 : index
    %c0_23 = arith.constant 0 : index
    %c0_24 = arith.constant 0 : index
    %62 = vector.load %arg3[%c4, %c0_23, %c0_24] : memref<9x3x8xbf16, #tpu.memory_space<vmem>>, vector<1x3x8xbf16>
    %63 = vector.shape_cast %62 : vector<1x3x8xbf16> to vector<3x8xbf16>
    %cst_25 = arith.constant dense<0.000000e+00> : vector<256x8xf32>
    %64 = tpu.matmul %61, %63, %cst_25 {dimension_numbers = #tpu.dot_dimension_numbers<[1], [0], [0], [1], [0, 0, 1, 1], [], []>} : vector<256x3xbf16>, vector<3x8xbf16>, vector<256x8xf32> -> vector<256x8xf32>
    %65 = arith.addf %60, %64 : vector<256x8xf32>
    %66 = vector.extract_strided_slice %1 {offsets = [25, 0], sizes = [256, 3], strides = [1, 1]} : vector<304x3xbf16> to vector<256x3xbf16>
    %c15_i32_26 = arith.constant 15 : i32
    %67 = vector.broadcast %c15_i32_26 : i32 to vector<256x1xi32>
    %68 = arith.cmpi slt, %18, %67 : vector<256x1xi32>
    %c0_i32_27 = arith.constant 0 : i32
    %69 = arith.sitofp %c0_i32_27 : i32 to bf16
    %70 = vector.shape_cast %68 : vector<256x1xi1> to vector<256x1xi1>
    %71 = vector.broadcast %70 : vector<256x1xi1> to vector<256x3xi1>
    %72 = vector.broadcast %69 : bf16 to vector<256x3xbf16>
    %73 = arith.select %71, %66, %72 : vector<256x3xi1>, vector<256x3xbf16>
    %c5 = arith.constant 5 : index
    %c0_28 = arith.constant 0 : index
    %c0_29 = arith.constant 0 : index
    %74 = vector.load %arg3[%c5, %c0_28, %c0_29] : memref<9x3x8xbf16, #tpu.memory_space<vmem>>, vector<1x3x8xbf16>
    %75 = vector.shape_cast %74 : vector<1x3x8xbf16> to vector<3x8xbf16>
    %cst_30 = arith.constant dense<0.000000e+00> : vector<256x8xf32>
    %76 = tpu.matmul %73, %75, %cst_30 {dimension_numbers = #tpu.dot_dimension_numbers<[1], [0], [0], [1], [0, 0, 1, 1], [], []>} : vector<256x3xbf16>, vector<3x8xbf16>, vector<256x8xf32> -> vector<256x8xf32>
    %77 = arith.addf %65, %76 : vector<256x8xf32>
    %78 = vector.extract_strided_slice %1 {offsets = [39, 0], sizes = [256, 3], strides = [1, 1]} : vector<304x3xbf16> to vector<256x3xbf16>
    %c0_i32_31 = arith.constant 0 : i32
    %79 = vector.broadcast %c0_i32_31 : i32 to vector<256x1xi32>
    %80 = arith.cmpi sgt, %18, %79 : vector<256x1xi32>
    %c0_i32_32 = arith.constant 0 : i32
    %81 = arith.sitofp %c0_i32_32 : i32 to bf16
    %82 = vector.shape_cast %80 : vector<256x1xi1> to vector<256x1xi1>
    %83 = vector.broadcast %82 : vector<256x1xi1> to vector<256x3xi1>
    %84 = vector.broadcast %81 : bf16 to vector<256x3xbf16>
    %85 = arith.select %83, %78, %84 : vector<256x3xi1>, vector<256x3xbf16>
    %c6 = arith.constant 6 : index
    %c0_33 = arith.constant 0 : index
    %c0_34 = arith.constant 0 : index
    %86 = vector.load %arg3[%c6, %c0_33, %c0_34] : memref<9x3x8xbf16, #tpu.memory_space<vmem>>, vector<1x3x8xbf16>
    %87 = vector.shape_cast %86 : vector<1x3x8xbf16> to vector<3x8xbf16>
    %cst_35 = arith.constant dense<0.000000e+00> : vector<256x8xf32>
    %88 = tpu.matmul %85, %87, %cst_35 {dimension_numbers = #tpu.dot_dimension_numbers<[1], [0], [0], [1], [0, 0, 1, 1], [], []>} : vector<256x3xbf16>, vector<3x8xbf16>, vector<256x8xf32> -> vector<256x8xf32>
    %89 = arith.addf %77, %88 : vector<256x8xf32>
    %90 = vector.extract_strided_slice %1 {offsets = [40, 0], sizes = [256, 3], strides = [1, 1]} : vector<304x3xbf16> to vector<256x3xbf16>
    %c7 = arith.constant 7 : index
    %c0_36 = arith.constant 0 : index
    %c0_37 = arith.constant 0 : index
    %91 = vector.load %arg3[%c7, %c0_36, %c0_37] : memref<9x3x8xbf16, #tpu.memory_space<vmem>>, vector<1x3x8xbf16>
    %92 = vector.shape_cast %91 : vector<1x3x8xbf16> to vector<3x8xbf16>
    %cst_38 = arith.constant dense<0.000000e+00> : vector<256x8xf32>
    %93 = tpu.matmul %90, %92, %cst_38 {dimension_numbers = #tpu.dot_dimension_numbers<[1], [0], [0], [1], [0, 0, 1, 1], [], []>} : vector<256x3xbf16>, vector<3x8xbf16>, vector<256x8xf32> -> vector<256x8xf32>
    %94 = arith.addf %89, %93 : vector<256x8xf32>
    %95 = vector.extract_strided_slice %1 {offsets = [41, 0], sizes = [256, 3], strides = [1, 1]} : vector<304x3xbf16> to vector<256x3xbf16>
    %c15_i32_39 = arith.constant 15 : i32
    %96 = vector.broadcast %c15_i32_39 : i32 to vector<256x1xi32>
    %97 = arith.cmpi slt, %18, %96 : vector<256x1xi32>
    %c0_i32_40 = arith.constant 0 : i32
    %98 = arith.sitofp %c0_i32_40 : i32 to bf16
    %99 = vector.shape_cast %97 : vector<256x1xi1> to vector<256x1xi1>
    %100 = vector.broadcast %99 : vector<256x1xi1> to vector<256x3xi1>
    %101 = vector.broadcast %98 : bf16 to vector<256x3xbf16>
    %102 = arith.select %100, %95, %101 : vector<256x3xi1>, vector<256x3xbf16>
    %c8 = arith.constant 8 : index
    %c0_41 = arith.constant 0 : index
    %c0_42 = arith.constant 0 : index
    %103 = vector.load %arg3[%c8, %c0_41, %c0_42] : memref<9x3x8xbf16, #tpu.memory_space<vmem>>, vector<1x3x8xbf16>
    %104 = vector.shape_cast %103 : vector<1x3x8xbf16> to vector<3x8xbf16>
    %cst_43 = arith.constant dense<0.000000e+00> : vector<256x8xf32>
    %105 = tpu.matmul %102, %104, %cst_43 {dimension_numbers = #tpu.dot_dimension_numbers<[1], [0], [0], [1], [0, 0, 1, 1], [], []>} : vector<256x3xbf16>, vector<3x8xbf16>, vector<256x8xf32> -> vector<256x8xf32>
    %106 = arith.addf %94, %105 : vector<256x8xf32>
    %c0_44 = arith.constant 0 : index
    %c0_45 = arith.constant 0 : index
    %107 = vector.load %arg4[%c0_44, %c0_45] : memref<1x8xf32, #tpu.memory_space<vmem>>, vector<1x8xf32>
    %108 = vector.broadcast %107 : vector<1x8xf32> to vector<256x8xf32>
    %109 = arith.addf %106, %108 : vector<256x8xf32>
    %110 = arith.negf %109 : vector<256x8xf32>
    %111 = math.exp %110 : vector<256x8xf32>
    %cst_46 = arith.constant 1.000000e+00 : f32
    %112 = vector.broadcast %cst_46 : f32 to vector<256x8xf32>
    %113 = arith.addf %112, %111 : vector<256x8xf32>
    %114 = arith.divf %112, %113 : vector<256x8xf32>
    %115 = arith.mulf %109, %114 : vector<256x8xf32>
    %116 = arith.truncf %115 : vector<256x8xf32> to vector<256x8xbf16>
    %c0_47 = arith.constant 0 : index
    %c0_48 = arith.constant 0 : index
    %c0_49 = arith.constant 0 : index
    %117 = vector.load %arg5[%c0_47, %c0_48, %c0_49] : memref<1x256x8xbf16, #tpu.memory_space<vmem>>, vector<1x256x8xbf16>
    %118 = vector.shape_cast %117 : vector<1x256x8xbf16> to vector<256x8xbf16>
    %119 = vector.shape_cast %116 : vector<256x8xbf16> to vector<1x256x8xbf16>
    tpu.vector_store %arg5[%c0_47, %c0_48, %c0_49], %119 {strides = array<i32>} : memref<1x256x8xbf16, #tpu.memory_space<vmem>>, vector<1x256x8xbf16>,
    return
  }
  func.func @transform_0(%arg0: i32, %arg1: i32) -> (i32, i32, i32) {
    %c0_i32 = arith.constant 0 : i32
    %c0_i32_0 = arith.constant 0 : i32
    %c0_i32_1 = arith.constant 0 : i32
    return %arg0, %c0_i32, %c0_i32_0 : i32, i32, i32
  }
  func.func @transform_1(%arg0: i32, %arg1: i32) -> (i32, i32, i32) {
    %c0_i32 = arith.constant 0 : i32
    %c0_i32_0 = arith.constant 0 : i32
    %c0_i32_1 = arith.constant 0 : i32
    %c0_i32_2 = arith.constant 0 : i32
    return %c0_i32, %c0_i32_0, %c0_i32_1 : i32, i32, i32
  }
  func.func @transform_2(%arg0: i32, %arg1: i32) -> (i32, i32) {
    %c0_i32 = arith.constant 0 : i32
    %c0_i32_0 = arith.constant 0 : i32
    %c0_i32_1 = arith.constant 0 : i32
    return %c0_i32, %c0_i32_0 : i32, i32
  }
  func.func @transform_3(%arg0: i32, %arg1: i32) -> (i32, i32, i32) {
    %c0_i32 = arith.constant 0 : i32
    %c0_i32_0 = arith.constant 0 : i32
    return %arg0, %arg1, %c0_i32 : i32, i32, i32
  }
}

</mosaic_0001>

<bundles_post_ra>
// kernel: tpu_custom_call.1
= control target key start
LH: loop header
LB: loop body
LE: loop exit
PB: predicated region body
PF: predicated region fallthrough
CT: control target
= control target key end

     0   :  { %s7239_s12 = smov 0   ;;  %s7241_s13 = smov 0   ;;  %s9392_s0 = inlined_call_operand.vmem [shape: bf16[2,304,3], index: 0, kind: input, shape index: {}]   ;;  %s9393_s1 = inlined_call_operand.vmem [shape: bf16[9,3,8], index: 1, kind: input, shape index: {}]   ;;  %s9394_s2 = inlined_call_operand.vmem [shape: f32[1,8], index: 2, kind: input, shape index: {}]   ;;  %s9395_s3 = inlined_call_operand.vmem [shape: bf16[2,256,8], index: 3, kind: output, shape index: {}]  }
   0x1   :  { %s7243_s14 = smov 0  }
   0x2 LB: > { %s25_s15 = sadd.s32 1, %s7210_s13  ;;  %p5863_p0 = scmp.ge.s32.totalorder %s7214_s14, 1  ;;  %s7214_s14 = sphi %s7243_s14, %s13_s14   ;;  %s7210_s13 = sphi %s7241_s13, %s10217_s13   ;;  %s7206_s12 = sphi %s7239_s12, %s10216_s12  }
   0x3   : > { %p27_p1 = scmp.ge.s32.totalorder %s25_s15, 2  ;;  %p151_p2 = scmp.lt.s32.totalorder %s7214_s14, 3 }
   0x5   : > { %s10219_s15 = smov (%p27_p1, %s25_s15), 0  ;;  %p152_p3 = pnand %p5863_p0, %p151_p2 }
   0x7   : > { %155 = sbr.rel (%p152_p3) target bundleno = 695 (0x2b7), region = 32 }
   0xe   : > { %v5867_v0 = vld [vmem:[%s9393_s1 + $0x2] sm:$0x3]  ;;  %vm1332_vm0 = vcmask 1040384   ;;  %vm1333_vm1 = vcmask 1041408   ;;  %p179_p4 = scmp.lt.s32.totalorder %s7206_s12, 1  ;;  %v235_v1 = vlaneseq  ;;  %v7216_v2 = vmov 65535  }
   0xf   : > { %v1334_v3 = vsel %vm1332_vm0, 4294967295, %v7216_v2  ;;  %v6001_v4 = vld [vmem:[%s9393_s1 + $0x8] sm:$0x3]  ;;  %vm7217_vm2 = vmmov 1   ;;  %v9399_v9 = vmov 0   ;;  %vm9448_vm4 = vcmask 23552  }
  0x10   : > { %v7263_v5 = vsel %vm1333_vm1, %v1334_v3, 0  ;;  %s10221_s12 = smov (!%p179_p4, %s7206_s12), 1  ;;  %v7267_v6 = vshrl.u32 %v235_v1, 7  ;;  %vm749_vm3 = vmpackc.low %vm7217_vm2, %vm7217_vm2  ;;  %v1200_v11 = vld [vmem:[%s9393_s1] sm:$0x3]  ;;  %v9625_v63 = vmov 0 }
  0x11   : > { %v1337_v7 = vand.u32 %v5867_v0, %v7263_v5  ;;  %v7271_v8 = vand.u32 %v6001_v4, %v7263_v5  ;;  %v781_v10 = vsel %vm749_vm3, 65537, %v9399_v9  ;;  %s6956_s22 = smul.u32 152, %s10221_s12  ;;  %vm812_vm5 = vsmask.f32 3328  ;;  %v6019_v22 = vld [vmem:[%s9393_s1 + $0xa] sm:$0x3] }
  0x12   : > { %v237_v12 = vadd.s32 8, %v7267_v6  ;;  %v238_v13 = vadd.s32 16, %v7267_v6  ;;  %v272_v14 = vand.u32 15, %v7267_v6  ;;  %v825_v15 = vshll.u32 %v781_v10, 16  ;;  %s6206_s17 = sshll.u32 %s10221_s12, 7 }
  0x13   : > { %9615 = vst [vmem:[#allocation2_spill] sm:$0xff] %v7271_v8  ;;  %6392 = vmatprep.subr.bf16.mxu1 %v1337_v7  ;;  %6528 = vmatprep.subr.bf16.mxu0 %v7271_v8  ;;  %vm813_vm6 = vsmask.f32 7440  ;;  %v829_v16 = vshrl.u32 %v781_v10, 16  ;;  %v7283_v17 = vand.u32 %v7263_v5, %v1200_v11  ;;  %s7289_s25 = scalar_lea.vmem %s9392_s0, %s6956_s22  ;;  %vm2108_vm8 = vsmask.f32 256  ;;  %s9221_s19 = scalar_lea.vmem %s9395_s3, %s6206_s17 }
  0x14   : > { %6393 = vmatpush3.bf16.msra.mxu1 %v1337_v7  ;;  %6529 = vmatpush3.bf16.msra.mxu0 %v7271_v8  ;;  %v279_v18 = vand.u32 15, %v237_v12  ;;  %v286_v19 = vand.u32 15, %v238_v13  ;;  %vm7291_vm7 = vcmp.gt.s32.totalorder %v272_v14, 0  ;;  %v7295_v21 = vrot.slane %v825_v15, 5  ;;  %v7301_v23 = vld [vmem:[%s7289_s25 + $0x4] sm:$0xf]  ;;  %vm7337_vm15 = vmor %vm812_vm5, %vm813_vm6 }
  0x15   : > { %v7304_v24 = vld [vmem:[%s7289_s25 + $0x8] sm:$0xf]  ;;  %6426 = vmatprep.subr.bf16.mxu1 %v7283_v17  ;;  %v7308_v25 = vand.u32 %v6019_v22, %v7263_v5  ;;  %v7311_v26 = vld [vmem:[%s7289_s25 + $0x14] sm:$0xf]  ;;  %vm748_vm10 = vmpackc.low %vm7291_vm7, %vm7291_vm7  ;;  %v831_v27 = vrot.slane %v829_v16, 4  ;;  %v2114_v31 = vrot.slane %v829_v16, 7 }
  0x16   : > { %9618 = vst [vmem:[#allocation3_spill] sm:$0xff] %v7311_v26  ;;  %vm654_vm9 = vcmp.gt.s32.totalorder %v286_v19, 0  ;;  %v5868_v28 = vcombine.low %v7301_v23, %v7304_v24  ;;  %vm2109_vm11 = vsmask.f32 4368  ;;  %v7319_v29 = vld [vmem:[%s7289_s25 + $0x18] sm:$0xf] }
  0x17   : > { %9619 = vst [vmem:[#allocation4_spill] sm:$0xff] %v7319_v29  ;;  %vm750_vm12 = vmpackc.low %vm654_vm9, %vm654_vm9  ;;  %v780_v30 = vsel %vm748_vm10, 65537, %v9399_v9  ;;  %vm1949_vm13 = vcmp.lt.s32.totalorder %v279_v18, 15  ;;  %6562 = vmatprep.subr.bf16.mxu0 %v7308_v25  ;;  %v832_v35 = vor.u32 %v831_v27, %v7295_v21  ;;  %v7327_v36 = vld [vmem:[%s7289_s25 + $0xc] sm:$0xf]  ;;  %v7330_v40 = vor.u32 %v2114_v31, %v825_v15 }
  0x18   : > { %v782_v32 = vsel %vm750_vm12, 65537, %v9399_v9  ;;  %v816_v33 = vshll.u32 %v780_v30, 16  ;;  %v819_v34 = vshrl.u32 %v780_v30, 16  ;;  %6394 = vmatprep.mubr.msk.bf16.mxu1 %vm9448_vm4, %v5868_v28  ;;  %vm2045_vm14 = vmpackc.low %vm1949_vm13, %vm1949_vm13  ;;  %v7333_v41 = vld [vmem:[%s7289_s25 + $0x10] sm:$0xf]  ;;  %v7347_v46 = vcombine.low %v7311_v26, %v7319_v29 }
  0x19   : > { %v835_v37 = vshll.u32 %v782_v32, 16  ;;  %v839_v38 = vshrl.u32 %v782_v32, 16  ;;  %v2077_v39 = vsel %vm2045_vm14, 65537, %v9399_v9  ;;  %v7343_v45 = vrot.slane %v832_v35, 4  ;;  %v197_v47 = vld [vmem:[%s7289_s25] sm:$0xf]  ;;  %vm7380_vm3 = vmor %vm2108_vm8, %vm2109_vm11 }
  0x1a   : > { %v7341_v43 = vrot.slane %v816_v33, 5  ;;  %v821_v44 = vrot.slane %v819_v34, 4  ;;  %9624 = vst [vmem:[#allocation7_spill] sm:$0xff] %v7347_v46  ;;  %v2120_v50 = vshrl.u32 %v2077_v39, 16  ;;  %v2123_v51 = vshll.u32 %v2077_v39, 16 }
  0x1b   : > { %9623 = vst [vmem:[#allocation6_spill] sm:$0xff] %v7343_v45  ;;  %v837_v48 = vrot.slane %v835_v37, 5  ;;  %v841_v49 = vrot.slane %v839_v38, 4  ;;  %v7352_v53 = vrot.slane %v2114_v31, 4  ;;  %v5869_v54 = vcombine.low %v7327_v36, %v7333_v41  ;;  %v7357_v55 = vld [vmem:[%s7289_s25 + $0x1c] sm:$0xf] }
  0x1c   : > { %9622 = vst [vmem:[#allocation5_spill] sm:$0xff] %v7341_v43  ;;  %v822_v52 = vor.u32 %v821_v44, %v7341_v43  ;;  %vm9439_vm0 = vcmp.ne.s16.totalorder %v7341_v43, 0  ;;  %v7360_v56 = vld [vmem:[%s7289_s25 + $0x20] sm:$0xf]  ;;  %v2122_v59 = vrot.slane %v2120_v50, 7  ;;  %vm2398_vm1 = vcmp.ne.s16.totalorder %v7330_v40, 0 }
  0x1d   : > { %v838_v57 = vsel %vm7337_vm15, %v7343_v45, %v837_v48  ;;  %v842_v58 = vor.u32 %v841_v49, %v837_v48  ;;  %v7367_v60 = vld [vmem:[%s7289_s25 + $0x24] sm:$0xf]  ;;  %v7370_v61 = vld [vmem:[%s7289_s25 + $0x28] sm:$0xf]  ;;  %v1167_v0 = vsel %vm9439_vm0, %v197_v47, 0  ;;  %v2431_v2 = vsel %vm2398_vm1, %v7301_v23, 0  ;;  %6530 = vmatprep.mubr.msk.bf16.mxu0 %vm9448_vm4, %v5869_v54  ;;  %6395 = vmatmul.mubr.msk.bf16.vlgmr.msra.gmra.mrb[0].mxu1 %vm9448_vm4, %v5869_v54 }
  0x1e   : > { %v823_v62 = vrot.slane %v822_v52, 4  ;;  %vm7372_vm2 = vcmp.ne.s16.totalorder %v838_v57, 0  ;;  %v7390_v3 = vld [vmem:[%s7289_s25 + $0x2c] sm:$0xf]  ;;  %v2125_v4 = vor.u32 %v2123_v51, %v2122_v59  ;;  %6427 = vmatpush3.bf16.msra.mxu1 %v7283_v17  ;;  %6531 = vmatmul.mubr.msk.bf16.vlgmr.msra.gmra.mrb[0].mxu0 %vm9448_vm4, %v7347_v46  ;;  %v7396_v7 = vld [vmem:[%s7289_s25 + $0x30] sm:$0xf]  ;;  %v7417_v15 = vcombine.low %v7357_v55, %v7360_v56 }
  0x1f   : > { %v9626_v63 = vsel %vm7372_vm2, 4294967295, %v9625_v63  ;;  %v7399_v10 = vld [vmem:[%s7289_s25 + $0x34] sm:$0xf]  ;;  %v7402_v11 = vld [vmem:[%s7289_s25 + $0x38] sm:$0xf]  ;;  %v7407_v13 = vrot.slane %v842_v58, 4  ;;  %6563 = vmatpush3.bf16.msra.mxu0 %v7308_v25  ;;  %6398 = vmatprep.mubr.msk.bf16.mxu1 %vm9448_vm4, %v7347_v46  ;;  %v7431_v19 = vcombine.low %v7367_v60, %v7370_v61  ;;  %v7447_v27 = vcombine.low %v7390_v3, %v7396_v7 }
  0x20   : > { %9627 = vst [vmem:[#allocation8_spill] sm:$0xff] %v9626_v63  ;;  %v828_v12 = vsel %vm7337_vm15, %v823_v62, %v7295_v21  ;;  %9630 = vst [vmem:[#allocation9_spill] sm:$0xff] %v7417_v15  ;;  %v9631_v16 = vmov 0  ;;  %v2126_v17 = vsel %vm7380_vm3, %v7352_v53, %v2125_v4  ;;  %v4860_v18 = vsel %vm2398_vm1, %v7311_v26, 0  ;;  %v7434_v20 = vld [vmem:[%s7289_s25 + $0x3c] sm:$0xf]  ;;  %6534 = vmatprep.mubr.msk.bf16.mxu0 %vm9448_vm4, %v7417_v15 }
  0x21   : > { %vm7419_vm5 = vcmp.ne.s16.totalorder %v828_v12, 0  ;;  %9634 = vst [vmem:[#allocation11_spill] sm:$0xff] %v7431_v19  ;;  %vm7439_vm6 = vcmp.ne.s16.totalorder %v2126_v17, 0  ;;  %9637 = vst [vmem:[#allocation12_spill] sm:$0xff] %v7447_v27  ;;  %v7451_v28 = vcombine.low %v7399_v10, %v7402_v11  ;;  %v7454_v30 = vld [vmem:[%s7289_s25 + $0x40] sm:$0xf] }
  0x22   : > { %v9632_v16 = vsel %vm7419_vm5, 4294967295, %v9631_v16  ;;  %v1168_v22 = vsel %vm7419_vm5, %v7301_v23, 0  ;;  %v7457_v31 = vld [vmem:[%s7289_s25 + $0x44] sm:$0xf]  ;;  %v2432_v32 = vsel %vm7439_vm6, %v7304_v24, 0  ;;  %v4861_v34 = vsel %vm7439_vm6, %v7319_v29, 0 }
  0x23   : > { %9633 = vst [vmem:[#allocation10_spill] sm:$0xff] %v9632_v16  ;;  %9638 = vst [vmem:[#allocation13_spill] sm:$0xff] %v7451_v28  ;;  %v5900_v23 = vcombine.low %v1167_v0, %v1168_v22  ;;  %v7469_v35 = vld [vmem:[%s7289_s25 + $0x48] sm:$0xf]  ;;  %v7471_v37 = vcombine.low %v2431_v2, %v2432_v32  ;;  %v7473_v38 = vcombine.low %v4860_v18, %v4861_v34  ;;  %v239_v39 = vadd.s32 24, %v7267_v6 }
  0x24   : > { %v2127_v44 = vrot.slane %v2122_v59, 4  ;;  %v6053_v47 = vld [vmem:[%s9393_s1 + $0xc] sm:$0x3]  ;;  %v7481_v50 = vcombine.low %v7434_v20, %v7454_v30  ;;  %v3646_v51 = vsel %vm2398_vm1, %v7327_v36, 0  ;;  %v7494_v57 = vcombine.low %v7457_v31, %v7469_v35  ;;  %v7502_v62 = vld [vmem:[%s7289_s25 + $0x50] sm:$0xf] }
  0x25   : > { %9639 = vst [vmem:[#allocation14_spill] sm:$0xff] %v7471_v37  ;;  %9640 = vst [vmem:[#allocation15_spill] sm:$0xff] %v7473_v38  ;;  %v1585_v48 = vshrl.u32 %v5900_v23, 16  ;;  %v1588_v49 = vshll.u32 %v5900_v23, 16  ;;  %v7487_v52 = vld [vmem:[%s7289_s25 + $0x4c] sm:$0xf]  ;;  %6399 = vmatmul.mubr.msk.bf16.gmra.mrb[4].mxu1 %vm9448_vm4, %v7417_v15  ;;  %v7534_v34 = vand.u32 %v6053_v47, %v7263_v5 }
  0x26   : > { %9641 = vst [vmem:[#allocation16_spill] sm:$0xff] %v7481_v50  ;;  %v2553_v54 = vshll.u32 %v7471_v37, 16  ;;  %9642 = vst [vmem:[#allocation17_spill] sm:$0xff] %v7494_v57  ;;  %v293_v58 = vand.u32 15, %v239_v39  ;;  %v7499_v59 = vsel %vm7380_vm3, %v2127_v44, %v7330_v40  ;;  %v7505_v0 = vld [vmem:[%s7289_s25 + $0x54] sm:$0xf]  ;;  %6535 = vmatmul.mubr.msk.bf16.gmra.mrb[4].mxu0 %vm9448_vm4, %v7431_v19  ;;  %6402 = vmatprep.mubr.msk.bf16.mxu1 %vm9448_vm4, %v7431_v19 }
  0x27   : > { %9643 = vst [vmem:[#allocation18_spill] sm:$0xff] %v7499_v59  ;;  %v7507_v2 = vrot.slane %v1585_v48, 3  ;;  %vm9437_vm7 = vcmp.ne.s16.totalorder %v7499_v59, 0  ;;  %v3647_v12 = vsel %vm7439_vm6, %v7333_v41, 0  ;;  %v7519_v17 = vld [vmem:[%s7289_s25 + $0x58] sm:$0xf]  ;;  %6538 = vmatprep.mubr.msk.bf16.mxu0 %vm9448_vm4, %v7447_v27  ;;  %v7538_v39 = vcombine.low %v7487_v52, %v7502_v62  ;;  %6596 = vmatprep.subr.bf16.mxu0 %v7534_v34 }
  0x28   : > { %v7521_v18 = vrot.slane %v1588_v49, 4  ;;  %v7523_v22 = vrot.slane %v2553_v54, 1  ;;  %vm1951_vm8 = vcmp.lt.s32.totalorder %v293_v58, 15  ;;  %v6020_v23 = vcombine.low %v3646_v51, %v3647_v12  ;;  %v7528_v32 = vld [vmem:[%s7289_s25 + $0x5c] sm:$0xf] }
  0x29   : > { %vm2047_vm9 = vmpackc.low %vm1951_vm8, %vm1951_vm8  ;;  %v3648_v25 = vsel %vm9437_vm7, %v7311_v26, 0  ;;  %9645 = vst [vmem:[#allocation20_spill] sm:$0xff] %v7538_v39  ;;  %v241_v44 = vadd.s32 40, %v7267_v6  ;;  %v7542_v48 = vld [vmem:[%s7289_s25 + $0x60] sm:$0xf]  ;;  %v243_v12 = vadd.s32 56, %v7267_v6  ;;  %v7555_v38 = vcombine.low %v7505_v0, %v7519_v17 }
  0x2a   : > { %9644 = vst [vmem:[#allocation19_spill] sm:$0xff] %v7523_v22  ;;  %9646 = vst [vmem:[#allocation21_spill] sm:$0xff] %v7542_v48  ;;  %v7545_v49 = vld [vmem:[%s7289_s25 + $0x64] sm:$0xf]  ;;  %v2079_v51 = vsel %vm2047_vm9, 65537, %v9399_v9  ;;  %v3765_v54 = vshrl.u32 %v6020_v23, 16  ;;  %v7559_v9 = vcombine.low %v7528_v32, %v7542_v48 }
  0x2b   : > { %9647 = vst [vmem:[#allocation22_spill] sm:$0xff] %v7545_v49  ;;  %v3767_v58 = vshll.u32 %v6020_v23, 16  ;;  %v7550_v4 = vld [vmem:[%s7289_s25 + $0x68] sm:$0xf]  ;;  %v2138_v47 = vshrl.u32 %v2079_v51, 16  ;;  %v2141_v33 = vshll.u32 %v2079_v51, 16 }
  0x2c   : > { %9648 = vst [vmem:[#allocation23_spill] sm:$0xff] %v7550_v4  ;;  %v307_v14 = vand.u32 15, %v241_v44  ;;  %9649 = vst [vmem:[#allocation24_spill] sm:$0xff] %v7555_v38  ;;  %v321_v15 = vand.u32 15, %v243_v12  ;;  %v245_v23 = vadd.s32 72, %v7267_v6  ;;  %v7564_v51 = vcombine.low %v7545_v49, %v7550_v4 }
  0x2d   : > { %v3769_v19 = vrot.slane %v3767_v58, 1  ;;  %9650 = vst [vmem:[#allocation25_spill] sm:$0xff] %v7559_v9  ;;  %v2140_v46 = vrot.slane %v2138_v47, 7  ;;  %v247_v44 = vadd.s32 88, %v7267_v6  ;;  %6403 = vmatmul.mubr.msk.bf16.gmra.mrb[8].mxu1 %vm9448_vm4, %v7447_v27  ;;  %v7570_v12 = vadd.s32 104, %v7267_v6 }
  0x2e   : > { %vm1953_vm10 = vcmp.lt.s32.totalorder %v307_v14, 15  ;;  %9651 = vst [vmem:[#allocation26_spill] sm:$0xff] %v7564_v51  ;;  %vm1955_vm12 = vcmp.lt.s32.totalorder %v321_v15, 15  ;;  %v335_v58 = vand.u32 15, %v245_v23  ;;  %6539 = vmatmul.mubr.msk.bf16.gmra.mrb[8].mxu0 %vm9448_vm4, %v7451_v28  ;;  %6406 = vmatprep.mubr.msk.bf16.mxu1 %vm9448_vm4, %v7451_v28  ;;  %vm9454_vm13 = vsmask.f32 7424 }
  0x2f   : > { %v3770_v8 = vor.u32 %v3769_v19, %v3765_v54  ;;  %vm2049_vm11 = vmpackc.low %vm1953_vm10, %vm1953_vm10  ;;  %v2143_v14 = vor.u32 %v2141_v33, %v2140_v46  ;;  %v2145_v47 = vrot.slane %v2140_v46, 4  ;;  %v9652_v22 = vmov 0   ;;  %6542 = vmatprep.mubr.msk.bf16.mxu0 %vm9448_vm4, %v7481_v50  ;;  %v8197_v63 = vld [vmem:[%s7289_s25 + $0x8c] sm:$0xf] }
  0x30   : > { %v2081_v37 = vsel %vm2049_vm11, 65537, %v9652_v22  ;;  %vm2051_vm14 = vmpackc.low %vm1955_vm12, %vm1955_vm12  ;;  %v349_v27 = vand.u32 15, %v247_v44  ;;  %vm1957_vm1 = vcmp.lt.s32.totalorder %v335_v58, 15  ;;  %v9653_v44 = vmov 0  ;;  %9793 = vst [vmem:[#allocation67_spill] sm:$0xff] %v8197_v63 }
  0x31   : > { %v2156_v15 = vshrl.u32 %v2081_v37, 16  ;;  %v2159_v19 = vshll.u32 %v2081_v37, 16  ;;  %v2083_v54 = vsel %vm2051_vm14, 65537, %v9652_v22  ;;  %v2144_v23 = vsel %vm7380_vm3, %v7352_v53, %v2143_v14  ;;  %vm2053_vm6 = vmpackc.low %vm1957_vm1, %vm1957_vm1 }
  0x32   : > { %v7586_v46 = vsel %vm7380_vm3, %v2145_v47, %v7330_v40  ;;  %v2174_v33 = vshrl.u32 %v2083_v54, 16  ;;  %v2177_v28 = vshll.u32 %v2083_v54, 16  ;;  %vm7588_vm8 = vcmp.ne.s16.totalorder %v2144_v23, 0 }
  0x33   : > { %v9654_v44 = vsel %vm7588_vm8, 4294967295, %v9653_v44  ;;  %v2158_v37 = vrot.slane %v2156_v15, 7  ;;  %vm9436_vm9 = vcmp.ne.s16.totalorder %v7586_v46, 0  ;;  %v2085_v58 = vsel %vm2053_vm6, 65537, %v9652_v22 }
  0x34   : > { %9655 = vst [vmem:[#allocation27_spill] sm:$0xff] %v9654_v44  ;;  %v3649_v14 = vsel %vm7588_vm8, %v7319_v29, 0  ;;  %v3650_v47 = vsel %vm9436_vm9, %v7357_v55, 0  ;;  %v2176_v59 = vrot.slane %v2174_v33, 7  ;;  %v2192_v54 = vshrl.u32 %v2085_v58, 16 }
  0x35   : > { %v6021_v16 = vcombine.low %v3648_v25, %v3649_v14  ;;  %v2161_v23 = vor.u32 %v2159_v19, %v2158_v37  ;;  %v2163_v43 = vrot.slane %v2158_v37, 4  ;;  %v2195_v4 = vshll.u32 %v2085_v58, 16  ;;  %6407 = vmatmul.mubr.msk.bf16.gmra.mrb[12].mxu1 %vm9448_vm4, %v7481_v50 }
  0x36   : > { %v2179_v49 = vor.u32 %v2177_v28, %v2176_v59  ;;  %v2181_v15 = vrot.slane %v2176_v59, 4  ;;  %v2194_v48 = vrot.slane %v2192_v54, 7  ;;  %vm7600_vm10 = vcmp.lt.s32.totalorder %v349_v27, 15  ;;  %6543 = vmatmul.mubr.msk.bf16.gmra.mrb[12].mxu0 %vm9448_vm4, %v7494_v57  ;;  %6410 = vmatprep.mubr.msk.bf16.mxu1 %vm9448_vm4, %v7494_v57 }
  0x37   : > { %v3772_v44 = vshll.u32 %v6021_v16, 16  ;;  %v3776_v29 = vshrl.u32 %v6021_v16, 16  ;;  %v2162_v33 = vsel %vm7380_vm3, %v7352_v53, %v2161_v23  ;;  %v7612_v25 = vsel %vm7380_vm3, %v2163_v43, %v7330_v40  ;;  %vm2055_vm1 = vmpackc.low %vm7600_vm10, %vm7600_vm10 }
  0x38   : > { %vm7618_vm11 = vcmp.ne.s16.totalorder %v2162_v33, 0  ;;  %v9658_v27 = vmov 0  ;;  %v2180_v16 = vsel %vm7380_vm3, %v7352_v53, %v2179_v49  ;;  %vm9435_vm12 = vcmp.ne.s16.totalorder %v7612_v25, 0 }
  0x39   : > { %v9659_v27 = vsel %vm7618_vm11, 4294967295, %v9658_v27  ;;  %v7629_v43 = vsel %vm7380_vm3, %v2181_v15, %v7330_v40  ;;  %v3774_v28 = vrot.slane %v3772_v44, 1  ;;  %v3651_v59 = vsel %vm7618_vm11, %v7360_v56, 0 }
  0x3a   : > { %9660 = vst [vmem:[#allocation28_spill] sm:$0xff] %v7629_v43  ;;  %vm7634_vm14 = vcmp.ne.s16.totalorder %v2180_v16, 0  ;;  %v9661_v19 = vmov 0  ;;  %v3652_v49 = vsel %vm9435_vm12, %v7367_v60, 0  ;;  %v6022_v37 = vcombine.low %v3650_v47, %v3651_v59  ;;  %v7662_v59 = vld [vmem:[%s7289_s25 + $0x6c] sm:$0xf] }
  0x3b   : > { %v9662_v19 = vsel %vm7634_vm14, 4294967295, %v9661_v19  ;;  %v3653_v44 = vsel %vm7634_vm14, %v7370_v61, 0  ;;  %v2197_v58 = vor.u32 %v2195_v4, %v2194_v48  ;;  %vm9422_vm6 = vcmp.ne.s16.totalorder %v7629_v43, 0  ;;  %v5933_v43 = vld [vmem:[%s9393_s1 + $0x4] sm:$0x3] }
  0x3c   : > { %v3775_v14 = vsel %vm9454_vm13, %v3770_v8, %v3774_v28  ;;  %v3778_v54 = vor.u32 %v3776_v29, %v3774_v28  ;;  %v6023_v23 = vcombine.low %v3652_v49, %v3653_v44  ;;  %v3654_v26 = vsel %vm9422_vm6, %v7390_v3, 0 }
  0x3d   : > { %6564 = vmatprep.mubr.msk.bf16.mxu0 %vm9448_vm4, %v3775_v14  ;;  %v3780_v47 = vshll.u32 %v6022_v37, 16  ;;  %v3784_v15 = vshrl.u32 %v6022_v37, 16  ;;  %v2198_v33 = vsel %vm7380_vm3, %v7352_v53, %v2197_v58  ;;  %v2087_v4 = vsel %vm2055_vm1, 65537, %v9652_v22  ;;  %v7668_v14 = vld [vmem:[%s7289_s25 + $0x70] sm:$0xf]  ;;  %6411 = vmatmul.mubr.msk.bf16.gmra.mrb[16].mxu1 %vm9448_vm4, %v7538_v39 }
  0x3e   : > { %v3788_v16 = vshll.u32 %v6023_v23, 16  ;;  %vm7657_vm10 = vcmp.ne.s16.totalorder %v2198_v33, 0  ;;  %v9663_v8 = vmov 0  ;;  %v3792_v29 = vshrl.u32 %v6023_v23, 16  ;;  %6414 = vmatprep.mubr.msk.bf16.mxu1 %vm9448_vm4, %v7555_v38  ;;  %v7699_v38 = vld [vmem:[%s7289_s25 + $0x7c] sm:$0xf] }
  0x3f   : > { %v9664_v8 = vsel %vm7657_vm10, 4294967295, %v9663_v8  ;;  %v2199_v28 = vrot.slane %v2194_v48, 4  ;;  %v3782_v49 = vrot.slane %v3780_v47, 1  ;;  %v3655_v37 = vsel %vm7657_vm10, %v7396_v7, 0 }
  0x40   : > { %9665 = vst [vmem:[#allocation29_spill] sm:$0xff] %v9664_v8  ;;  %v2210_v44 = vshrl.u32 %v2087_v4, 16  ;;  %v2213_v58 = vshll.u32 %v2087_v4, 16  ;;  %v3790_v33 = vrot.slane %v3788_v16, 1  ;;  %v6024_v57 = vcombine.low %v3654_v26, %v3655_v37  ;;  %v7683_v16 = vld [vmem:[%s7289_s25 + $0x74] sm:$0xf] }
  0x41   : > { %v7675_v48 = vsel %vm7380_vm3, %v2199_v28, %v7330_v40  ;;  %v363_v23 = vand.u32 15, %v7570_v12  ;;  %v3783_v47 = vsel %vm9454_vm13, %v3778_v54, %v3782_v49  ;;  %v3786_v7 = vor.u32 %v3784_v15, %v3782_v49  ;;  %v7686_v26 = vld [vmem:[%s7289_s25 + $0x78] sm:$0xf] }
  0x42   : > { %9666 = vst [vmem:[#allocation30_spill] sm:$0xff] %v7675_v48  ;;  %v2212_v4 = vrot.slane %v2210_v44, 7  ;;  %vm9427_vm1 = vcmp.ne.s16.totalorder %v7675_v48, 0  ;;  %6565 = vmatmul.mubr.msk.bf16.vlgmr.msra.gmra.mrb[0].mxu0 %vm9448_vm4, %v3783_v47  ;;  %v3794_v28 = vor.u32 %v3792_v29, %v3790_v33  ;;  %v3796_v37 = vshll.u32 %v6024_v57, 16  ;;  %v7702_v47 = vld [vmem:[%s7289_s25 + $0x80] sm:$0xf] }
  0x43   : > { %v3656_v12 = vsel %vm9427_vm1, %v7399_v10, 0  ;;  %v7694_v54 = vcombine.low %v7662_v59, %v7668_v14  ;;  %6597 = vmatpush3.bf16.msra.mxu0 %v7534_v34  ;;  %v3791_v15 = vsel %vm9454_vm13, %v3786_v7, %v3790_v33  ;;  %vm1961_vm6 = vcmp.lt.s32.totalorder %v363_v23, 15 }
  0x44   : > { %v2215_v49 = vor.u32 %v2213_v58, %v2212_v4  ;;  %v2217_v44 = vrot.slane %v2212_v4, 4  ;;  %6568 = vmatprep.mubr.msk.bf16.mxu0 %vm9448_vm4, %v3791_v15  ;;  %v3798_v29 = vrot.slane %v3796_v37, 1  ;;  %v3800_v39 = vshrl.u32 %v6024_v57, 16  ;;  %vm2057_vm1 = vmpackc.low %vm1961_vm6, %vm1961_vm6 }
  0x45   : > { %9667 = vst [vmem:[#allocation31_spill] sm:$0xff] %v7694_v54  ;;  %v7707_v10 = vcombine.low %v7683_v16, %v7686_v26  ;;  %v251_v34 = vadd.s32 120, %v7267_v6  ;;  %v2089_v33 = vsel %vm2057_vm1, 65537, %v9652_v22  ;;  %v253_v57 = vadd.s32 136, %v7267_v6  ;;  %6415 = vmatmul.mubr.msk.bf16.gmra.mrb[20].mxu1 %vm9448_vm4, %v7559_v9 }
  0x46   : > { %v2216_v58 = vsel %vm7380_vm3, %v7352_v53, %v2215_v49  ;;  %v7717_v23 = vsel %vm7380_vm3, %v2217_v44, %v7330_v40  ;;  %v3799_v7 = vsel %vm9454_vm13, %v3794_v28, %v3798_v29  ;;  %v9670_v4 = vmov 0  ;;  %6418 = vmatprep.mubr.msk.bf16.mxu1 %vm9448_vm4, %v7564_v51 }
  0x47   : > { %9668 = vst [vmem:[#allocation32_spill] sm:$0xff] %v7707_v10  ;;  %9669 = vst [vmem:[#allocation33_spill] sm:$0xff] %v7717_v23  ;;  %vm7721_vm6 = vcmp.ne.s16.totalorder %v2216_v58, 0  ;;  %v2228_v37 = vshrl.u32 %v2089_v33, 16  ;;  %v7727_v15 = vcombine.low %v7699_v38, %v7702_v47  ;;  %v2231_v50 = vshll.u32 %v2089_v33, 16 }
  0x48   : > { %v9671_v4 = vsel %vm7721_vm6, 4294967295, %v9670_v4  ;;  %v3657_v49 = vsel %vm7721_vm6, %v7402_v11, 0  ;;  %vm9438_vm1 = vcmp.ne.s16.totalorder %v7717_v23, 0  ;;  %v377_v44 = vand.u32 15, %v251_v34 }
  0x49   : > { %9672 = vst [vmem:[#allocation34_spill] sm:$0xff] %v9671_v4  ;;  %9673 = vst [vmem:[#allocation35_spill] sm:$0xff] %v7727_v15  ;;  %v6025_v28 = vcombine.low %v3656_v12, %v3657_v49  ;;  %v3802_v58 = vor.u32 %v3800_v39, %v3798_v29  ;;  %v2230_v48 = vrot.slane %v2228_v37, 7  ;;  %v391_v8 = vand.u32 15, %v253_v57 }
  0x4a   : > { %v3658_v11 = vsel %vm9438_vm1, %v7434_v20, 0  ;;  %vm1963_vm12 = vcmp.lt.s32.totalorder %v377_v44, 15  ;;  %v848_v12 = vsel %vm7337_vm15, %v7407_v13, %v7295_v21  ;;  %6569 = vmatmul.mubr.msk.bf16.gmra.mrb[4].mxu0 %vm9448_vm4, %v3799_v7  ;;  %v9674_v20 = vmov 0 }
  0x4b   : > { %v3804_v29 = vshll.u32 %v6025_v28, 16  ;;  %v2233_v34 = vor.u32 %v2231_v50, %v2230_v48  ;;  %v3808_v33 = vshrl.u32 %v6025_v28, 16  ;;  %vm2059_vm9 = vmpackc.low %vm1963_vm12, %vm1963_vm12  ;;  %v2235_v57 = vrot.slane %v2230_v48, 4 }
  0x4c   : > { %v2091_v37 = vsel %vm2059_vm9, 65537, %v9652_v22  ;;  %vm1965_vm7 = vcmp.lt.s32.totalorder %v391_v8, 15  ;;  %vm7751_vm1 = vcmp.ne.s16.totalorder %v848_v12, 0  ;;  %v7756_v49 = vand.u32 %v5933_v43, %v7263_v5 }
  0x4d   : > { %v9675_v20 = vsel %vm7751_vm1, 4294967295, %v9674_v20  ;;  %v3806_v13 = vrot.slane %v3804_v29, 1  ;;  %v2234_v7 = vsel %vm7380_vm3, %v7352_v53, %v2233_v34  ;;  %v7764_v50 = vsel %vm7380_vm3, %v2235_v57, %v7330_v40  ;;  %vm2061_vm9 = vmpackc.low %vm1965_vm7, %vm1965_vm7  ;;  %6419 = vmatmul.mubr.msk.bf16.gmra.mrb[24].mxu1 %vm9448_vm4, %v7694_v54 }
  0x4e   : > { %9676 = vst [vmem:[#allocation36_spill] sm:$0xff] %v9675_v20  ;;  %9677 = vst [vmem:[#allocation37_spill] sm:$0xff] %v7764_v50  ;;  %v2246_v48 = vshrl.u32 %v2091_v37, 16  ;;  %vm7766_vm12 = vcmp.ne.s16.totalorder %v2234_v7, 0  ;;  %v9678_v8 = vmov 0  ;;  %v2249_v44 = vshll.u32 %v2091_v37, 16  ;;  %6460 = vmatprep.subr.bf16.mxu1 %v7756_v49  ;;  %6422 = vmatprep.mubr.msk.bf16.mxu1 %vm9448_vm4, %v7707_v10 }
  0x4f   : > { %v9679_v8 = vsel %vm7766_vm12, 4294967295, %v9678_v8  ;;  %vm9442_vm0 = vcmp.ne.s16.totalorder %v7764_v50, 0  ;;  %v2093_v43 = vsel %vm2061_vm9, 65537, %v9652_v22  ;;  %v3807_v28 = vsel %vm9454_vm13, %v3802_v58, %v3806_v13 }
  0x50   : > { %9680 = vst [vmem:[#allocation38_spill] sm:$0xff] %v9679_v8  ;;  %v3659_v12 = vsel %vm7766_vm12, %v7454_v30, 0  ;;  %v3810_v29 = vor.u32 %v3808_v33, %v3806_v13  ;;  %v2248_v34 = vrot.slane %v2246_v48, 7  ;;  %6572 = vmatprep.mubr.msk.bf16.mxu0 %vm9448_vm4, %v3807_v28  ;;  %v3660_v37 = vsel %vm9442_vm0, %v7457_v31, 0 }
  0x51   : > { %v6026_v57 = vcombine.low %v3658_v11, %v3659_v12  ;;  %v2264_v7 = vshrl.u32 %v2093_v43, 16  ;;  %v2267_v39 = vshll.u32 %v2093_v43, 16  ;;  %v1170_v30 = vsel %vm7751_vm1, %v7327_v36, 0 }
  0x52   : > { %v2251_v58 = vor.u32 %v2249_v44, %v2248_v34  ;;  %v2253_v51 = vrot.slane %v2248_v34, 4  ;;  %v255_v33 = vadd.s32 152, %v7267_v6  ;;  %v9681_v48 = vsel %vm7372_vm2, %v7304_v24, 0 }
  0x53   : > { %v3812_v13 = vshll.u32 %v6026_v57, 16  ;;  %v3816_v11 = vshrl.u32 %v6026_v57, 16  ;;  %v2266_v31 = vrot.slane %v2264_v7, 7  ;;  %v5901_v43 = vcombine.low %v9681_v48, %v1170_v30 }
  0x54   : > { %v2252_v44 = vsel %vm7380_vm3, %v7352_v53, %v2251_v58  ;;  %v7799_v36 = vsel %vm7380_vm3, %v2253_v51, %v7330_v40  ;;  %v405_v28 = vand.u32 15, %v255_v33  ;;  %v240_v12 = vadd.s32 32, %v7267_v6 }
  0x55   : > { %9682 = vst [vmem:[#allocation39_spill] sm:$0xff] %v7799_v36  ;;  %v3814_v34 = vrot.slane %v3812_v13, 1  ;;  %vm7802_vm9 = vcmp.ne.s16.totalorder %v2252_v44, 0  ;;  %v9683_v57 = vmov 0  ;;  %v2269_v7 = vor.u32 %v2267_v39, %v2266_v31  ;;  %6423 = vmatmul.mubr.msk.bf16.gmra.mrb[28].mxu1 %vm9448_vm4, %v7727_v15 }
  0x56   : > { %v9684_v57 = vsel %vm7802_vm9, 4294967295, %v9683_v57  ;;  %vm9447_vm0 = vcmp.ne.s16.totalorder %v7799_v36, 0  ;;  %v3661_v24 = vsel %vm7802_vm9, %v7469_v35, 0  ;;  %v1593_v58 = vshrl.u32 %v5901_v43, 16 }
  0x57   : > { %9685 = vst [vmem:[#allocation40_spill] sm:$0xff] %v9684_v57  ;;  %v3662_v51 = vsel %vm9447_vm0, %v7487_v52, 0  ;;  %v1596_v30 = vshll.u32 %v5901_v43, 16  ;;  %v3815_v33 = vsel %vm9454_vm13, %v3810_v29, %v3814_v34  ;;  %v6027_v13 = vcombine.low %v3660_v37, %v3661_v24 }
  0x58   : > { %v3818_v48 = vor.u32 %v3816_v11, %v3814_v34  ;;  %v2270_v39 = vsel %vm7380_vm3, %v7352_v53, %v2269_v7  ;;  %6573 = vmatmul.mubr.msk.bf16.gmra.mrb[8].mxu0 %vm9448_vm4, %v3815_v33  ;;  %v9686_v44 = vmov 0  ;;  %v1595_v35 = vrot.slane %v1593_v58, 3 }
  0x59   : > { %vm7818_vm7 = vcmp.ne.s16.totalorder %v2270_v39, 0  ;;  %v1598_v10 = vrot.slane %v1596_v30, 4  ;;  %vm1967_vm9 = vcmp.lt.s32.totalorder %v405_v28, 15  ;;  %v3820_v52 = vshll.u32 %v6027_v13, 16 }
  0x5a   : > { %v9687_v44 = vsel %vm7818_vm7, 4294967295, %v9686_v44  ;;  %v3663_v29 = vsel %vm7818_vm7, %v7502_v62, 0  ;;  %v3824_v37 = vshrl.u32 %v6027_v13, 16  ;;  %vm2063_vm0 = vmpackc.low %vm1967_vm9, %vm1967_vm9  ;;  %v2271_v11 = vrot.slane %v2266_v31, 4 }
  0x5b   : > { %9688 = vst [vmem:[#allocation41_spill] sm:$0xff] %v9687_v44  ;;  %v6028_v43 = vcombine.low %v3662_v51, %v3663_v29  ;;  %v7827_v34 = vor.u32 %v1598_v10, %v1595_v35  ;;  %v2095_v7 = vsel %vm2063_vm0, 65537, %v9652_v22  ;;  %v300_v24 = vand.u32 15, %v240_v12  ;;  %v8228_v44 = vld [vmem:[%s7289_s25 + $0x40] sm:$0xf] }
  0x5c   : > { %v3822_v58 = vrot.slane %v3820_v52, 1  ;;  %v7833_v28 = vsel %vm7380_vm3, %v2271_v11, %v7330_v40  ;;  %v2282_v30 = vshrl.u32 %v2095_v7, 16  ;;  %v2285_v62 = vshll.u32 %v2095_v7, 16 }
  0x5d   : > { %9689 = vst [vmem:[#allocation42_spill] sm:$0xff] %v7833_v28  ;;  %v3828_v33 = vshll.u32 %v6028_v43, 16  ;;  %v9690_v31 = vor.u32 %v7521_v18, %v7507_v2  ;;  %vm9691_vm9 = vsmask.f32 4352  ;;  %vm9453_vm4 = vcmp.ne.s16.totalorder %v7833_v28, 0 }
  0x5e   : > { %v3832_v10 = vshrl.u32 %v6028_v43, 16  ;;  %v3823_v12 = vsel %vm9454_vm13, %v3818_v48, %v3822_v58  ;;  %v3826_v13 = vor.u32 %v3824_v37, %v3822_v58  ;;  %vm9692_vm0 = vcmask 23552  }
  0x5f   : > { %v1600_v51 = vsel %vm9691_vm9, %v9690_v31, %v7827_v34  ;;  %v2284_v39 = vrot.slane %v2282_v30, 7  ;;  %v3664_v35 = vsel %vm9453_vm4, %v7505_v0, 0  ;;  %vm9693_vm7 = vmmov %vm9692_vm0  ;;  %v3830_v52 = vrot.slane %v3828_v33, 1 }
  0x60   : > { %6428 = vmatprep.mubr.msk.bf16.mxu1 %vm9692_vm0, %v1600_v51  ;;  %6576 = vmatprep.mubr.msk.bf16.mxu0 %vm9693_vm7, %v3823_v12  ;;  %vm656_vm12 = vcmp.gt.s32.totalorder %v300_v24, 0  ;;  %v257_v2 = vadd.s32 168, %v7267_v6  ;;  %v242_v18 = vadd.s32 48, %v7267_v6  ;;  %v259_v48 = vadd.s32 184, %v7267_v6  ;;  %vm9694_vm7 = vmmov %vm9692_vm0 }
  0x61   : > { %v2287_v29 = vor.u32 %v2285_v62, %v2284_v39  ;;  %vm752_vm9 = vmpackc.low %vm656_vm12, %vm656_vm12  ;;  %v2289_v11 = vrot.slane %v2284_v39, 4  ;;  %v7851_v37 = vadd.s32 64, %v7267_v6  ;;  %v3831_v43 = vsel %vm9454_vm13, %v3826_v13, %v3830_v52 }
  0x62   : > { %v3834_v7 = vor.u32 %v3832_v10, %v3830_v52  ;;  %v784_v0 = vsel %vm752_vm9, 65537, %v9652_v22  ;;  %v419_v58 = vand.u32 15, %v257_v2  ;;  %6577 = vmatmul.mubr.msk.bf16.gmra.mrb[12].mxu0 %vm9694_vm7, %v3831_v43  ;;  %v9696_v31 = vmov 0 }
  0x63   : > { %v2288_v24 = vsel %vm7380_vm3, %v7352_v53, %v2287_v29  ;;  %v855_v30 = vshll.u32 %v784_v0, 16  ;;  %v859_v62 = vshrl.u32 %v784_v0, 16  ;;  %v7862_v33 = vsel %vm7380_vm3, %v2289_v11, %v7330_v40 }
  0x64   : > { %9695 = vst [vmem:[#allocation43_spill] sm:$0xff] %v7862_v33  ;;  %vm7864_vm12 = vcmp.ne.s16.totalorder %v2288_v24, 0  ;;  %vm1969_vm0 = vcmp.lt.s32.totalorder %v419_v58, 15  ;;  %vm9457_vm9 = vcmp.ne.s16.totalorder %v7862_v33, 0  ;;  %v314_v51 = vand.u32 15, %v242_v18 }
  0x65   : > { %v9697_v31 = vsel %vm7864_vm12, 4294967295, %v9696_v31  ;;  %v3665_v10 = vsel %vm7864_vm12, %v7519_v17, 0  ;;  %v857_v12 = vrot.slane %v855_v30, 5  ;;  %v861_v13 = vrot.slane %v859_v62, 4  ;;  %vm2065_vm7 = vmpackc.low %vm1969_vm0, %vm1969_vm0 }
  0x66   : > { %9698 = vst [vmem:[#allocation44_spill] sm:$0xff] %v9697_v31  ;;  %v3666_v39 = vsel %vm9457_vm9, %v7528_v32, 0  ;;  %v6029_v52 = vcombine.low %v3664_v35, %v3665_v10  ;;  %v2097_v2 = vsel %vm2065_vm7, 65537, %v9652_v22  ;;  %vm658_vm4 = vcmp.gt.s32.totalorder %v314_v51, 0 }
  0x67   : > { %v433_v29 = vand.u32 15, %v259_v48  ;;  %v858_v18 = vsel %vm7337_vm15, %v7343_v45, %v857_v12  ;;  %v862_v11 = vor.u32 %v861_v13, %v857_v12  ;;  %v2300_v43 = vshrl.u32 %v2097_v2, 16  ;;  %vm754_vm13 = vmpackc.low %vm658_vm4, %vm658_vm4 }
  0x68   : > { %v2303_v0 = vshll.u32 %v2097_v2, 16  ;;  %v3836_v17 = vshll.u32 %v6029_v52, 16  ;;  %vm7879_vm12 = vcmp.ne.s16.totalorder %v858_v18, 0  ;;  %v9699_v58 = vmov 0 }
  0x69   : > { %v9700_v58 = vsel %vm7879_vm12, 4294967295, %v9699_v58  ;;  %v3840_v24 = vshrl.u32 %v6029_v52, 16  ;;  %v786_v32 = vsel %vm754_vm13, 65537, %v9652_v22  ;;  %v863_v35 = vrot.slane %v862_v11, 4 }
  0x6a   : > { %9701 = vst [vmem:[#allocation45_spill] sm:$0xff] %v9700_v58  ;;  %v1171_v48 = vsel %vm7879_vm12, %v7333_v41, 0  ;;  %v2302_v30 = vrot.slane %v2300_v43, 7  ;;  %v875_v62 = vshll.u32 %v786_v32, 16  ;;  %v3838_v51 = vrot.slane %v3836_v17, 1 }
  0x6b   : > { %v879_v10 = vshrl.u32 %v786_v32, 16  ;;  %vm7887_vm0 = vcmp.lt.s32.totalorder %v433_v29, 15  ;;  %v328_v13 = vand.u32 15, %v7851_v37  ;;  %v868_v52 = vsel %vm7337_vm15, %v863_v35, %v7295_v21  ;;  %v9709_v37 = vld [vmem:[#allocation3_spill] sm:$0xff] }
  0x6c   : > { %v2305_v2 = vor.u32 %v2303_v0, %v2302_v30  ;;  %v877_v18 = vrot.slane %v875_v62, 5  ;;  %vm2067_vm4 = vmpackc.low %vm7887_vm0, %vm7887_vm0  ;;  %v2307_v41 = vrot.slane %v2302_v30, 4  ;;  %vm9704_vm13 = vsmask.f32 7424 }
  0x6d   : > { %v3839_v11 = vsel %vm9704_vm13, %v3834_v7, %v3838_v51  ;;  %vm7899_vm7 = vcmp.ne.s16.totalorder %v868_v52, 0  ;;  %v9705_v29 = vmov 0  ;;  %v3842_v43 = vor.u32 %v3840_v24, %v3838_v51  ;;  %v9717_v52 = vld [vmem:[#allocation4_spill] sm:$0xff] }
  0x6e   : > { %v9706_v29 = vsel %vm7899_vm7, 4294967295, %v9705_v29  ;;  %v881_v17 = vrot.slane %v879_v10, 4  ;;  %vm9708_vm9 = vcmask 23552   ;;  %v1172_v0 = vsel %vm7899_vm7, %v9709_v37, 0  ;;  %v9716_v10 = vld [vmem:[#allocation21_spill] sm:$0xff] }
  0x6f   : > { %9707 = vst [vmem:[#allocation46_spill] sm:$0xff] %v9706_v29  ;;  %6580 = vmatprep.mubr.msk.bf16.mxu0 %vm9708_vm9, %v3839_v11  ;;  %v2306_v32 = vsel %vm7380_vm3, %v7352_v53, %v2305_v2  ;;  %v878_v7 = vsel %vm7337_vm15, %v7343_v45, %v877_v18  ;;  %v2099_v35 = vsel %vm2067_vm4, 65537, %v9652_v22  ;;  %v5902_v30 = vcombine.low %v1171_v48, %v1172_v0  ;;  %v8315_v29 = vld [vmem:[%s7289_s25 + $0x2c] sm:$0xf] }
  0x70   : > { %vm7914_vm0 = vcmp.ne.s16.totalorder %v2306_v32, 0  ;;  %v9710_v24 = vmov 0  ;;  %v882_v62 = vor.u32 %v881_v17, %v877_v18  ;;  %vm7918_vm9 = vcmp.ne.s16.totalorder %v878_v7, 0  ;;  %9822 = vst [vmem:[#allocation75_spill] sm:$0xff] %v8315_v29 }
  0x71   : > { %v9711_v24 = vsel %vm7914_vm0, 4294967295, %v9710_v24  ;;  %v9713_v51 = vmov 0  ;;  %v3667_v12 = vsel %vm7914_vm0, %v9716_v10, 0  ;;  %v1173_v2 = vsel %vm7918_vm9, %v9717_v52, 0 }
  0x72   : > { %9712 = vst [vmem:[#allocation3_spill] sm:$0xff] %v9711_v24  ;;  %v9714_v51 = vsel %vm7918_vm9, 4294967295, %v9713_v51  ;;  %v7931_v48 = vsel %vm7380_vm3, %v2307_v41, %v7330_v40  ;;  %v2318_v11 = vshrl.u32 %v2099_v35, 16  ;;  %v1602_v0 = vshrl.u32 %v5902_v30, 16 }
  0x73   : > { %9715 = vst [vmem:[#allocation47_spill] sm:$0xff] %v9714_v51  ;;  %9718 = vst [vmem:[#allocation21_spill] sm:$0xff] %v7931_v48  ;;  %v1605_v18 = vshll.u32 %v5902_v30, 16  ;;  %v6030_v17 = vcombine.low %v3666_v39, %v3667_v12  ;;  %v883_v32 = vrot.slane %v882_v62, 4  ;;  %v2321_v15 = vshll.u32 %v2099_v35, 16  ;;  %v9722_v39 = vld [vmem:[#allocation22_spill] sm:$0xff] }
  0x74   : > { %v2320_v7 = vrot.slane %v2318_v11, 7  ;;  %vm9470_vm4 = vcmp.ne.s16.totalorder %v7931_v48, 0  ;;  %vm660_vm13 = vcmp.gt.s32.totalorder %v328_v13, 0  ;;  %v1604_v10 = vrot.slane %v1602_v0, 3 }
  0x75   : > { %v1607_v54 = vrot.slane %v1605_v18, 4  ;;  %v3844_v9 = vshll.u32 %v6030_v17, 16  ;;  %v888_v52 = vsel %vm7337_vm15, %v883_v32, %v7295_v21  ;;  %vm756_vm0 = vmpackc.low %vm660_vm13, %vm660_vm13  ;;  %v9719_v41 = vmov 0 }
  0x76   : > { %vm7937_vm6 = vcmp.ne.s16.totalorder %v888_v52, 0  ;;  %v2323_v30 = vor.u32 %v2321_v15, %v2320_v7  ;;  %v3668_v35 = vsel %vm9470_vm4, %v9722_v39, 0  ;;  %v3848_v62 = vshrl.u32 %v6030_v17, 16 }
  0x77   : > { %v9720_v41 = vsel %vm7937_vm6, 4294967295, %v9719_v41  ;;  %v1608_v12 = vor.u32 %v1607_v54, %v1604_v10  ;;  %v3846_v13 = vrot.slane %v3844_v9, 1  ;;  %v1174_v11 = vsel %vm7937_vm6, %v7357_v55, 0  ;;  %v9730_v10 = vld [vmem:[#allocation23_spill] sm:$0xff] }
  0x78   : > { %9721 = vst [vmem:[#allocation4_spill] sm:$0xff] %v9720_v41  ;;  %v788_v0 = vsel %vm756_vm0, 65537, %v9652_v22  ;;  %v5903_v18 = vcombine.low %v1173_v2, %v1174_v11  ;;  %v2324_v32 = vsel %vm7380_vm3, %v7352_v53, %v2323_v30  ;;  %vm9723_vm13 = vsmask.f32 4352 }
  0x79   : > { %v895_v52 = vshll.u32 %v788_v0, 16  ;;  %v899_v15 = vshrl.u32 %v788_v0, 16  ;;  %v1609_v48 = vsel %vm9723_vm13, %v7827_v34, %v1608_v12  ;;  %vm9724_vm4 = vsmask.f32 7424 }
  0x7a   : > { %v3847_v17 = vsel %vm9724_vm4, %v3842_v43, %v3846_v13  ;;  %vm7954_vm10 = vcmp.ne.s16.totalorder %v2324_v32, 0  ;;  %v9725_v9 = vmov 0  ;;  %v3850_v54 = vor.u32 %v3848_v62, %v3846_v13 }
  0x7b   : > { %v9726_v9 = vsel %vm7954_vm10, 4294967295, %v9725_v9  ;;  %vm9728_vm14 = vcmask 23552   ;;  %v1611_v55 = vshrl.u32 %v5903_v18, 16  ;;  %v1614_v2 = vshll.u32 %v5903_v18, 16 }
  0x7c   : > { %9727 = vst [vmem:[#allocation22_spill] sm:$0xff] %v9726_v9  ;;  %6429 = vmatmul.mubr.msk.bf16.vlgmr.msra.gmra.mrb[0].mxu1 %vm9728_vm14, %v1609_v48  ;;  %vm9729_vm0 = vmmov %vm9728_vm14  ;;  %v3669_v30 = vsel %vm7954_vm10, %v9730_v10, 0  ;;  %v897_v39 = vrot.slane %v895_v52, 5  ;;  %v901_v43 = vrot.slane %v899_v15, 4  ;;  %v261_v11 = vadd.s32 200, %v7267_v6 }
  0x7d   : > { %6581 = vmatmul.mubr.msk.bf16.gmra.mrb[16].mxu0 %vm9729_vm0, %v3847_v17  ;;  %6461 = vmatpush3.bf16.msra.mxu1 %v7756_v49  ;;  %v6031_v34 = vcombine.low %v3668_v35, %v3669_v30  ;;  %v2325_v0 = vrot.slane %v2320_v7, 4  ;;  %v1613_v32 = vrot.slane %v1611_v55, 3  ;;  %v1616_v62 = vrot.slane %v1614_v2, 4 }
  0x7e   : > { %v898_v48 = vsel %vm7337_vm15, %v7343_v45, %v897_v39  ;;  %v246_v13 = vadd.s32 80, %v7267_v6  ;;  %v902_v17 = vor.u32 %v901_v43, %v897_v39  ;;  %v9731_v10 = vmov 0 }
  0x7f   : > { %v3852_v18 = vshll.u32 %v6031_v34, 16  ;;  %vm7969_vm14 = vcmp.ne.s16.totalorder %v898_v48, 0  ;;  %v447_v49 = vand.u32 15, %v261_v11  ;;  %v7973_v35 = vor.u32 %v1616_v62, %v1613_v32 }
  0x80   : > { %v9732_v10 = vsel %vm7969_vm14, 4294967295, %v9731_v10  ;;  %v1175_v7 = vsel %vm7969_vm14, %v7360_v56, 0  ;;  %v7981_v52 = vsel %vm7380_vm3, %v2325_v0, %v7330_v40  ;;  %v3856_v15 = vshrl.u32 %v6031_v34, 16 }
  0x81   : > { %9733 = vst [vmem:[#allocation23_spill] sm:$0xff] %v9732_v10  ;;  %9734 = vst [vmem:[#allocation48_spill] sm:$0xff] %v7981_v52  ;;  %v3854_v55 = vrot.slane %v3852_v18, 1  ;;  %v903_v2 = vrot.slane %v902_v17, 4  ;;  %vm1973_vm4 = vcmp.lt.s32.totalorder %v447_v49, 15  ;;  %vm9481_vm13 = vcmp.ne.s16.totalorder %v7981_v52, 0 }
  0x82   : > { %vm9735_vm0 = vsmask.f32 4352  ;;  %vm2069_vm10 = vmpackc.low %vm1973_vm4, %vm1973_vm4  ;;  %v3670_v39 = vsel %vm9481_vm13, %v7662_v59, 0  ;;  %v342_v56 = vand.u32 15, %v246_v13  ;;  %v263_v43 = vadd.s32 216, %v7267_v6 }
  0x83   : > { %v1618_v30 = vsel %vm9735_vm0, %v1608_v12, %v7973_v35  ;;  %vm9736_vm11 = vcmask 23552   ;;  %vm9737_vm8 = vsmask.f32 7424  ;;  %v908_v11 = vsel %vm7337_vm15, %v903_v2, %v7295_v21 }
  0x84   : > { %6432 = vmatprep.mubr.msk.bf16.mxu1 %vm9736_vm11, %v1618_v30  ;;  %v3855_v34 = vsel %vm9737_vm8, %v3850_v54, %v3854_v55  ;;  %v2101_v0 = vsel %vm2069_vm10, 65537, %v9652_v22  ;;  %v7996_v32 = vor.u32 %v3856_v15, %v3854_v55  ;;  %vm9738_vm4 = vmmov %vm9736_vm11  ;;  %vm7999_vm0 = vcmp.ne.s16.totalorder %v908_v11, 0 }
  0x85   : > { %6584 = vmatprep.mubr.msk.bf16.mxu0 %vm9738_vm4, %v3855_v34  ;;  %v9739_v12 = vmov 0  ;;  %v2336_v59 = vshrl.u32 %v2101_v0, 16  ;;  %v2339_v62 = vshll.u32 %v2101_v0, 16  ;;  %vm662_vm13 = vcmp.gt.s32.totalorder %v342_v56, 0 }
  0x86   : > { %v9740_v12 = vsel %vm7999_vm0, 4294967295, %v9739_v12  ;;  %v1176_v54 = vsel %vm7999_vm0, %v7367_v60, 0  ;;  %vm758_vm8 = vmpackc.low %vm662_vm13, %vm662_vm13  ;;  %v461_v48 = vand.u32 15, %v263_v43  ;;  %v248_v13 = vadd.s32 96, %v7267_v6 }
  0x87   : > { %9741 = vst [vmem:[#allocation49_spill] sm:$0xff] %v9740_v12  ;;  %v265_v18 = vadd.s32 232, %v7267_v6  ;;  %v5904_v17 = vcombine.low %v1175_v7, %v1176_v54  ;;  %v2338_v49 = vrot.slane %v2336_v59, 7  ;;  %v790_v15 = vsel %vm758_vm8, 65537, %v9652_v22 }
  0x88   : > { %v8010_v55 = vadd.s32 112, %v7267_v6  ;;  %v915_v2 = vshll.u32 %v790_v15, 16  ;;  %v919_v30 = vshrl.u32 %v790_v15, 16  ;;  %vm1975_vm11 = vcmp.lt.s32.totalorder %v461_v48, 15 }
  0x89   : > { %v356_v56 = vand.u32 15, %v248_v13  ;;  %v1620_v34 = vshrl.u32 %v5904_v17, 16  ;;  %v1623_v11 = vshll.u32 %v5904_v17, 16  ;;  %v2341_v60 = vor.u32 %v2339_v62, %v2338_v49  ;;  %vm2071_vm10 = vmpackc.low %vm1975_vm11, %vm1975_vm11 }
  0x8a   : > { %v2343_v43 = vrot.slane %v2338_v49, 4  ;;  %v917_v0 = vrot.slane %v915_v2, 5  ;;  %v921_v52 = vrot.slane %v919_v30, 4  ;;  %v2103_v9 = vsel %vm2071_vm10, 65537, %v9652_v22 }
  0x8b   : > { %vm8013_vm13 = vcmp.gt.s32.totalorder %v356_v56, 0  ;;  %v1622_v59 = vrot.slane %v1620_v34, 3  ;;  %v1625_v54 = vrot.slane %v1623_v11, 4  ;;  %v2342_v48 = vsel %vm7380_vm3, %v7352_v53, %v2341_v60 }
  0x8c   : > { %v8023_v62 = vsel %vm7380_vm3, %v2343_v43, %v7330_v40  ;;  %vm8025_vm4 = vcmp.ne.s16.totalorder %v2342_v48, 0  ;;  %v9745_v13 = vmov 0  ;;  %v918_v17 = vsel %vm7337_vm15, %v7343_v45, %v917_v0  ;;  %vm760_vm8 = vmpackc.low %vm8013_vm13, %vm8013_vm13 }
  0x8d   : > { %9744 = vst [vmem:[#allocation50_spill] sm:$0xff] %v8023_v62  ;;  %v9746_v13 = vsel %vm8025_vm4, 4294967295, %v9745_v13  ;;  %v922_v49 = vor.u32 %v921_v52, %v917_v0  ;;  %v2354_v15 = vshrl.u32 %v2103_v9, 16  ;;  %v1626_v2 = vor.u32 %v1625_v54, %v1622_v59 }
  0x8e   : > { %9747 = vst [vmem:[#allocation51_spill] sm:$0xff] %v9746_v13  ;;  %v3671_v30 = vsel %vm8025_vm4, %v7668_v14, 0  ;;  %vm8038_vm11 = vcmp.ne.s16.totalorder %v918_v17, 0  ;;  %v9748_v56 = vmov 0  ;;  %v2357_v34 = vshll.u32 %v2103_v9, 16 }
  0x8f   : > { %v9749_v56 = vsel %vm8038_vm11, 4294967295, %v9748_v56  ;;  %v6032_v11 = vcombine.low %v3670_v39, %v3671_v30  ;;  %v923_v60 = vrot.slane %v922_v49, 4  ;;  %v1177_v52 = vsel %vm8038_vm11, %v7370_v61, 0 }
  0x90   : > { %9750 = vst [vmem:[#allocation52_spill] sm:$0xff] %v9749_v56  ;;  %v2356_v43 = vrot.slane %v2354_v15, 7  ;;  %vm9751_vm10 = vsmask.f32 4352  ;;  %vm9490_vm13 = vcmp.ne.s16.totalorder %v8023_v62, 0  ;;  %v792_v7 = vsel %vm760_vm8, 65537, %v9652_v22 }
  0x91   : > { %v1627_v0 = vsel %vm9751_vm10, %v7973_v35, %v1626_v2  ;;  %v475_v14 = vand.u32 15, %v265_v18  ;;  %vm9752_vm4 = vcmask 23552   ;;  %v3860_v59 = vshll.u32 %v6032_v11, 16 }
  0x92   : > { %6433 = vmatmul.mubr.msk.bf16.gmra.mrb[4].mxu1 %vm9752_vm4, %v1627_v0  ;;  %v928_v9 = vsel %vm7337_vm15, %v923_v60, %v7295_v21  ;;  %v2359_v39 = vor.u32 %v2357_v34, %v2356_v43  ;;  %v3672_v61 = vsel %vm9490_vm13, %v7683_v16, 0  ;;  %v9753_v54 = vmov 0 }
  0x93   : > { %vm8056_vm11 = vcmp.ne.s16.totalorder %v928_v9, 0  ;;  %v3864_v35 = vshrl.u32 %v6032_v11, 16  ;;  %v935_v48 = vshll.u32 %v792_v7, 16  ;;  %v939_v17 = vshrl.u32 %v792_v7, 16 }
  0x94   : > { %v9754_v54 = vsel %vm8056_vm11, 4294967295, %v9753_v54  ;;  %v3862_v18 = vrot.slane %v3860_v59, 1  ;;  %v1178_v49 = vsel %vm8056_vm11, %v7390_v3, 0  ;;  %v2360_v15 = vsel %vm7380_vm3, %v7352_v53, %v2359_v39 }
  0x95   : > { %9755 = vst [vmem:[#allocation53_spill] sm:$0xff] %v9754_v54  ;;  %vm1977_vm4 = vcmp.lt.s32.totalorder %v475_v14, 15  ;;  %v5905_v30 = vcombine.low %v1177_v52, %v1178_v49  ;;  %vm8066_vm8 = vcmp.ne.s16.totalorder %v2360_v15, 0  ;;  %v9756_v16 = vmov 0  ;;  %v8085_v49 = vld [vmem:[%s7289_s25 + $0x30] sm:$0xf] }
  0x96   : > { %v9757_v16 = vsel %vm8066_vm8, 4294967295, %v9756_v16  ;;  %v937_v34 = vrot.slane %v935_v48, 5  ;;  %v941_v60 = vrot.slane %v939_v17, 4  ;;  %vm2073_vm10 = vmpackc.low %vm1977_vm4, %vm1977_vm4  ;;  %vm9759_vm13 = vsmask.f32 7424  ;;  %9764 = vst [vmem:[#allocation56_spill] sm:$0xff] %v8085_v49 }
  0x97   : > { %9758 = vst [vmem:[#allocation54_spill] sm:$0xff] %v9757_v16  ;;  %v3863_v11 = vsel %vm9759_vm13, %v7996_v32, %v3862_v18  ;;  %v3673_v3 = vsel %vm8066_vm8, %v7686_v26, 0  ;;  %v3866_v0 = vor.u32 %v3864_v35, %v3862_v18  ;;  %v2105_v7 = vsel %vm2073_vm10, 65537, %v9652_v22  ;;  %v8137_v16 = vld [vmem:[%s7289_s25 + $0x84] sm:$0xf] }
  0x98   : > { %vm9760_vm11 = vcmask 23552   ;;  %v1629_v52 = vshrl.u32 %v5905_v30, 16  ;;  %v1632_v14 = vshll.u32 %v5905_v30, 16  ;;  %v6033_v59 = vcombine.low %v3672_v61, %v3673_v3  ;;  %9778 = vst [vmem:[#allocation62_spill] sm:$0xff] %v8137_v16 }
  0x99   : > { %6585 = vmatmul.mubr.msk.bf16.gmra.mrb[20].mxu0 %vm9760_vm11, %v3863_v11  ;;  %v938_v9 = vsel %vm7337_vm15, %v7343_v45, %v937_v34  ;;  %v942_v39 = vor.u32 %v941_v60, %v937_v34  ;;  %v9761_v32 = vmov 0  ;;  %v2361_v48 = vrot.slane %v2356_v43, 4 }
  0x9a   : > { %vm8080_vm4 = vcmp.ne.s16.totalorder %v938_v9, 0  ;;  %v2372_v17 = vshrl.u32 %v2105_v7, 16  ;;  %v1631_v26 = vrot.slane %v1629_v52, 3  ;;  %v1634_v35 = vrot.slane %v1632_v14, 4 }
  0x9b   : > { %v9762_v32 = vsel %vm8080_vm4, 4294967295, %v9761_v32  ;;  %v3868_v18 = vshll.u32 %v6033_v59, 16  ;;  %v1179_v61 = vsel %vm8080_vm4, %v8085_v49, 0  ;;  %v943_v15 = vrot.slane %v942_v39, 4 }
  0x9c   : > { %9763 = vst [vmem:[#allocation55_spill] sm:$0xff] %v9762_v32  ;;  %v8093_v30 = vsel %vm7380_vm3, %v2361_v48, %v7330_v40  ;;  %v2374_v34 = vrot.slane %v2372_v17, 7  ;;  %v2375_v60 = vshll.u32 %v2105_v7, 16  ;;  %v1635_v43 = vor.u32 %v1634_v35, %v1631_v26  ;;  %v8112_v26 = vld [vmem:[%s7289_s25 + $0x34] sm:$0xf] }
  0x9d   : > { %9765 = vst [vmem:[#allocation57_spill] sm:$0xff] %v8093_v30  ;;  %v3870_v11 = vrot.slane %v3868_v18, 1  ;;  %vm9505_vm11 = vcmp.ne.s16.totalorder %v8093_v30, 0  ;;  %v3872_v3 = vshrl.u32 %v6033_v59, 16  ;;  %v948_v52 = vsel %vm7337_vm15, %v943_v15, %v7295_v21  ;;  %9773 = vst [vmem:[#allocation59_spill] sm:$0xff] %v8112_v26 }
  0x9e   : > { %v2377_v14 = vor.u32 %v2375_v60, %v2374_v34  ;;  %v3674_v9 = vsel %vm9505_vm11, %v7699_v38, 0  ;;  %v370_v39 = vand.u32 15, %v8010_v55  ;;  %vm9766_vm13 = vsmask.f32 4352 }
  0x9f   : > { %v1636_v48 = vsel %vm9766_vm13, %v1626_v2, %v1635_v43  ;;  %vm9767_vm10 = vsmask.f32 7424  ;;  %vm8105_vm8 = vcmp.ne.s16.totalorder %v948_v52, 0  ;;  %v9768_v17 = vmov 0 }
  0xa0   : > { %v3871_v7 = vsel %vm9767_vm10, %v3866_v0, %v3870_v11  ;;  %v9769_v17 = vsel %vm8105_vm8, 4294967295, %v9768_v17  ;;  %v3874_v59 = vor.u32 %v3872_v3, %v3870_v11  ;;  %vm9771_vm4 = vcmask 23552  }
  0xa1   : > { %9770 = vst [vmem:[#allocation58_spill] sm:$0xff] %v9769_v17  ;;  %6436 = vmatprep.mubr.msk.bf16.mxu1 %vm9771_vm4, %v1636_v48  ;;  %vm9772_vm0 = vmmov %vm9771_vm4  ;;  %v1180_v38 = vsel %vm8105_vm8, %v8112_v26, 0  ;;  %v2378_v55 = vsel %vm7380_vm3, %v7352_v53, %v2377_v14  ;;  %vm666_vm13 = vcmp.gt.s32.totalorder %v370_v39, 0  ;;  %v267_v2 = vadd.s32 248, %v7267_v6 }
  0xa2   : > { %6588 = vmatprep.mubr.msk.bf16.mxu0 %vm9772_vm0, %v3871_v7  ;;  %v5906_v0 = vcombine.low %v1179_v61, %v1180_v38  ;;  %vm8121_vm10 = vcmp.ne.s16.totalorder %v2378_v55, 0  ;;  %v9774_v35 = vmov 0  ;;  %vm762_vm4 = vmpackc.low %vm666_vm13, %vm666_vm13  ;;  %v2379_v18 = vrot.slane %v2374_v34, 4 }
  0xa3   : > { %v9775_v35 = vsel %vm8121_vm10, 4294967295, %v9774_v35  ;;  %v252_v15 = vadd.s32 128, %v7267_v6  ;;  %v3675_v60 = vsel %vm8121_vm10, %v7702_v47, 0  ;;  %v794_v11 = vsel %vm762_vm4, 65537, %v9652_v22 }
  0xa4   : > { %9776 = vst [vmem:[#allocation60_spill] sm:$0xff] %v9775_v35  ;;  %v489_v3 = vand.u32 15, %v267_v2  ;;  %v254_v52 = vadd.s32 144, %v7267_v6  ;;  %v1638_v14 = vshrl.u32 %v5906_v0, 16  ;;  %v1641_v61 = vshll.u32 %v5906_v0, 16 }
  0xa5   : > { %v6034_v39 = vcombine.low %v3674_v9, %v3675_v60  ;;  %v955_v48 = vshll.u32 %v794_v11, 16  ;;  %v959_v7 = vshrl.u32 %v794_v11, 16  ;;  %v8134_v34 = vsel %vm7380_vm3, %v2379_v18, %v7330_v40 }
  0xa6   : > { %vm1979_vm0 = vcmp.lt.s32.totalorder %v489_v3, 15  ;;  %9777 = vst [vmem:[#allocation61_spill] sm:$0xff] %v8134_v34  ;;  %v384_v38 = vand.u32 15, %v252_v15  ;;  %v1640_v55 = vrot.slane %v1638_v14, 3  ;;  %v1643_v47 = vrot.slane %v1641_v61, 4 }
  0xa7   : > { %v3876_v35 = vshll.u32 %v6034_v39, 16  ;;  %v957_v30 = vrot.slane %v955_v48, 5  ;;  %vm2075_vm13 = vmpackc.low %vm1979_vm0, %vm1979_vm0  ;;  %v961_v2 = vrot.slane %v959_v7, 4  ;;  %vm9510_vm4 = vcmp.ne.s16.totalorder %v8134_v34, 0  ;;  %v8157_v48 = vld [vmem:[%s7289_s25 + $0x38] sm:$0xf] }
  0xa8   : > { %v2107_v9 = vsel %vm2075_vm13, 65537, %v9652_v22  ;;  %v3880_v0 = vshrl.u32 %v6034_v39, 16  ;;  %v8141_v60 = vor.u32 %v1643_v47, %v1640_v55  ;;  %v9779_v3 = vmov 0  ;;  %9784 = vst [vmem:[#allocation64_spill] sm:$0xff] %v8157_v48  ;;  %v8171_v34 = vld [vmem:[%s7289_s25 + $0x18] sm:$0xf] }
  0xa9   : > { %v3878_v11 = vrot.slane %v3876_v35, 1  ;;  %v958_v40 = vsel %vm7337_vm15, %v7343_v45, %v957_v30  ;;  %v2390_v18 = vshrl.u32 %v2107_v9, 16  ;;  %v962_v15 = vor.u32 %v961_v2, %v957_v30 }
  0xaa   : > { %vm8146_vm11 = vcmp.ne.s16.totalorder %v958_v40, 0  ;;  %v2393_v14 = vshll.u32 %v2107_v9, 16  ;;  %v3676_v61 = vsel %vm9510_vm4, %v8137_v16, 0  ;;  %vm9782_vm0 = vsmask.f32 4352  ;;  %v9787_v40 = vld [vmem:[#allocation5_spill] sm:$0xff] }
  0xab   : > { %v9780_v3 = vsel %vm8146_vm11, 4294967295, %v9779_v3  ;;  %v1645_v39 = vsel %vm9782_vm0, %v1635_v43, %v8141_v60  ;;  %vm9783_vm13 = vsmask.f32 7424  ;;  %v1181_v30 = vsel %vm8146_vm11, %v8157_v48, 0  ;;  %v8165_v9 = vld [vmem:[%s7289_s25 + $0x10] sm:$0xf] }
  0xac   : > { %9781 = vst [vmem:[#allocation63_spill] sm:$0xff] %v9780_v3  ;;  %v3879_v35 = vsel %vm9783_vm13, %v3874_v59, %v3878_v11  ;;  %v2392_v7 = vrot.slane %v2390_v18, 7  ;;  %vm9785_vm10 = vcmask 23552   ;;  %v963_v55 = vrot.slane %v962_v15, 4 }
  0xad   : > { %6437 = vmatmul.mubr.msk.bf16.gmra.mrb[8].mxu1 %vm9785_vm10, %v1645_v39  ;;  %vm9786_vm8 = vmmov %vm9785_vm10  ;;  %v3882_v47 = vor.u32 %v3880_v0, %v3878_v11  ;;  %vm668_vm4 = vcmp.gt.s32.totalorder %v384_v38, 0  ;;  %v398_v43 = vand.u32 15, %v254_v52  ;;  %vm9788_vm13 = vcmp.ne.s16.totalorder %v9787_v40, 0  ;;  %v8180_v38 = vld [vmem:[%s7289_s25 + $0x88] sm:$0xf] }
  0xae   : > { %6589 = vmatmul.mubr.msk.bf16.gmra.mrb[24].mxu0 %vm9786_vm8, %v3879_v35  ;;  %v2395_v2 = vor.u32 %v2393_v14, %v2392_v7  ;;  %vm764_vm0 = vmpackc.low %vm668_vm4, %vm668_vm4  ;;  %v2397_v59 = vrot.slane %v2392_v7, 4  ;;  %v4140_v18 = vsel %vm9788_vm13, %v8165_v9, 0  ;;  %v4142_v15 = vsel %vm7372_vm2, %v8171_v34, 0  ;;  %9789 = vst [vmem:[#allocation65_spill] sm:$0xff] %v8180_v38  ;;  %v8184_v11 = vld [vmem:[%s7289_s25 + $0x1c] sm:$0xf] }
  0xaf   : > { %v968_v52 = vsel %vm7337_vm15, %v963_v55, %v7295_v21  ;;  %v796_v0 = vsel %vm764_vm0, 65537, %v9652_v22  ;;  %vm670_vm8 = vcmp.gt.s32.totalorder %v398_v43, 0  ;;  %v4143_v14 = vsel %vm7751_vm1, %v8184_v11, 0  ;;  %v8200_v43 = vld [vmem:[%s7289_s25 + $0x3c] sm:$0xf] }
  0xb0   : > { %vm8189_vm10 = vcmp.ne.s16.totalorder %v968_v52, 0  ;;  %v9790_v39 = vmov 0  ;;  %v2396_v35 = vsel %vm7380_vm3, %v7352_v53, %v2395_v2  ;;  %v975_v7 = vshll.u32 %v796_v0, 16  ;;  %vm766_vm4 = vmpackc.low %vm670_vm8, %vm670_vm8 }
  0xb1   : > { %v9791_v39 = vsel %vm8189_vm10, 4294967295, %v9790_v39  ;;  %v979_v55 = vshrl.u32 %v796_v0, 16  ;;  %v1182_v20 = vsel %vm8189_vm10, %v8200_v43, 0  ;;  %vm8205_vm0 = vcmp.ne.s16.totalorder %v2396_v35, 0 }
  0xb2   : > { %9792 = vst [vmem:[#allocation66_spill] sm:$0xff] %v9791_v39  ;;  %v9794_v52 = vmov 0  ;;  %vm8209_vm13 = vcmp.ne.s16.totalorder %v2397_v59, 0  ;;  %v9797_v40 = vmov 0  ;;  %v798_v53 = vsel %vm766_vm4, 65537, %v9652_v22 }
  0xb3   : > { %v9795_v52 = vsel %vm8205_vm0, 4294967295, %v9794_v52  ;;  %v9798_v40 = vsel %vm8209_vm13, 4294967295, %v9797_v40  ;;  %v5907_v1 = vcombine.low %v1181_v30, %v1182_v20  ;;  %v3677_v2 = vsel %vm8205_vm0, %v8180_v38, 0 }
  0xb4   : > { %9796 = vst [vmem:[#allocation68_spill] sm:$0xff] %v9795_v52  ;;  %9799 = vst [vmem:[#allocation69_spill] sm:$0xff] %v9798_v40  ;;  %v977_v0 = vrot.slane %v975_v7, 5  ;;  %v981_v62 = vrot.slane %v979_v55, 4  ;;  %v6035_v13 = vcombine.low %v3676_v61, %v3677_v2  ;;  %v3678_v35 = vsel %vm8209_vm13, %v8197_v63, 0 }
  0xb5   : > { %v995_v24 = vshll.u32 %v798_v53, 16  ;;  %v999_v59 = vshrl.u32 %v798_v53, 16  ;;  %v1647_v33 = vshrl.u32 %v5907_v1, 16  ;;  %v1650_v31 = vshll.u32 %v5907_v1, 16 }
  0xb6   : > { %v978_v20 = vsel %vm7337_vm15, %v7343_v45, %v977_v0  ;;  %v982_v30 = vor.u32 %v981_v62, %v977_v0  ;;  %v3884_v28 = vshll.u32 %v6035_v13, 16  ;;  %v9800_v52 = vmov 0 }
  0xb7   : > { %vm8223_vm3 = vcmp.ne.s16.totalorder %v978_v20, 0  ;;  %v6036_v7 = vcombine.low %v3678_v35, %v3678_v35  ;;  %v3888_v61 = vshrl.u32 %v6035_v13, 16  ;;  %v1649_v55 = vrot.slane %v1647_v33, 3  ;;  %v8305_v13 = vld [vmem:[%s7289_s25 + $0x28] sm:$0xf] }
  0xb8   : > { %v9801_v52 = vsel %vm8223_vm3, 4294967295, %v9800_v52  ;;  %v1652_v2 = vrot.slane %v1650_v31, 4  ;;  %v983_v40 = vrot.slane %v982_v30, 4  ;;  %v1183_v53 = vsel %vm8223_vm3, %v8228_v44, 0 }
  0xb9   : > { %9802 = vst [vmem:[#allocation70_spill] sm:$0xff] %v9801_v52  ;;  %v3886_v1 = vrot.slane %v3884_v28, 1  ;;  %v3892_v36 = vshll.u32 %v6036_v7, 16  ;;  %v997_v62 = vrot.slane %v995_v24, 5  ;;  %v1001_v0 = vrot.slane %v999_v59, 4 }
  0xba   : > { %v1653_v20 = vor.u32 %v1652_v2, %v1649_v55  ;;  %v988_v35 = vsel %vm7337_vm15, %v983_v40, %v7295_v21  ;;  %v9804_v33 = vsel %vm7419_vm5, %v9709_v37, 0  ;;  %v6055_v30 = vcombine.low %v4142_v15, %v4143_v14  ;;  %v8249_v40 = vld [vmem:[%s7289_s25 + $0x44] sm:$0xf]  ;;  %v6087_v14 = vld [vmem:[%s9393_s1 + $0xe] sm:$0x3] }
  0xbb   : > { %v6054_v31 = vcombine.low %v4140_v18, %v9804_v33  ;;  %vm9805_vm8 = vsmask.f32 7424  ;;  %vm8241_vm4 = vcmp.ne.s16.totalorder %v988_v35, 0  ;;  %v9806_v38 = vmov 0  ;;  %9811 = vst [vmem:[#allocation72_spill] sm:$0xff] %v8249_v40 }
  0xbc   : > { %v3887_v63 = vsel %vm9805_vm8, %v3882_v47, %v3886_v1  ;;  %v9807_v38 = vsel %vm8241_vm4, 4294967295, %v9806_v38  ;;  %v3890_v28 = vor.u32 %v3888_v61, %v3886_v1  ;;  %v3894_v24 = vrot.slane %v3892_v36, 1  ;;  %v8268_v61 = vld [vmem:[%s7289_s25 + $0x48] sm:$0xf] }
  0xbd   : > { %9808 = vst [vmem:[#allocation71_spill] sm:$0xff] %v9807_v38  ;;  %vm9809_vm13 = vsmask.f32 4352  ;;  %vm9810_vm1 = vcmask 23552   ;;  %v1184_v37 = vsel %vm8241_vm4, %v8249_v40, 0  ;;  %v998_v47 = vsel %vm7337_vm15, %v7343_v45, %v997_v62  ;;  %9816 = vst [vmem:[#allocation73_spill] sm:$0xff] %v8268_v61 }
  0xbe   : > { %v1654_v59 = vsel %vm9809_vm13, %v8141_v60, %v1653_v20  ;;  %6592 = vmatprep.mubr.msk.bf16.mxu0 %vm9810_vm1, %v3887_v63  ;;  %v1002_v18 = vor.u32 %v1001_v0, %v997_v62  ;;  %vm9812_vm8 = vmmov %vm9810_vm1  ;;  %v5908_v15 = vcombine.low %v1183_v53, %v1184_v37  ;;  %vm9813_vm2 = vsmask.f32 7424 }
  0xbf   : > { %6440 = vmatprep.mubr.msk.bf16.mxu1 %vm9812_vm8, %v1654_v59  ;;  %v3895_v36 = vsel %vm9813_vm2, %v3890_v28, %v3894_v24  ;;  %vm8259_vm5 = vcmp.ne.s16.totalorder %v998_v47, 0  ;;  %v9814_v60 = vmov 0  ;;  %v4259_v63 = vshrl.u32 %v6054_v31, 16  ;;  %vm9820_vm8 = vmmov %vm9809_vm13 }
  0xc0   : > { %v9815_v60 = vsel %vm8259_vm5, 4294967295, %v9814_v60  ;;  %6593 = vmatmul.mubr.msk.bf16.gmra.mrb[28].mxu0 %vm9810_vm1, %v3895_v36  ;;  %v1003_v7 = vrot.slane %v1002_v18, 4  ;;  %v1185_v55 = vsel %vm8259_vm5, %v8268_v61, 0  ;;  %v4262_v2 = vshll.u32 %v6054_v31, 16 }
  0xc1   : > { %v4267_v53 = vshrl.u32 %v6055_v30, 16  ;;  %v1656_v1 = vshrl.u32 %v5908_v15, 16  ;;  %v1659_v62 = vshll.u32 %v5908_v15, 16  ;;  %v4261_v0 = vrot.slane %v4259_v63, 3  ;;  %v8284_v15 = vld [vmem:[%s7289_s25 + $0x4c] sm:$0xf] }
  0xc2   : > { %v4270_v35 = vshll.u32 %v6055_v30, 16  ;;  %v1008_v33 = vsel %vm7337_vm15, %v1003_v7, %v7295_v21  ;;  %v4264_v28 = vrot.slane %v4262_v2, 4  ;;  %v8277_v59 = vand.u32 %v6087_v14, %v7263_v5  ;;  %9819 = vst [vmem:[#allocation74_spill] sm:$0xff] %v8284_v15  ;;  %v8292_v14 = vld [vmem:[%s7289_s25 + $0x20] sm:$0xf] }
  0xc3   : > { %v4269_v24 = vrot.slane %v4267_v53, 3  ;;  %v1658_v37 = vrot.slane %v1656_v1, 3  ;;  %v1661_v47 = vrot.slane %v1659_v62, 4  ;;  %vm8279_vm2 = vcmp.ne.s16.totalorder %v1008_v33, 0  ;;  %v8298_v62 = vld [vmem:[%s7289_s25 + $0x24] sm:$0xf] }
  0xc4   : > { %v9817_v31 = vmov 0  ;;  %v4272_v18 = vrot.slane %v4270_v35, 4  ;;  %v1186_v30 = vsel %vm8279_vm2, %v8284_v15, 0  ;;  %v4265_v36 = vor.u32 %v4264_v28, %v4261_v0  ;;  %6630 = vmatprep.subr.bf16.mxu0 %v8277_v59 }
  0xc5   : > { %v9818_v31 = vsel %vm8279_vm2, 4294967295, %v9817_v31  ;;  %v256_v63 = vadd.s32 160, %v7267_v6  ;;  %v4144_v7 = vsel %vm7879_vm12, %v8292_v14, 0  ;;  %v1662_v2 = vor.u32 %v1661_v47, %v1658_v37 }
  0xc6   : > { %v5909_v53 = vcombine.low %v1185_v55, %v1186_v30  ;;  %v4273_v1 = vor.u32 %v4272_v18, %v4269_v24  ;;  %v4145_v35 = vsel %vm7899_vm7, %v8298_v62, 0  ;;  %v258_v28 = vadd.s32 176, %v7267_v6  ;;  %vm9821_vm7 = vmmov %vm9810_vm1 }
  0xc7   : > { %v412_v0 = vand.u32 15, %v256_v63  ;;  %v6056_v33 = vcombine.low %v4144_v7, %v4145_v35  ;;  %v4146_v58 = vsel %vm7918_vm9, %v8305_v13, 0  ;;  %v1663_v55 = vsel %vm9809_vm13, %v1653_v20, %v1662_v2 }
  0xc8   : > { %v1665_v24 = vshrl.u32 %v5909_v53, 16  ;;  %v1668_v37 = vshll.u32 %v5909_v53, 16  ;;  %v4274_v47 = vsel %vm9820_vm8, %v4265_v36, %v4273_v1  ;;  %6441 = vmatmul.mubr.msk.bf16.gmra.mrb[12].mxu1 %vm9810_vm1, %v1663_v55  ;;  %v426_v63 = vand.u32 15, %v258_v28 }
  0xc9   : > { %6598 = vmatprep.mubr.msk.bf16.mxu0 %vm9821_vm7, %v4274_v47  ;;  %vm672_vm12 = vcmp.gt.s32.totalorder %v412_v0, 0  ;;  %v4276_v18 = vshrl.u32 %v6056_v33, 16  ;;  %v4279_v30 = vshll.u32 %v6056_v33, 16  ;;  %v4147_v20 = vsel %vm7937_vm6, %v8315_v29, 0 }
  0xca   : > { %v1667_v7 = vrot.slane %v1665_v24, 3  ;;  %v1670_v35 = vrot.slane %v1668_v37, 4  ;;  %vm768_vm0 = vmpackc.low %vm672_vm12, %vm672_vm12  ;;  %v260_v53 = vadd.s32 192, %v7267_v6  ;;  %vm674_vm7 = vcmp.gt.s32.totalorder %v426_v63, 0 }
  0xcb   : > { %v800_v36 = vsel %vm768_vm0, 65537, %v9652_v22  ;;  %v4278_v55 = vrot.slane %v4276_v18, 3  ;;  %v4281_v51 = vrot.slane %v4279_v30, 4  ;;  %vm770_vm13 = vmpackc.low %vm674_vm7, %vm674_vm7  ;;  %v6057_v24 = vcombine.low %v4146_v58, %v4147_v20 }
  0xcc   : > { %v8322_v0 = vor.u32 %v1670_v35, %v1667_v7  ;;  %v1015_v33 = vshll.u32 %v800_v36, 16  ;;  %v1019_v28 = vshrl.u32 %v800_v36, 16  ;;  %v802_v47 = vsel %vm770_vm13, 65537, %v9652_v22  ;;  %vm9823_vm12 = vmmov %vm9820_vm8 }
  0xcd   : > { %v4282_v37 = vor.u32 %v4281_v51, %v4278_v55  ;;  %v440_v57 = vand.u32 15, %v260_v53  ;;  %v4148_v41 = vsel %vm7969_vm14, %v8085_v49, 0  ;;  %v1035_v63 = vshll.u32 %v802_v47, 16  ;;  %vm9824_vm0 = vmmov %vm9810_vm1 }
  0xce   : > { %v1672_v50 = vsel %vm9823_vm12, %v1662_v2, %v8322_v0  ;;  %v1017_v18 = vrot.slane %v1015_v33, 5  ;;  %v1021_v30 = vrot.slane %v1019_v28, 4  ;;  %v1039_v58 = vshrl.u32 %v802_v47, 16  ;;  %vm9825_vm1 = vmmov %vm9824_vm0  ;;  %v8342_v28 = vld [vmem:[%s7289_s25 + $0x50] sm:$0xf] }
  0xcf   : > { %6444 = vmatprep.mubr.msk.bf16.mxu1 %vm9824_vm0, %v1672_v50  ;;  %v4283_v7 = vsel %vm9820_vm8, %v4273_v1, %v4282_v37  ;;  %v4285_v51 = vshrl.u32 %v6057_v24, 16  ;;  %v4288_v35 = vshll.u32 %v6057_v24, 16  ;;  %v1037_v36 = vrot.slane %v1035_v63, 5  ;;  %9828 = vst [vmem:[#allocation76_spill] sm:$0xff] %v8342_v28 }
  0xd0   : > { %v1018_v20 = vsel %vm7337_vm15, %v7343_v45, %v1017_v18  ;;  %v1022_v53 = vor.u32 %v1021_v30, %v1017_v18  ;;  %6599 = vmatmul.mubr.msk.bf16.vlgmr.msra.gmra.mrb[0].mxu0 %vm9825_vm1, %v4283_v7  ;;  %vm676_vm7 = vcmp.gt.s32.totalorder %v440_v57, 0  ;;  %v1041_v50 = vrot.slane %v1039_v58, 4  ;;  %v8359_v58 = vld [vmem:[%s7289_s25 + $0x58] sm:$0xf] }
  0xd1   : > { %vm8336_vm13 = vcmp.ne.s16.totalorder %v1018_v20, 0  ;;  %6631 = vmatpush3.bf16.msra.mxu0 %v8277_v59  ;;  %v4287_v1 = vrot.slane %v4285_v51, 3  ;;  %v4290_v55 = vrot.slane %v4288_v35, 4  ;;  %vm772_vm12 = vmpackc.low %vm676_vm7, %vm676_vm7  ;;  %v1038_v57 = vsel %vm7337_vm15, %v7343_v45, %v1037_v36 }
  0xd2   : > { %v1023_v33 = vrot.slane %v1022_v53, 4  ;;  %v1187_v24 = vsel %vm8336_vm13, %v8342_v28, 0  ;;  %v804_v47 = vsel %vm772_vm12, 65537, %v9652_v22  ;;  %v1042_v18 = vor.u32 %v1041_v50, %v1037_v36 }
  0xd3   : > { %vm8351_vm0 = vcmp.ne.s16.totalorder %v1038_v57, 0  ;;  %v9829_v59 = vmov 0  ;;  %v4291_v30 = vor.u32 %v4290_v55, %v4287_v1  ;;  %v1055_v63 = vshll.u32 %v804_v47, 16  ;;  %v8373_v55 = vld [vmem:[%s7289_s25 + $0x54] sm:$0xf] }
  0xd4   : > { %v9830_v59 = vsel %vm8351_vm0, 4294967295, %v9829_v59  ;;  %v1028_v7 = vsel %vm7337_vm15, %v1023_v33, %v7295_v21  ;;  %v1189_v51 = vsel %vm8351_vm0, %v8359_v58, 0  ;;  %v1059_v35 = vshrl.u32 %v804_v47, 16  ;;  %9835 = vst [vmem:[#allocation77_spill] sm:$0xff] %v8373_v55 }
  0xd5   : > { %vm9831_vm8 = vnez %v9740_v12  ;;  %vm8367_vm1 = vcmp.ne.s16.totalorder %v1028_v7, 0  ;;  %v9832_v53 = vmov 0  ;;  %v1043_v36 = vrot.slane %v1042_v18, 4 }
  0xd6   : > { %v4149_v20 = vsel %vm9831_vm8, %v8112_v26, 0  ;;  %v9833_v53 = vsel %vm8367_vm1, 4294967295, %v9832_v53  ;;  %vm9834_vm7 = vsmask.f32 4352  ;;  %v1057_v1 = vrot.slane %v1055_v63, 5 }
  0xd7   : > { %v4292_v50 = vsel %vm9834_vm7, %v4282_v37, %v4291_v30  ;;  %v1188_v33 = vsel %vm8367_vm1, %v8373_v55, 0  ;;  %vm9836_vm12 = vcmask 23552   ;;  %v1061_v57 = vrot.slane %v1059_v35, 4 }
  0xd8   : > { %6602 = vmatprep.mubr.msk.bf16.mxu0 %vm9836_vm12, %v4292_v50  ;;  %v6058_v47 = vcombine.low %v4148_v41, %v4149_v20  ;;  %v262_v7 = vadd.s32 208, %v7267_v6  ;;  %v5910_v12 = vcombine.low %v1187_v24, %v1188_v33  ;;  %v1048_v37 = vsel %vm7337_vm15, %v1043_v36, %v7295_v21  ;;  %v8398_v33 = vld [vmem:[%s7289_s25 + $0x5c] sm:$0xf] }
  0xd9   : > { %v1058_v18 = vsel %vm7337_vm15, %v7343_v45, %v1057_v1  ;;  %vm9837_vm7 = vnez %v9749_v56  ;;  %vm8389_vm8 = vcmp.ne.s16.totalorder %v1048_v37, 0  ;;  %v9838_v50 = vmov 0  ;;  %v8404_v56 = vld [vmem:[%s7289_s25 + $0x60] sm:$0xf] }
  0xda   : > { %v4150_v63 = vsel %vm9837_vm7, %v8157_v48, 0  ;;  %v9839_v50 = vsel %vm8389_vm8, 4294967295, %v9838_v50  ;;  %v1062_v41 = vor.u32 %v1061_v57, %v1057_v1  ;;  %vm8393_vm12 = vcmp.ne.s16.totalorder %v1058_v18, 0 }
  0xdb   : > { %v9840_v35 = vmov 0  ;;  %v4294_v24 = vshrl.u32 %v6058_v47, 16  ;;  %v1674_v20 = vshrl.u32 %v5910_v12, 16  ;;  %v1677_v36 = vshll.u32 %v5910_v12, 16 }
  0xdc   : > { %v9841_v35 = vsel %vm8393_vm12, 4294967295, %v9840_v35  ;;  %v1190_v10 = vsel %vm8389_vm8, %v8398_v33, 0  ;;  %v1191_v37 = vsel %vm8393_vm12, %v8404_v56, 0  ;;  %v1063_v57 = vrot.slane %v1062_v41, 4  ;;  %v8420_v41 = vld [vmem:[%s7289_s25 + $0x64] sm:$0xf] }
  0xdd   : > { %9842 = vst [vmem:[#allocation78_spill] sm:$0xff] %v9841_v35  ;;  %v5911_v1 = vcombine.low %v1189_v51, %v1190_v10  ;;  %v4296_v18 = vrot.slane %v4294_v24, 3  ;;  %v4297_v16 = vshll.u32 %v6058_v47, 16  ;;  %v1676_v8 = vrot.slane %v1674_v20, 3 }
  0xde   : > { %v1679_v48 = vrot.slane %v1677_v36, 4  ;;  %v454_v12 = vand.u32 15, %v262_v7  ;;  %vm9843_vm7 = vnez %v9754_v54  ;;  %v1068_v49 = vsel %vm7337_vm15, %v1063_v57, %v7295_v21 }
  0xdf   : > { %v4151_v23 = vsel %vm9843_vm7, %v8200_v43, 0  ;;  %v1683_v26 = vshrl.u32 %v5911_v1, 16  ;;  %v1686_v4 = vshll.u32 %v5911_v1, 16  ;;  %v4299_v29 = vrot.slane %v4297_v16, 4 }
  0xe0   : > { %v1680_v35 = vor.u32 %v1679_v48, %v1676_v8  ;;  %vm8415_vm14 = vcmp.ne.s16.totalorder %v1068_v49, 0  ;;  %v9844_v10 = vmov 0  ;;  %vm678_vm6 = vcmp.gt.s32.totalorder %v454_v12, 0 }
  0xe1   : > { %v9845_v10 = vsel %vm8415_vm14, 4294967295, %v9844_v10  ;;  %v6059_v51 = vcombine.low %v4150_v63, %v4151_v23  ;;  %v1685_v47 = vrot.slane %v1683_v26, 3  ;;  %v1688_v7 = vrot.slane %v1686_v4, 4  ;;  %vm774_vm7 = vmpackc.low %vm678_vm6, %vm678_vm6 }
  0xe2   : > { %v1192_v24 = vsel %vm8415_vm14, %v8420_v41, 0  ;;  %v4300_v20 = vor.u32 %v4299_v29, %v4296_v18  ;;  %vm9846_vm9 = vsmask.f32 4352  ;;  %v806_v49 = vsel %vm774_vm7, 65537, %v9652_v22 }
  0xe3   : > { %v1681_v16 = vsel %vm9846_vm9, %v8322_v0, %v1680_v35  ;;  %v5912_v8 = vcombine.low %v1191_v37, %v1192_v24  ;;  %v4303_v48 = vshrl.u32 %v6059_v51, 16  ;;  %vm9847_vm12 = vcmask 23552   ;;  %vm9848_vm8 = vmmov %vm9846_vm9 }
  0xe4   : > { %6445 = vmatmul.mubr.msk.bf16.gmra.mrb[16].mxu1 %vm9847_vm12, %v1681_v16  ;;  %v1689_v23 = vor.u32 %v1688_v7, %v1685_v47  ;;  %v4301_v4 = vsel %vm9848_vm8, %v4291_v30, %v4300_v20  ;;  %v1075_v26 = vshll.u32 %v806_v49, 16  ;;  %v1079_v63 = vshrl.u32 %v806_v49, 16  ;;  %vm9849_vm0 = vmmov %vm9847_vm12 }
  0xe5   : > { %v1692_v36 = vshrl.u32 %v5912_v8, 16  ;;  %v1695_v1 = vshll.u32 %v5912_v8, 16  ;;  %6603 = vmatmul.mubr.msk.bf16.gmra.mrb[4].mxu0 %vm9849_vm0, %v4301_v4  ;;  %v4305_v29 = vrot.slane %v4303_v48, 3  ;;  %v4306_v57 = vshll.u32 %v6059_v51, 16  ;;  %vm9850_vm6 = vmmov %vm9848_vm8 }
  0xe6   : > { %v1690_v18 = vsel %vm9850_vm6, %v1680_v35, %v1689_v23  ;;  %v1077_v0 = vrot.slane %v1075_v26, 5  ;;  %v1081_v37 = vrot.slane %v1079_v63, 4  ;;  %v264_v12 = vadd.s32 224, %v7267_v6  ;;  %vm9851_vm9 = vmmov %vm9849_vm0 }
  0xe7   : > { %6448 = vmatprep.mubr.msk.bf16.mxu1 %vm9851_vm9, %v1690_v18  ;;  %v1694_v47 = vrot.slane %v1692_v36, 3  ;;  %v1697_v7 = vrot.slane %v1695_v1, 4  ;;  %v4308_v30 = vrot.slane %v4306_v57, 4  ;;  %vm9852_vm8 = vnez %v9762_v32  ;;  %v8450_v36 = vld [vmem:[%s7289_s25 + $0x68] sm:$0xf]  ;;  %vm9856_vm9 = vmmov %vm9850_vm6 }
  0xe8   : > { %v4152_v24 = vsel %vm9852_vm8, %v8228_v44, 0  ;;  %v1078_v51 = vsel %vm7337_vm15, %v7343_v45, %v1077_v0  ;;  %v1082_v16 = vor.u32 %v1081_v37, %v1077_v0  ;;  %v468_v35 = vand.u32 15, %v264_v12  ;;  %v8540_v32 = vld [vmem:[%s7289_s25 + $0xc] sm:$0xf] }
  0xe9   : > { %vm9853_vm0 = vnez %v9769_v17  ;;  %v8443_v49 = vor.u32 %v1697_v7, %v1694_v47  ;;  %vm8445_vm7 = vcmp.ne.s16.totalorder %v1078_v51, 0  ;;  %v4309_v4 = vor.u32 %v4308_v30, %v4305_v29  ;;  %v8473_v51 = vld [vmem:[%s7289_s25 + $0x6c] sm:$0xf]  ;;  %9873 = vst [vmem:[#allocation83_spill] sm:$0xff] %v8540_v32 }
  0xea   : > { %v4153_v8 = vsel %vm9853_vm0, %v8249_v40, 0  ;;  %v1083_v63 = vrot.slane %v1082_v16, 4  ;;  %v1193_v1 = vsel %vm8445_vm7, %v8450_v36, 0  ;;  %vm680_vm12 = vcmp.gt.s32.totalorder %v468_v35, 0 }
  0xeb   : > { %v6060_v26 = vcombine.low %v4152_v24, %v4153_v8  ;;  %v266_v57 = vadd.s32 240, %v7267_v6  ;;  %v1699_v18 = vsel %vm9850_vm6, %v1689_v23, %v8443_v49  ;;  %v4310_v0 = vsel %vm9856_vm9, %v4300_v20, %v4309_v4  ;;  %vm776_vm0 = vmpackc.low %vm680_vm12, %vm680_vm12 }
  0xec   : > { %vm9857_vm8 = vcmask 23552   ;;  %v1088_v12 = vsel %vm7337_vm15, %v1083_v63, %v7295_v21  ;;  %v808_v47 = vsel %vm776_vm0, 65537, %v9652_v22  ;;  %v4154_v23 = vsel %vm8146_vm11, %v8268_v61, 0 }
  0xed   : > { %v4312_v37 = vshrl.u32 %v6060_v26, 16  ;;  %v4315_v29 = vshll.u32 %v6060_v26, 16  ;;  %6449 = vmatmul.mubr.msk.bf16.gmra.mrb[20].mxu1 %vm9857_vm8, %v1699_v18  ;;  %vm9858_vm14 = vmmov %vm9857_vm8  ;;  %v482_v6 = vand.u32 15, %v266_v57  ;;  %vm8468_vm6 = vcmp.ne.s16.totalorder %v1088_v12, 0 }
  0xee   : > { %6606 = vmatprep.mubr.msk.bf16.mxu0 %vm9858_vm14, %v4310_v0  ;;  %v1095_v7 = vshll.u32 %v808_v47, 16  ;;  %v1099_v30 = vshrl.u32 %v808_v47, 16  ;;  %v1194_v16 = vsel %vm8468_vm6, %v8473_v51, 0  ;;  %v4155_v8 = vsel %vm8189_vm10, %v8284_v15, 0 }
  0xef   : > { %v4314_v24 = vrot.slane %v4312_v37, 3  ;;  %v4317_v35 = vrot.slane %v4315_v29, 4  ;;  %vm682_vm14 = vcmp.gt.s32.totalorder %v482_v6, 0  ;;  %v5913_v26 = vcombine.low %v1193_v1, %v1194_v16 }
  0xf0   : > { %v1097_v63 = vrot.slane %v1095_v7, 5  ;;  %v1101_v57 = vrot.slane %v1099_v30, 4  ;;  %vm778_vm8 = vmpackc.low %vm682_vm14, %vm682_vm14  ;;  %v6061_v18 = vcombine.low %v4154_v23, %v4155_v8  ;;  %vm9584_vm0 = vcmp.ne.s16.totalorder %v7343_v45, 0  ;;  %v8495_v8 = vld [vmem:[%s7289_s25 + $0x70] sm:$0xf] }
  0xf1   : > { %v4318_v0 = vor.u32 %v4317_v35, %v4314_v24  ;;  %v810_v37 = vsel %vm778_vm8, 65537, %v9652_v22  ;;  %v4156_v29 = vsel %vm8223_vm3, %v8342_v28, 0  ;;  %v1701_v12 = vshrl.u32 %v5913_v26, 16  ;;  %v9884_v28 = vld [vmem:[#allocation14_spill] sm:$0xff] }
  0xf2   : > { %v1704_v47 = vshll.u32 %v5913_v26, 16  ;;  %v1098_v1 = vsel %vm7337_vm15, %v7343_v45, %v1097_v63  ;;  %v1102_v6 = vor.u32 %v1101_v57, %v1097_v63  ;;  %v9861_v7 = vmov 0 }
  0xf3   : > { %vm8489_vm12 = vcmp.ne.s16.totalorder %v1098_v1, 0  ;;  %v4319_v22 = vsel %vm9856_vm9, %v4309_v4, %v4318_v0  ;;  %v1115_v23 = vshll.u32 %v810_v37, 16  ;;  %v1119_v30 = vshrl.u32 %v810_v37, 16  ;;  %v8505_v37 = vld [vmem:[%s7289_s25 + $0x80] sm:$0xf] }
  0xf4   : > { %v9862_v7 = vsel %vm8489_vm12, 4294967295, %v9861_v7  ;;  %v1703_v24 = vrot.slane %v1701_v12, 3  ;;  %v1706_v16 = vrot.slane %v1704_v47, 4  ;;  %v1103_v35 = vrot.slane %v1102_v6, 4  ;;  %9865 = vst [vmem:[#allocation80_spill] sm:$0xff] %v8505_v37 }
  0xf5   : > { %9863 = vst [vmem:[#allocation79_spill] sm:$0xff] %v9862_v7  ;;  %v1195_v26 = vsel %vm8489_vm12, %v8495_v8, 0  ;;  %vm9864_vm14 = vcmask 23552   ;;  %v1117_v63 = vrot.slane %v1115_v23, 5  ;;  %v1121_v57 = vrot.slane %v1119_v30, 4  ;;  %v9968_v7 = vld [vmem:[#allocation43_spill] sm:$0xff] }
  0xf6   : > { %6607 = vmatmul.mubr.msk.bf16.gmra.mrb[8].mxu0 %vm9864_vm14, %v4319_v22  ;;  %v4321_v1 = vshrl.u32 %v6061_v18, 16  ;;  %v4324_v52 = vshll.u32 %v6061_v18, 16  ;;  %v1707_v39 = vor.u32 %v1706_v16, %v1703_v24  ;;  %v1108_v4 = vsel %vm7337_vm15, %v1103_v35, %v7295_v21  ;;  %v8523_v24 = vld [vmem:[%s7289_s25 + $0x74] sm:$0xf] }
  0xf7   : > { %v1199_v12 = vsel %vm9584_vm0, %v8505_v37, 0  ;;  %v4157_v47 = vsel %vm8241_vm4, %v8373_v55, 0  ;;  %vm8513_vm8 = vcmp.ne.s16.totalorder %v1108_v4, 0  ;;  %v9866_v6 = vmov 0 }
  0xf8   : > { %v9867_v6 = vsel %vm8513_vm8, 4294967295, %v9866_v6  ;;  %v1118_v18 = vsel %vm7337_vm15, %v7343_v45, %v1117_v63  ;;  %v1122_v22 = vor.u32 %v1121_v57, %v1117_v63  ;;  %v4323_v23 = vrot.slane %v4321_v1, 3  ;;  %v8534_v63 = vld [vmem:[%s7289_s25 + $0x78] sm:$0xf]  ;;  %v9886_v45 = vld [vmem:[#allocation19_spill] sm:$0xff] }
  0xf9   : > { %9868 = vst [vmem:[#allocation81_spill] sm:$0xff] %v9867_v6  ;;  %v1708_v30 = vsel %vm9856_vm9, %v8443_v49, %v1707_v39  ;;  %v1196_v16 = vsel %vm8513_vm8, %v8523_v24, 0  ;;  %vm8528_vm14 = vcmp.ne.s16.totalorder %v1118_v18, 0  ;;  %v9869_v35 = vmov 0  ;;  %v9874_v18 = vld [vmem:[#allocation18_spill] sm:$0xff] }
  0xfa   : > { %v9870_v35 = vsel %vm8528_vm14, 4294967295, %v9869_v35  ;;  %v4326_v4 = vrot.slane %v4324_v52, 4  ;;  %vm9872_vm0 = vcmask 23552   ;;  %v5914_v38 = vcombine.low %v1195_v26, %v1196_v16 }
  0xfb   : > { %9871 = vst [vmem:[#allocation82_spill] sm:$0xff] %v9870_v35  ;;  %6452 = vmatprep.mubr.msk.bf16.mxu1 %vm9872_vm0, %v1708_v30  ;;  %v1123_v3 = vrot.slane %v1122_v22, 4  ;;  %v1197_v49 = vsel %vm8528_vm14, %v8534_v63, 0  ;;  %v5916_v57 = vcombine.low %v1199_v12, %v1199_v12  ;;  %v6062_v17 = vcombine.low %v4156_v29, %v4157_v47  ;;  %v9876_v30 = vld [vmem:[#allocation27_spill] sm:$0xff] }
  0xfc   : > { %v4327_v1 = vor.u32 %v4326_v4, %v4323_v23  ;;  %vm9875_vm9 = vcmp.ne.s16.totalorder %v9874_v18, 0  ;;  %vm9877_vm0 = vnez %v9876_v30  ;;  %v1710_v22 = vshrl.u32 %v5914_v38, 16  ;;  %v5967_v30 = vld [vmem:[%s9393_s1 + $0x6] sm:$0x3] }
  0xfd   : > { %v2433_v52 = vsel %vm9875_vm9, %v8540_v32, 0  ;;  %v2434_v26 = vsel %vm9877_vm0, %v8165_v9, 0  ;;  %v1713_v16 = vshll.u32 %v5914_v38, 16  ;;  %v1128_v54 = vsel %vm7337_vm15, %v1123_v3, %v7295_v21  ;;  %v8560_v38 = vld [vmem:[%s7289_s25 + $0x7c] sm:$0xf] }
  0xfe   : > { %v1728_v12 = vshrl.u32 %v5916_v57, 16  ;;  %vm8551_vm4 = vcmp.ne.s16.totalorder %v1128_v54, 0  ;;  %v9878_v23 = vmov 0  ;;  %vm9881_vm3 = vsmask.f32 4352  ;;  %9882 = vst [vmem:[#allocation85_spill] sm:$0xff] %v8560_v38 }
  0xff   : > { %v9879_v23 = vsel %vm8551_vm4, 4294967295, %v9878_v23  ;;  %v4328_v29 = vsel %vm9881_vm3, %v4318_v0, %v4327_v1  ;;  %v1731_v47 = vshll.u32 %v5916_v57, 16  ;;  %v4330_v4 = vshrl.u32 %v6062_v17, 16 }
 0x100   : > { %9880 = vst [vmem:[#allocation84_spill] sm:$0xff] %v9879_v23  ;;  %v1712_v9 = vrot.slane %v1710_v22, 3  ;;  %v1715_v18 = vrot.slane %v1713_v16, 4  ;;  %v1198_v21 = vsel %vm8551_vm4, %v8560_v38, 0  ;;  %vm9883_vm15 = vcmask 23552  }
 0x101   : > { %6610 = vmatprep.mubr.msk.bf16.mxu0 %vm9883_vm15, %v4328_v29  ;;  %v1730_v42 = vrot.slane %v1728_v12, 3  ;;  %v5915_v54 = vcombine.low %v1197_v49, %v1198_v21  ;;  %v1733_v3 = vrot.slane %v1731_v47, 4  ;;  %v4332_v0 = vrot.slane %v4330_v4, 3  ;;  %vm9887_vm9 = vmmov %vm9883_vm15 }
 0x102   : > { %v4333_v57 = vshll.u32 %v6062_v17, 16  ;;  %v1716_v32 = vor.u32 %v1715_v18, %v1712_v9  ;;  %v5935_v55 = vcombine.low %v2433_v52, %v2434_v26  ;;  %v9885_v15 = vshrl.u32 %v9884_v28, 16 }
 0x103   : > { %v8570_v16 = vand.u32 %v5967_v30, %v7263_v5  ;;  %v1719_v61 = vshrl.u32 %v5915_v54, 16  ;;  %v1722_v40 = vshll.u32 %v5915_v54, 16  ;;  %v1734_v23 = vor.u32 %v1733_v3, %v1730_v42 }
 0x104   : > { %v2556_v22 = vor.u32 %v9886_v45, %v9885_v15  ;;  %v4335_v35 = vrot.slane %v4333_v57, 4  ;;  %v1717_v12 = vsel %vm9881_vm3, %v1707_v39, %v1716_v32  ;;  %v2558_v49 = vshll.u32 %v5935_v55, 16  ;;  %v8582_v39 = vld [vmem:[%s7289_s25 + $0x14] sm:$0xf] }
 0x105   : > { %v2562_v29 = vshrl.u32 %v5935_v55, 16  ;;  %6494 = vmatprep.subr.bf16.mxu1 %v8570_v16  ;;  %v4158_v17 = vsel %vm8259_vm5, %v8359_v58, 0  ;;  %6453 = vmatmul.mubr.msk.bf16.gmra.mrb[24].mxu1 %vm9887_vm9, %v1717_v12  ;;  %v1721_v45 = vrot.slane %v1719_v61, 3  ;;  %v1724_v15 = vrot.slane %v1722_v40, 4 }
 0x106   : > { %v4336_v28 = vor.u32 %v4335_v35, %v4332_v0  ;;  %v4159_v18 = vsel %vm8279_vm2, %v8398_v33, 0  ;;  %v2560_v52 = vrot.slane %v2558_v49, 1  ;;  %vm9888_vm15 = vcmp.ne.s16.totalorder %v7586_v46, 0 }
 0x107   : > { %v6063_v30 = vcombine.low %v4158_v17, %v4159_v18  ;;  %v2435_v55 = vsel %vm9888_vm15, %v8582_v39, 0  ;;  %vm9889_vm3 = vnez %v9659_v27  ;;  %v1725_v47 = vor.u32 %v1724_v15, %v1721_v45 }
 0x108   : > { %v2436_v26 = vsel %vm9889_vm3, %v8171_v34, 0  ;;  %vm9890_vm9 = vsmask.f32 4352  ;;  %v4160_v35 = vsel %vm8336_vm13, %v8404_v56, 0  ;;  %vm9891_vm0 = vcmask 23552  }
 0x109   : > { %v4337_v40 = vsel %vm9890_vm9, %v4327_v1, %v4336_v28  ;;  %v5936_v61 = vcombine.low %v2435_v55, %v2436_v26  ;;  %vm9892_vm2 = vsmask.f32 7424  ;;  %v2564_v9 = vor.u32 %v2562_v29, %v2560_v52  ;;  %vm9893_vm15 = vmmov %vm9890_vm9  ;;  %v9902_v55 = vld [vmem:[#allocation28_spill] sm:$0xff] }
 0x10a   : > { %6611 = vmatmul.mubr.msk.bf16.gmra.mrb[12].mxu0 %vm9891_vm0, %v4337_v40  ;;  %v2561_v4 = vsel %vm9892_vm2, %v2556_v22, %v2560_v52  ;;  %v4339_v21 = vshrl.u32 %v6063_v30, 16  ;;  %v4342_v42 = vshll.u32 %v6063_v30, 16  ;;  %v1726_v54 = vsel %vm9893_vm15, %v1716_v32, %v1725_v47  ;;  %vm9894_vm5 = vmmov %vm9890_vm9 }
 0x10b   : > { %v1735_v3 = vsel %vm9894_vm5, %v1725_v47, %v1734_v23  ;;  %v2566_v34 = vshll.u32 %v5936_v61, 16  ;;  %v4161_v1 = vsel %vm8367_vm1, %v8420_v41, 0  ;;  %vm9895_vm9 = vmmov %vm9891_vm0  ;;  %vm9896_vm2 = vcmp.ne.s16.totalorder %v7612_v25, 0 }
 0x10c   : > { %6456 = vmatprep.mubr.msk.bf16.mxu1 %vm9895_vm9, %v1726_v54  ;;  %v4341_v0 = vrot.slane %v4339_v21, 3  ;;  %v4344_v57 = vrot.slane %v4342_v42, 4  ;;  %v6064_v12 = vcombine.low %v4160_v35, %v4161_v1  ;;  %v2437_v22 = vsel %vm9896_vm2, %v8184_v11, 0  ;;  %vm9899_vm15 = vmmov %vm9895_vm9 }
 0x10d   : > { %v2568_v49 = vrot.slane %v2566_v34, 1  ;;  %vm9897_vm0 = vnez %v9662_v19  ;;  %v2570_v23 = vshrl.u32 %v5936_v61, 16  ;;  %vm9898_vm5 = vnez %v9830_v59  ;;  %6457 = vmatmul.mubr.msk.bf16.gmra.mrb[28].mxu1 %vm9899_vm15, %v1735_v3  ;;  %vm9904_vm3 = vmmov %vm9899_vm15  ;;  %v9909_v3 = vld [vmem:[#allocation78_spill] sm:$0xff] }
 0x10e   : > { %v2438_v32 = vsel %vm9897_vm0, %v8292_v14, 0  ;;  %v4162_v29 = vsel %vm9898_vm5, %v8450_v36, 0  ;;  %v4345_v17 = vor.u32 %v4344_v57, %v4341_v0  ;;  %v4348_v45 = vshrl.u32 %v6064_v12, 16  ;;  %6462 = vmatprep.mubr.msk.bf16.mxu1 %vm9904_vm3, %v2561_v4  ;;  %vm9906_vm1 = vmmov %vm9904_vm3 }
 0x10f   : > { %v4351_v15 = vshll.u32 %v6064_v12, 16  ;;  %v5937_v18 = vcombine.low %v2437_v22, %v2438_v32  ;;  %vm9900_vm9 = vsmask.f32 7424  ;;  %v2572_v30 = vor.u32 %v2570_v23, %v2568_v49  ;;  %v9913_v32 = vld [vmem:[#allocation30_spill] sm:$0xff] }
 0x110   : > { %v2569_v52 = vsel %vm9900_vm9, %v2564_v9, %v2568_v49  ;;  %vm9901_vm2 = vnez %v9839_v50  ;;  %vm9903_vm0 = vcmp.ne.s16.totalorder %v9902_v55, 0  ;;  %vm9905_vm5 = vsmask.f32 4352  ;;  %v9907_v9 = vld [vmem:[#allocation29_spill] sm:$0xff]  ;;  %v9912_v49 = vld [vmem:[#allocation75_spill] sm:$0xff] }
 0x111   : > { %v4163_v11 = vsel %vm9901_vm2, %v8473_v51, 0  ;;  %v2439_v26 = vsel %vm9903_vm0, %v8298_v62, 0  ;;  %v4346_v47 = vsel %vm9905_vm5, %v4336_v28, %v4345_v17  ;;  %v4350_v40 = vrot.slane %v4348_v45, 3  ;;  %vm9915_vm0 = vmmov %vm9905_vm5 }
 0x112   : > { %v4353_v61 = vrot.slane %v4351_v15, 4  ;;  %v2574_v35 = vshll.u32 %v5937_v18, 16  ;;  %6614 = vmatprep.mubr.msk.bf16.mxu0 %vm9906_vm1, %v4346_v47  ;;  %v6065_v21 = vcombine.low %v4162_v29, %v4163_v11  ;;  %vm9908_vm15 = vnez %v9907_v9 }
 0x113   : > { %v2440_v42 = vsel %vm9908_vm15, %v8305_v13, 0  ;;  %v2578_v54 = vshrl.u32 %v5937_v18, 16  ;;  %vm9910_vm9 = vnez %v9909_v3  ;;  %vm9911_vm3 = vnez %v9845_v10  ;;  %v8963_v3 = vld [vmem:[%s7289_s25 + $0x8c] sm:$0xf] }
 0x114   : > { %v4164_v34 = vsel %vm9910_vm9, %v8495_v8, 0  ;;  %v4354_v1 = vor.u32 %v4353_v61, %v4350_v40  ;;  %v2576_v0 = vrot.slane %v2574_v35, 1  ;;  %v5938_v4 = vcombine.low %v2439_v26, %v2440_v42  ;;  %v9918_v35 = vld [vmem:[#allocation56_spill] sm:$0xff] }
 0x115   : > { %v4165_v28 = vsel %vm9911_vm3, %v8523_v24, 0  ;;  %v4357_v57 = vshrl.u32 %v6065_v21, 16  ;;  %v4360_v12 = vshll.u32 %v6065_v21, 16  ;;  %vm9914_vm1 = vcmp.ne.s16.totalorder %v9913_v32, 0  ;;  %v9919_v21 = vld [vmem:[#allocation34_spill] sm:$0xff] }
 0x116   : > { %v6066_v22 = vcombine.low %v4164_v34, %v4165_v28  ;;  %v2441_v23 = vsel %vm9914_vm1, %v9912_v49, 0  ;;  %v4355_v29 = vsel %vm9915_vm0, %v4345_v17, %v4354_v1  ;;  %vm9916_vm5 = vsmask.f32 7424 }
 0x117   : > { %v2577_v45 = vsel %vm9916_vm5, %v2572_v30, %v2576_v0  ;;  %v2580_v15 = vor.u32 %v2578_v54, %v2576_v0  ;;  %v2582_v18 = vshll.u32 %v5938_v4, 16  ;;  %vm9917_vm15 = vcmask 23552   ;;  %vm9923_vm0 = vmmov %vm9916_vm5 }
 0x118   : > { %6615 = vmatmul.mubr.msk.bf16.gmra.mrb[16].mxu0 %vm9917_vm15, %v4355_v29  ;;  %v4359_v11 = vrot.slane %v4357_v57, 3  ;;  %v4362_v26 = vrot.slane %v4360_v12, 4  ;;  %v4366_v47 = vshrl.u32 %v6066_v22, 16  ;;  %v4369_v40 = vshll.u32 %v6066_v22, 16  ;;  %vm9921_vm1 = vmmov %vm9917_vm15  ;;  %v9924_v22 = vld [vmem:[#allocation59_spill] sm:$0xff]  ;;  %v9925_v29 = vld [vmem:[#allocation33_spill] sm:$0xff] }
 0x119   : > { %v2584_v61 = vrot.slane %v2582_v18, 1  ;;  %vm9920_vm3 = vnez %v9919_v21  ;;  %v2586_v34 = vshrl.u32 %v5938_v4, 16  ;;  %v4166_v17 = vsel %vm8445_vm7, %v8534_v63, 0  ;;  %6463 = vmatmul.mubr.msk.bf16.vlgmr.msra.gmra.mrb[0].mxu1 %vm9921_vm1, %v2569_v52  ;;  %vm9922_vm15 = vmmov %vm9921_vm1 }
 0x11a   : > { %v2442_v42 = vsel %vm9920_vm3, %v9918_v35, 0  ;;  %v4363_v30 = vor.u32 %v4362_v26, %v4359_v11  ;;  %v4368_v54 = vrot.slane %v4366_v47, 3  ;;  %v4371_v0 = vrot.slane %v4369_v40, 4  ;;  %6495 = vmatpush3.bf16.msra.mxu1 %v8570_v16  ;;  %6466 = vmatprep.mubr.msk.bf16.mxu1 %vm9922_vm15, %v2577_v45  ;;  %v9928_v47 = vld [vmem:[#allocation2_spill] sm:$0xff]  ;;  %vm9929_vm3 = vmmov %vm9922_vm15  ;;  %v9930_v16 = vld [vmem:[#allocation64_spill] sm:$0xff] }
 0x11b   : > { %v5939_v28 = vcombine.low %v2441_v23, %v2442_v42  ;;  %v2585_v57 = vsel %vm9923_vm0, %v2580_v15, %v2584_v61  ;;  %v2588_v12 = vor.u32 %v2586_v34, %v2584_v61  ;;  %v4167_v4 = vsel %vm8468_vm6, %v8560_v38, 0  ;;  %6698 = vmatprep.subr.bf16.mxu1 %v9928_v47  ;;  %v9931_v45 = vld [vmem:[#allocation38_spill] sm:$0xff] }
 0x11c   : > { %vm9926_vm5 = vcmp.ne.s16.totalorder %v9925_v29, 0  ;;  %vm9927_vm1 = vsmask.f32 4352  ;;  %v4372_v11 = vor.u32 %v4371_v0, %v4368_v54  ;;  %v6067_v23 = vcombine.low %v4166_v17, %v4167_v4  ;;  %v9933_v35 = vld [vmem:[#allocation62_spill] sm:$0xff] }
 0x11d   : > { %v2443_v18 = vsel %vm9926_vm5, %v9924_v22, 0  ;;  %v4364_v52 = vsel %vm9927_vm1, %v4354_v1, %v4363_v30  ;;  %v2590_v26 = vshll.u32 %v5939_v28, 16  ;;  %vm9932_vm15 = vnez %v9931_v45  ;;  %vm9934_vm0 = vmmov %vm9927_vm1  ;;  %v9935_v22 = vld [vmem:[#allocation37_spill] sm:$0xff] }
 0x11e   : > { %6618 = vmatprep.mubr.msk.bf16.mxu0 %vm9929_vm3, %v4364_v52  ;;  %v2444_v15 = vsel %vm9932_vm15, %v9930_v16, 0  ;;  %v2594_v40 = vshrl.u32 %v5939_v28, 16  ;;  %v4168_v61 = vsel %vm8489_vm12, %v8505_v37, 0  ;;  %v4169_v1 = vsel %vm8513_vm8, %v9933_v35, 0  ;;  %v9937_v28 = vld [vmem:[#allocation40_spill] sm:$0xff] }
 0x11f   : > { %v4373_v42 = vsel %vm9934_vm0, %v4363_v30, %v4372_v11  ;;  %v2592_v34 = vrot.slane %v2590_v26, 1  ;;  %v4375_v17 = vshrl.u32 %v6067_v23, 16  ;;  %v4378_v54 = vshll.u32 %v6067_v23, 16 }
 0x120   : > { %v5940_v0 = vcombine.low %v2443_v18, %v2444_v15  ;;  %v6068_v4 = vcombine.low %v4168_v61, %v4169_v1  ;;  %vm9936_vm3 = vcmp.ne.s16.totalorder %v9935_v22, 0  ;;  %vm9938_vm5 = vnez %v9937_v28  ;;  %v9942_v61 = vld [vmem:[#allocation65_spill] sm:$0xff]  ;;  %v9944_v28 = vld [vmem:[#allocation67_spill] sm:$0xff]  ;;  %v8690_v22 = vld [vmem:[%s7289_s25 + $0x90] sm:$0xf] }
 0x121   : > { %v2445_v52 = vsel %vm9936_vm3, %v8200_v43, 0  ;;  %v2446_v16 = vsel %vm9938_vm5, %v8228_v44, 0  ;;  %vm9939_vm1 = vcmask 23552   ;;  %vm9940_vm15 = vsmask.f32 7424 }
 0x122   : > { %6619 = vmatmul.mubr.msk.bf16.gmra.mrb[20].mxu0 %vm9939_vm1, %v4373_v42  ;;  %v2593_v45 = vsel %vm9940_vm15, %v2588_v12, %v2592_v34  ;;  %v4377_v35 = vrot.slane %v4375_v17, 3  ;;  %v4380_v29 = vrot.slane %v4378_v54, 4  ;;  %v2596_v30 = vor.u32 %v2594_v40, %v2592_v34  ;;  %vm9941_vm0 = vmmov %vm9939_vm1 }
 0x123   : > { %v2598_v26 = vshll.u32 %v5940_v0, 16  ;;  %v4384_v6 = vshrl.u32 %v6068_v4, 16  ;;  %v4387_v23 = vshll.u32 %v6068_v4, 16  ;;  %v5941_v18 = vcombine.low %v2445_v52, %v2446_v16  ;;  %6467 = vmatmul.mubr.msk.bf16.gmra.mrb[4].mxu1 %vm9941_vm0, %v2585_v57  ;;  %vm9946_vm15 = vmmov %vm9941_vm0  ;;  %v9948_v57 = vld [vmem:[#allocation72_spill] sm:$0xff]  ;;  %v9951_v16 = vld [vmem:[#allocation73_spill] sm:$0xff] }
 0x124   : > { %v4381_v15 = vor.u32 %v4380_v29, %v4377_v35  ;;  %v2602_v43 = vshrl.u32 %v5940_v0, 16  ;;  %v4170_v44 = vsel %vm8528_vm14, %v9942_v61, 0  ;;  %v4171_v12 = vsel %vm8551_vm4, %v9944_v28, 0  ;;  %6470 = vmatprep.mubr.msk.bf16.mxu1 %vm9946_vm15, %v2593_v45  ;;  %v9949_v29 = vld [vmem:[#allocation39_spill] sm:$0xff]  ;;  %v9952_v35 = vld [vmem:[#allocation41_spill] sm:$0xff]  ;;  %vm9954_vm5 = vmmov %vm9946_vm15 }
 0x125   : > { %v2600_v40 = vrot.slane %v2598_v26, 1  ;;  %v4386_v34 = vrot.slane %v4384_v6, 3  ;;  %v4389_v17 = vrot.slane %v4387_v23, 4  ;;  %v2606_v54 = vshll.u32 %v5941_v18, 16 }
 0x126   : > { %vm9947_vm3 = vsmask.f32 4352  ;;  %v6069_v52 = vcombine.low %v4170_v44, %v4171_v12  ;;  %vm9950_vm1 = vcmp.ne.s16.totalorder %v9949_v29, 0  ;;  %vm9953_vm0 = vnez %v9952_v35  ;;  %v9957_v29 = vld [vmem:[#allocation6_spill] sm:$0xff] }
 0x127   : > { %v4382_v4 = vsel %vm9947_vm3, %v4372_v11, %v4381_v15  ;;  %v2447_v0 = vsel %vm9950_vm1, %v9948_v57, 0  ;;  %v2448_v61 = vsel %vm9953_vm0, %v9951_v16, 0  ;;  %vm9955_vm15 = vsmask.f32 7424  ;;  %v6105_v57 = vld [vmem:[%s9393_s1 + $0x10] sm:$0x3] }
 0x128   : > { %6622 = vmatprep.mubr.msk.bf16.mxu0 %vm9954_vm5, %v4382_v4  ;;  %v2601_v45 = vsel %vm9955_vm15, %v2596_v30, %v2600_v40  ;;  %v4390_v6 = vor.u32 %v4389_v17, %v4386_v34  ;;  %v2604_v28 = vor.u32 %v2602_v43, %v2600_v40  ;;  %v2608_v26 = vrot.slane %v2606_v54, 1  ;;  %vm9956_vm1 = vmmov %vm9955_vm15  ;;  %v9959_v30 = vld [vmem:[#allocation74_spill] sm:$0xff] }
 0x129   : > { %v4393_v23 = vshrl.u32 %v6069_v52, 16  ;;  %v4396_v11 = vshll.u32 %v6069_v52, 16  ;;  %v5942_v44 = vcombine.low %v2447_v0, %v2448_v61  ;;  %v2610_v12 = vshrl.u32 %v5941_v18, 16  ;;  %v9960_v34 = vld [vmem:[#allocation42_spill] sm:$0xff]  ;;  %v9963_v0 = vld [vmem:[#allocation76_spill] sm:$0xff] }
 0x12a   : > { %v4391_v35 = vsel %vm9947_vm3, %v4381_v15, %v4390_v6  ;;  %v2609_v16 = vsel %vm9956_vm1, %v2604_v28, %v2608_v26  ;;  %vm9958_vm5 = vcmp.ne.s16.totalorder %v9957_v29, 0  ;;  %vm9961_vm15 = vcmp.ne.s16.totalorder %v9960_v34, 0  ;;  %v9964_v61 = vld [vmem:[#allocation44_spill] sm:$0xff] }
 0x12b   : > { %v4172_v4 = vsel %vm9958_vm5, %v8690_v22, 0  ;;  %v2449_v43 = vsel %vm9961_vm15, %v9959_v30, 0  ;;  %vm9962_vm0 = vcmask 23552   ;;  %v4395_v40 = vrot.slane %v4393_v23, 3  ;;  %v9967_v30 = vld [vmem:[#allocation77_spill] sm:$0xff] }
 0x12c   : > { %6623 = vmatmul.mubr.msk.bf16.gmra.mrb[24].mxu0 %vm9962_vm0, %v4391_v35  ;;  %v4398_v18 = vrot.slane %v4396_v11, 4  ;;  %v2612_v17 = vor.u32 %v2610_v12, %v2608_v26  ;;  %v2614_v54 = vshll.u32 %v5942_v44, 16  ;;  %v6070_v52 = vcombine.low %v4172_v4, %v4172_v4  ;;  %vm9966_vm1 = vmmov %vm9962_vm0  ;;  %v9971_v11 = vld [vmem:[#allocation3_spill] sm:$0xff] }
 0x12d   : > { %vm9965_vm3 = vnez %v9964_v61  ;;  %v2618_v28 = vshrl.u32 %v5942_v44, 16  ;;  %v5159_v42 = vand.u32 %v6105_v57, %v7263_v5  ;;  %6471 = vmatmul.mubr.msk.bf16.gmra.mrb[8].mxu1 %vm9966_vm1, %v2601_v45  ;;  %vm9969_vm0 = vcmp.ne.s16.totalorder %v9968_v7, 0  ;;  %vm9970_vm5 = vmmov %vm9966_vm1  ;;  %v9974_v57 = vld [vmem:[#allocation21_spill] sm:$0xff] }
 0x12e   : > { %v2450_v15 = vsel %vm9965_vm3, %v9963_v0, 0  ;;  %v4399_v29 = vor.u32 %v4398_v18, %v4395_v40  ;;  %v2616_v1 = vrot.slane %v2614_v54, 1  ;;  %v2451_v35 = vsel %vm9969_vm0, %v9967_v30, 0  ;;  %6474 = vmatprep.mubr.msk.bf16.mxu1 %vm9970_vm5, %v2609_v16  ;;  %vm9976_vm4 = vmmov %vm9970_vm5 }
 0x12f   : > { %v5943_v34 = vcombine.low %v2449_v43, %v2450_v15  ;;  %v4402_v26 = vshrl.u32 %v6070_v52, 16  ;;  %v4405_v23 = vshll.u32 %v6070_v52, 16  ;;  %6664 = vmatprep.subr.bf16.mxu0 %v5159_v42  ;;  %vm9972_vm15 = vnez %v9971_v11  ;;  %v9978_v15 = vld [vmem:[#allocation22_spill] sm:$0xff] }
 0x130   : > { %v2452_v44 = vsel %vm9972_vm15, %v8359_v58, 0  ;;  %vm9973_vm3 = vsmask.f32 4352  ;;  %v2620_v12 = vor.u32 %v2618_v28, %v2616_v1  ;;  %vm9975_vm1 = vcmp.ne.s16.totalorder %v9974_v57, 0 }
 0x131   : > { %v4400_v5 = vsel %vm9973_vm3, %v4390_v6, %v4399_v29  ;;  %v2622_v45 = vshll.u32 %v5943_v34, 16  ;;  %v2453_v4 = vsel %vm9975_vm1, %v8398_v33, 0  ;;  %vm9977_vm0 = vsmask.f32 7424  ;;  %v9980_v6 = vld [vmem:[#allocation48_spill] sm:$0xff] }
 0x132   : > { %6626 = vmatprep.mubr.msk.bf16.mxu0 %vm9976_vm4, %v4400_v5  ;;  %v2617_v43 = vsel %vm9977_vm0, %v2612_v17, %v2616_v1  ;;  %v4404_v16 = vrot.slane %v4402_v26, 3  ;;  %v4407_v40 = vrot.slane %v4405_v23, 4  ;;  %v5944_v18 = vcombine.low %v2451_v35, %v2452_v44  ;;  %v9982_v5 = vld [vmem:[#allocation51_spill] sm:$0xff]  ;;  %vm9984_vm1 = vmmov %vm9977_vm0  ;;  %v9986_v23 = vld [vmem:[#allocation50_spill] sm:$0xff] }
 0x133   : > { %v2624_v54 = vrot.slane %v2622_v45, 1  ;;  %v2626_v52 = vshrl.u32 %v5943_v34, 16  ;;  %vm9979_vm5 = vnez %v9978_v15  ;;  %vm9981_vm3 = vcmp.ne.s16.totalorder %v9980_v6, 0  ;;  %v8793_v6 = vld [vmem:[%s7289_s25 + $0x1c] sm:$0xf] }
 0x134   : > { %v2454_v11 = vsel %vm9979_vm5, %v8404_v56, 0  ;;  %v2455_v28 = vsel %vm9981_vm3, %v8420_v41, 0  ;;  %v4408_v7 = vor.u32 %v4407_v40, %v4404_v16  ;;  %v2630_v57 = vshll.u32 %v5944_v18, 16 }
 0x135   : > { %v5945_v61 = vcombine.low %v2453_v4, %v2454_v11  ;;  %vm9983_vm4 = vnez %v9982_v5  ;;  %v2625_v17 = vsel %vm9984_vm1, %v2620_v12, %v2624_v54  ;;  %v2634_v35 = vshrl.u32 %v5944_v18, 16  ;;  %v9990_v4 = vld [vmem:[#allocation54_spill] sm:$0xff]  ;;  %v9993_v12 = vld [vmem:[#allocation7_spill] sm:$0xff] }
 0x136   : > { %v2456_v1 = vsel %vm9983_vm4, %v8450_v36, 0  ;;  %vm9985_vm0 = vsmask.f32 4352  ;;  %vm9987_vm5 = vcmp.ne.s16.totalorder %v9986_v23, 0  ;;  %vm9988_vm15 = vcmask 23552   ;;  %v10014_v5 = vld [vmem:[#allocation10_spill] sm:$0xff] }
 0x137   : > { %v4409_v34 = vsel %vm9985_vm0, %v4399_v29, %v4408_v7  ;;  %v2638_v26 = vshll.u32 %v5945_v61, 16  ;;  %v2457_v44 = vsel %vm9987_vm5, %v8473_v51, 0  ;;  %6475 = vmatmul.mubr.msk.bf16.gmra.mrb[12].mxu1 %vm9988_vm15, %v2617_v43  ;;  %vm9989_vm3 = vmmov %vm9988_vm15  ;;  %v2632_v45 = vrot.slane %v2630_v57, 1  ;;  %v9995_v43 = vld [vmem:[#allocation57_spill] sm:$0xff]  ;;  %v9997_v57 = vld [vmem:[#allocation60_spill] sm:$0xff] }
 0x138   : > { %6627 = vmatmul.mubr.msk.bf16.gmra.mrb[28].mxu0 %vm9989_vm3, %v4409_v34  ;;  %v5946_v11 = vcombine.low %v2455_v28, %v2456_v1  ;;  %vm9991_vm14 = vnez %v9990_v4  ;;  %vm9992_vm4 = vmmov %vm9989_vm3  ;;  %v2628_v7 = vor.u32 %v2626_v52, %v2624_v54  ;;  %vm9996_vm15 = vcmp.ne.s16.totalorder %v9995_v43, 0  ;;  %v10001_v52 = vld [vmem:[#allocation61_spill] sm:$0xff]  ;;  %v10013_v43 = vld [vmem:[#allocation83_spill] sm:$0xff] }
 0x139   : > { %v2458_v16 = vsel %vm9991_vm14, %v8495_v8, 0  ;;  %6478 = vmatprep.mubr.msk.bf16.mxu1 %vm9992_vm4, %v2625_v17  ;;  %vm9994_vm1 = vmmov %vm9989_vm3  ;;  %v2636_v29 = vor.u32 %v2634_v35, %v2632_v45  ;;  %v2640_v40 = vrot.slane %v2638_v26, 1  ;;  %v2459_v34 = vsel %vm9996_vm15, %v8523_v24, 0  ;;  %v10003_v26 = vld [vmem:[#allocation68_spill] sm:$0xff] }
 0x13a   : > { %6632 = vmatprep.mubr.msk.bf16.mxu0 %vm9994_vm1, %v9993_v12  ;;  %v5947_v18 = vcombine.low %v2457_v44, %v2458_v16  ;;  %v2646_v23 = vshll.u32 %v5946_v11, 16  ;;  %vm9998_vm5 = vnez %v9997_v57  ;;  %vm9999_vm0 = vsmask.f32 7424  ;;  %v10006_v57 = vld [vmem:[#allocation9_spill] sm:$0xff] }
 0x13b   : > { %v2460_v28 = vsel %vm9998_vm5, %v8534_v63, 0  ;;  %v2633_v1 = vsel %vm9999_vm0, %v2628_v7, %v2632_v45  ;;  %v2642_v17 = vshrl.u32 %v5945_v61, 16  ;;  %v2650_v4 = vshrl.u32 %v5946_v11, 16  ;;  %vm10000_vm4 = vmmov %vm9999_vm0  ;;  %v7160_v7 = vld [vmem:[%s7289_s25 + $0x8] sm:$0xf] }
 0x13c   : > { %v2641_v12 = vsel %vm10000_vm4, %v2636_v29, %v2640_v40  ;;  %v2654_v54 = vshll.u32 %v5947_v18, 16  ;;  %vm10002_vm3 = vcmp.ne.s16.totalorder %v10001_v52, 0  ;;  %vm10004_vm1 = vnez %v10003_v26  ;;  %v10009_v29 = vld [vmem:[#allocation5_spill] sm:$0xff]  ;;  %v10011_v26 = vld [vmem:[#allocation11_spill] sm:$0xff] }
 0x13d   : > { %v2461_v35 = vsel %vm10002_vm3, %v8560_v38, 0  ;;  %v2462_v44 = vsel %vm10004_vm1, %v8505_v37, 0  ;;  %v5948_v16 = vcombine.low %v2459_v34, %v2460_v28  ;;  %vm10005_vm15 = vcmask 23552  }
 0x13e   : > { %vm10007_vm5 = vmmov %vm10005_vm15  ;;  %v2648_v61 = vrot.slane %v2646_v23, 1  ;;  %v2644_v45 = vor.u32 %v2642_v17, %v2640_v40  ;;  %v5949_v11 = vcombine.low %v2461_v35, %v2462_v44  ;;  %vm10010_vm4 = vcmp.ne.s16.totalorder %v10009_v29, 0  ;;  %v10018_v17 = vld [vmem:[#allocation36_spill] sm:$0xff]  ;;  %v8780_v44 = vld [vmem:[%s7289_s25 + $0x84] sm:$0xf] }
 0x13f   : > { %6479 = vmatmul.mubr.msk.bf16.gmra.mrb[16].mxu1 %vm10005_vm15, %v2633_v1  ;;  %vm10008_vm0 = vmmov %vm10007_vm5  ;;  %v2926_v52 = vsel %vm10010_vm4, %v7160_v7, 0  ;;  %v2656_v28 = vrot.slane %v2654_v54, 1  ;;  %v2662_v1 = vshll.u32 %v5948_v16, 16  ;;  %v2658_v35 = vshrl.u32 %v5947_v18, 16 }
 0x140   : > { %6633 = vmatmul.mubr.msk.bf16.vlgmr.msra.gmra.mrb[0].mxu0 %vm10007_vm5, %v10006_v57  ;;  %6482 = vmatprep.mubr.msk.bf16.mxu1 %vm10008_vm0, %v2641_v12  ;;  %vm10012_vm3 = vmmov %vm10008_vm0  ;;  %v2652_v34 = vor.u32 %v2650_v4, %v2648_v61  ;;  %vm10015_vm5 = vnez %v10014_v5  ;;  %v10016_v57 = vld [vmem:[#allocation8_spill] sm:$0xff]  ;;  %vm10019_vm0 = vnez %v10018_v17  ;;  %vm10020_vm4 = vsmask.f32 7424  ;;  %v10021_v5 = vld [vmem:[#allocation69_spill] sm:$0xff] }
 0x141   : > { %6665 = vmatpush3.bf16.msra.mxu0 %v5159_v42  ;;  %6636 = vmatprep.mubr.msk.bf16.mxu0 %vm10012_vm3, %v10011_v26  ;;  %v2927_v23 = vsel %vm10015_vm5, %v10013_v43, 0  ;;  %v7161_v42 = vld [vmem:[%s7289_s25 + $0x10] sm:$0xf]  ;;  %vm10017_vm15 = vnez %v10016_v57  ;;  %v2929_v12 = vsel %vm10019_vm0, %v8582_v39, 0  ;;  %v2649_v26 = vsel %vm10020_vm4, %v2644_v45, %v2648_v61  ;;  %vm10023_vm5 = vmmov %vm10020_vm4  ;;  %v10027_v45 = vld [vmem:[#allocation45_spill] sm:$0xff] }
 0x142   : > { %v2928_v40 = vsel %vm10017_vm15, %v7161_v42, 0  ;;  %v2666_v4 = vshrl.u32 %v5948_v16, 16  ;;  %v2670_v54 = vshll.u32 %v5949_v11, 16  ;;  %vm10022_vm3 = vnez %v10021_v5  ;;  %v10025_v39 = vld [vmem:[#allocation12_spill] sm:$0xff]  ;;  %v7163_v16 = vld [vmem:[%s7289_s25 + $0x18] sm:$0xf] }
 0x143   : > { %v2463_v43 = vsel %vm10022_vm3, %v8780_v44, 0  ;;  %v2657_v7 = vsel %vm10023_vm5, %v2652_v34, %v2656_v28  ;;  %v5968_v29 = vcombine.low %v2926_v52, %v2927_v23  ;;  %v5969_v42 = vcombine.low %v2928_v40, %v2929_v12  ;;  %v10029_v5 = vld [vmem:[#allocation46_spill] sm:$0xff]  ;;  %v10032_v52 = vld [vmem:[#allocation13_spill] sm:$0xff]  ;;  %v10036_v12 = vld [vmem:[#allocation4_spill] sm:$0xff] }
 0x144   : > { %v2664_v57 = vrot.slane %v2662_v1, 1  ;;  %vm10024_vm15 = vcmask 23552   ;;  %v2660_v18 = vor.u32 %v2658_v35, %v2656_v28  ;;  %v5950_v61 = vcombine.low %v2463_v43, %v2463_v43  ;;  %v10034_v28 = vld [vmem:[#allocation47_spill] sm:$0xff] }
 0x145   : > { %vm10026_vm0 = vmmov %vm10024_vm15  ;;  %vm10028_vm4 = vnez %v10027_v45  ;;  %vm10030_vm3 = vnez %v10029_v5  ;;  %v2672_v23 = vrot.slane %v2670_v54, 1  ;;  %v3048_v43 = vshll.u32 %v5968_v29, 16 }
 0x146   : > { %v2930_v17 = vsel %vm10028_vm4, %v7163_v16, 0  ;;  %v2931_v34 = vsel %vm10030_vm3, %v8793_v6, 0  ;;  %vm10031_vm5 = vmmov %vm10026_vm0  ;;  %v2668_v1 = vor.u32 %v2666_v4, %v2664_v57  ;;  %v3056_v5 = vshll.u32 %v5969_v42, 16 }
 0x147   : > { %6483 = vmatmul.mubr.msk.bf16.gmra.mrb[20].mxu1 %vm10024_vm15, %v2649_v26  ;;  %vm10033_vm1 = vmmov %vm10026_vm0  ;;  %vm10035_vm15 = vnez %v10034_v28  ;;  %v3045_v26 = vshrl.u32 %v5968_v29, 16  ;;  %v5970_v16 = vcombine.low %v2930_v17, %v2931_v34  ;;  %vm10038_vm3 = vsmask.f32 7424  ;;  %v10040_v29 = vld [vmem:[#allocation16_spill] sm:$0xff]  ;;  %v10047_v34 = vld [vmem:[#allocation17_spill] sm:$0xff] }
 0x148   : > { %6637 = vmatmul.mubr.msk.bf16.gmra.mrb[4].mxu0 %vm10026_vm0, %v10025_v39  ;;  %6486 = vmatprep.mubr.msk.bf16.mxu1 %vm10031_vm5, %v2657_v7  ;;  %v2932_v40 = vsel %vm10035_vm15, %v8292_v14, 0  ;;  %vm10037_vm0 = vnez %v10036_v12  ;;  %v3053_v39 = vshrl.u32 %v5969_v42, 16  ;;  %v2665_v7 = vsel %vm10038_vm3, %v2660_v18, %v2664_v57  ;;  %vm10039_vm4 = vmmov %vm10038_vm3  ;;  %v10042_v57 = vld [vmem:[#allocation23_spill] sm:$0xff]  ;;  %v10044_v18 = vld [vmem:[#allocation49_spill] sm:$0xff] }
 0x149   : > { %6640 = vmatprep.mubr.msk.bf16.mxu0 %vm10033_vm1, %v10032_v52  ;;  %v2933_v35 = vsel %vm10037_vm0, %v8298_v62, 0  ;;  %v2673_v52 = vsel %vm10039_vm4, %v2668_v1, %v2672_v23  ;;  %v2674_v4 = vshrl.u32 %v5949_v11, 16  ;;  %v2678_v54 = vshll.u32 %v5950_v61, 16  ;;  %vm10041_vm5 = vmmov %vm10033_vm1 }
 0x14a   : > { %v5971_v45 = vcombine.low %v2932_v40, %v2933_v35  ;;  %v3047_v15 = vrot.slane %v3045_v26, 3  ;;  %v3050_v37 = vrot.slane %v3048_v43, 4  ;;  %v3055_v28 = vrot.slane %v3053_v39, 3  ;;  %vm10046_vm3 = vmmov %vm10033_vm1  ;;  %v8822_v26 = vld [vmem:[%s7289_s25 + $0x30] sm:$0xf] }
 0x14b   : > { %v3058_v14 = vrot.slane %v3056_v5, 4  ;;  %v3062_v38 = vshrl.u32 %v5970_v16, 16  ;;  %v3065_v62 = vshll.u32 %v5970_v16, 16  ;;  %vm10043_vm15 = vnez %v10042_v57  ;;  %vm10048_vm4 = vmmov %vm10033_vm1  ;;  %v10049_v43 = vld [vmem:[#allocation52_spill] sm:$0xff] }
 0x14c   : > { %v3071_v42 = vshrl.u32 %v5971_v45, 16  ;;  %v3074_v17 = vshll.u32 %v5971_v45, 16  ;;  %v2934_v11 = vsel %vm10043_vm15, %v8305_v13, 0  ;;  %vm10045_vm0 = vnez %v10044_v18  ;;  %v8828_v39 = vld [vmem:[%s7289_s25 + $0x34] sm:$0xf] }
 0x14d   : > { %v2935_v61 = vsel %vm10045_vm0, %v9912_v49, 0  ;;  %v2676_v1 = vor.u32 %v2674_v4, %v2672_v23  ;;  %v2680_v40 = vrot.slane %v2678_v54, 1  ;;  %v3051_v12 = vor.u32 %v3050_v37, %v3047_v15  ;;  %v10051_v49 = vld [vmem:[#allocation53_spill] sm:$0xff] }
 0x14e   : > { %v3059_v35 = vor.u32 %v3058_v14, %v3055_v28  ;;  %v3064_v16 = vrot.slane %v3062_v38, 3  ;;  %v3067_v45 = vrot.slane %v3065_v62, 4  ;;  %v5972_v23 = vcombine.low %v2934_v11, %v2935_v61  ;;  %v8836_v14 = vld [vmem:[%s7289_s25 + $0x38] sm:$0xf]  ;;  %v8842_v38 = vld [vmem:[%s7289_s25 + $0x3c] sm:$0xf] }
 0x14f   : > { %6487 = vmatmul.mubr.msk.bf16.gmra.mrb[24].mxu1 %vm10033_vm1, %v2665_v7  ;;  %vm10050_vm1 = vnez %v10049_v43  ;;  %v3073_v37 = vrot.slane %v3071_v42, 3  ;;  %v3076_v15 = vrot.slane %v3074_v17, 4  ;;  %vm10053_vm15 = vsmask.f32 7424  ;;  %v10057_v62 = vld [vmem:[#allocation58_spill] sm:$0xff]  ;;  %v10060_v17 = vld [vmem:[#allocation20_spill] sm:$0xff] }
 0x150   : > { %6641 = vmatmul.mubr.msk.bf16.gmra.mrb[8].mxu0 %vm10041_vm5, %v10040_v29  ;;  %6490 = vmatprep.mubr.msk.bf16.mxu1 %vm10046_vm3, %v2673_v52  ;;  %v2936_v13 = vsel %vm10050_vm1, %v8822_v26, 0  ;;  %vm10052_vm5 = vnez %v10051_v49  ;;  %v2681_v7 = vsel %vm10053_vm15, %v2676_v1, %v2680_v40  ;;  %vm10054_vm0 = vsmask.f32 4352  ;;  %v10055_v29 = vld [vmem:[#allocation55_spill] sm:$0xff]  ;;  %v8851_v61 = vld [vmem:[%s7289_s25 + $0x40] sm:$0xf] }
 0x151   : > { %6644 = vmatprep.mubr.msk.bf16.mxu0 %vm10048_vm4, %v10047_v34  ;;  %v2937_v5 = vsel %vm10052_vm5, %v8828_v39, 0  ;;  %v3060_v4 = vsel %vm10054_vm0, %v3051_v12, %v3059_v35  ;;  %v3068_v54 = vor.u32 %v3067_v45, %v3064_v16  ;;  %v3080_v28 = vshrl.u32 %v5972_v23, 16  ;;  %v8857_v40 = vld [vmem:[%s7289_s25 + $0x44] sm:$0xf]  ;;  %v8868_v34 = vld [vmem:[%s7289_s25 + $0x48] sm:$0xf] }
 0x152   : > { %v5973_v52 = vcombine.low %v2936_v13, %v2937_v5  ;;  %vm10056_vm3 = vnez %v10055_v29  ;;  %vm10058_vm4 = vnez %v10057_v62  ;;  %vm10059_vm1 = vcmask 23552   ;;  %v10065_v13 = vld [vmem:[#allocation24_spill] sm:$0xff]  ;;  %v10069_v12 = vld [vmem:[#allocation70_spill] sm:$0xff] }
 0x153   : > { %v2938_v57 = vsel %vm10056_vm3, %v8836_v14, 0  ;;  %v2939_v42 = vsel %vm10058_vm4, %v8842_v38, 0  ;;  %vm10061_vm5 = vmmov %vm10059_vm1  ;;  %v3077_v11 = vor.u32 %v3076_v15, %v3073_v37  ;;  %v3083_v18 = vshll.u32 %v5972_v23, 16 }
 0x154   : > { %v2940_v1 = vsel %vm8146_vm11, %v8851_v61, 0  ;;  %v2941_v43 = vsel %vm8189_vm10, %v8857_v40, 0  ;;  %vm10064_vm15 = vmmov %vm10059_vm1  ;;  %v3089_v49 = vshrl.u32 %v5973_v52, 16  ;;  %v3092_v5 = vshll.u32 %v5973_v52, 16  ;;  %v10071_v52 = vld [vmem:[#allocation71_spill] sm:$0xff] }
 0x155   : > { %vm10066_vm0 = vmmov %vm10059_vm1  ;;  %v5974_v16 = vcombine.low %v2938_v57, %v2939_v42  ;;  %v5975_v45 = vcombine.low %v2940_v1, %v2941_v43  ;;  %vm10067_vm3 = vsmask.f32 4352  ;;  %v3082_v15 = vrot.slane %v3080_v28, 3  ;;  %v10076_v43 = vld [vmem:[#allocation25_spill] sm:$0xff] }
 0x156   : > { %v3069_v23 = vsel %vm10067_vm3, %v3059_v35, %v3068_v54  ;;  %vm10068_vm4 = vmmov %vm10067_vm3  ;;  %v3091_v29 = vrot.slane %v3089_v49, 3  ;;  %v3094_v62 = vrot.slane %v3092_v5, 4  ;;  %vm10070_vm11 = vnez %v10069_v12 }
 0x157   : > { %6491 = vmatmul.mubr.msk.bf16.gmra.mrb[28].mxu1 %vm10059_vm1, %v2681_v7  ;;  %v3078_v37 = vsel %vm10068_vm4, %v3068_v54, %v3077_v11  ;;  %v3085_v7 = vrot.slane %v3083_v18, 4  ;;  %vm10072_vm10 = vnez %v10071_v52  ;;  %v3098_v42 = vshrl.u32 %v5974_v16, 16  ;;  %vm10077_vm3 = vmmov %vm10066_vm0 }
 0x158   : > { %6645 = vmatmul.mubr.msk.bf16.gmra.mrb[12].mxu0 %vm10061_vm5, %v10060_v17  ;;  %6496 = vmatprep.mubr.msk.bf16.mxu1 %vm10064_vm15, %v3060_v4  ;;  %v2942_v4 = vsel %vm10070_vm11, %v8868_v34, 0  ;;  %v8874_v17 = vld [vmem:[%s7289_s25 + $0x4c] sm:$0xf]  ;;  %v3101_v35 = vshll.u32 %v5974_v16, 16  ;;  %vm10073_vm1 = vnez %v9815_v60  ;;  %vm10074_vm5 = vnez %v9818_v31  ;;  %vm10075_vm15 = vmmov %vm10066_vm0 }
 0x159   : > { %6648 = vmatprep.mubr.msk.bf16.mxu0 %vm10066_vm0, %v10065_v13  ;;  %v2943_v57 = vsel %vm10072_vm10, %v8874_v17, 0  ;;  %v2944_v54 = vsel %vm10073_vm1, %v9963_v0, 0  ;;  %v2945_v28 = vsel %vm10074_vm5, %v9967_v30, 0  ;;  %v3107_v18 = vshrl.u32 %v5975_v45, 16  ;;  %v10078_v0 = vld [vmem:[#allocation26_spill] sm:$0xff]  ;;  %vm10079_vm4 = vmmov %vm10066_vm0 }
 0x15a   : > { %v3110_v1 = vshll.u32 %v5975_v45, 16  ;;  %v5976_v49 = vcombine.low %v2942_v4, %v2943_v57  ;;  %v3086_v5 = vor.u32 %v3085_v7, %v3082_v15  ;;  %v5977_v60 = vcombine.low %v2944_v54, %v2945_v28  ;;  %v10082_v4 = vld [vmem:[#allocation27_spill] sm:$0xff] }
 0x15b   : > { %v3095_v31 = vor.u32 %v3094_v62, %v3091_v29  ;;  %v3100_v30 = vrot.slane %v3098_v42, 3  ;;  %v3103_v16 = vrot.slane %v3101_v35, 4  ;;  %v3109_v12 = vrot.slane %v3107_v18, 3  ;;  %v10088_v18 = vld [vmem:[#allocation15_spill] sm:$0xff] }
 0x15c   : > { %v3112_v45 = vrot.slane %v3110_v1, 4  ;;  %vm10083_vm10 = vnez %v10082_v4  ;;  %v3116_v57 = vshrl.u32 %v5976_v49, 16  ;;  %vm10084_vm1 = vsmask.f32 4352 }
 0x15d   : > { %v3119_v15 = vshll.u32 %v5976_v49, 16  ;;  %v3125_v7 = vshrl.u32 %v5977_v60, 16  ;;  %vm10085_vm5 = vmmov %vm10084_vm1  ;;  %v3128_v62 = vshll.u32 %v5977_v60, 16  ;;  %v3104_v35 = vor.u32 %v3103_v16, %v3100_v30  ;;  %v10091_v49 = vld [vmem:[#allocation32_spill] sm:$0xff]  ;;  %v7174_v30 = vld [vmem:[%s7289_s25 + $0x24] sm:$0xf] }
 0x15e   : > { %v3096_v29 = vsel %vm10085_vm5, %v3086_v5, %v3095_v31  ;;  %v3113_v54 = vor.u32 %v3112_v45, %v3109_v12  ;;  %v3118_v28 = vrot.slane %v3116_v57, 3  ;;  %v4981_v1 = vshll.u32 %v10088_v18, 16  ;;  %v7175_v12 = vld [vmem:[%s7289_s25 + $0x28] sm:$0xf] }
 0x15f   : > { %6497 = vmatmul.mubr.msk.bf16.vlgmr.msra.gmra.mrb[0].mxu1 %vm10075_vm15, %v3069_v23  ;;  %v10080_v23 = vld [vmem:[#allocation18_spill] sm:$0xff]  ;;  %vm10086_vm15 = vmmov %vm10066_vm0  ;;  %v3127_v60 = vrot.slane %v3125_v7, 3  ;;  %v4979_v4 = vshrl.u32 %v10088_v18, 16  ;;  %v7177_v7 = vld [vmem:[%s7289_s25 + $0x2c] sm:$0xf] }
 0x160   : > { %6649 = vmatmul.mubr.msk.bf16.gmra.mrb[16].mxu0 %vm10066_vm0, %v10076_v43  ;;  %6699 = vmatpush3.bf16.msra.mxu1 %v9928_v47  ;;  %vm10081_vm11 = vcmp.ne.s16.totalorder %v10080_v23, 0  ;;  %v7173_v43 = vld [vmem:[%s7289_s25 + $0x20] sm:$0xf]  ;;  %v8926_v23 = vld [vmem:[%s7289_s25 + $0x88] sm:$0xf] }
 0x161   : > { %6500 = vmatprep.mubr.msk.bf16.mxu1 %vm10077_vm3, %v3078_v37  ;;  %6652 = vmatprep.mubr.msk.bf16.mxu0 %vm10079_vm4, %v10078_v0  ;;  %v4862_v52 = vsel %vm10081_vm11, %v8793_v6, 0  ;;  %v4863_v47 = vsel %vm10083_vm10, %v7173_v43, 0  ;;  %v3087_v37 = vsel %vm10084_vm1, %v3077_v11, %v3086_v5  ;;  %v10087_v6 = vld [vmem:[#allocation31_spill] sm:$0xff]  ;;  %v2946_v11 = vsel %vm8336_vm13, %v8359_v58, 0  ;;  %vm10090_vm4 = vmmov %vm10066_vm0 }
 0x162   : > { %v6107_v42 = vcombine.low %v4862_v52, %v4863_v47  ;;  %vm10089_vm3 = vnez %v9833_v53  ;;  %vm10092_vm11 = vmmov %vm10066_vm0  ;;  %v3121_v5 = vrot.slane %v3119_v15, 4  ;;  %vm10093_vm10 = vcmp.ne.s16.totalorder %v7586_v46, 0 }
 0x163   : > { %v2947_v43 = vsel %vm10089_vm3, %v8398_v33, 0  ;;  %v4864_v16 = vsel %vm10093_vm10, %v7174_v30, 0  ;;  %vm10094_vm1 = vnez %v9659_v27  ;;  %v3130_v58 = vrot.slane %v3128_v62, 4  ;;  %vm10102_vm10 = vmmov %vm10090_vm4 }
 0x164   : > { %v4865_v2 = vsel %vm10094_vm1, %v7175_v12, 0  ;;  %v4986_v45 = vshll.u32 %v6107_v42, 16  ;;  %vm10095_vm13 = vnez %v9830_v59  ;;  %v2949_v33 = vsel %vm9901_vm2, %v8420_v41, 0  ;;  %vm10103_vm1 = vmmov %vm10090_vm4 }
 0x165   : > { %v2948_v53 = vsel %vm10095_vm13, %v8404_v56, 0  ;;  %v8930_v46 = vcombine.low %v8780_v44, %v8926_v23  ;;  %v5978_v52 = vcombine.low %v2946_v11, %v2947_v43  ;;  %v3105_v27 = vsel %vm10085_vm5, %v3095_v31, %v3104_v35  ;;  %vm10105_vm13 = vmmov %vm10085_vm5 }
 0x166   : > { %v4983_v47 = vrot.slane %v4981_v1, 1  ;;  %v6108_v57 = vcombine.low %v4864_v16, %v4865_v2  ;;  %v3122_v56 = vor.u32 %v3121_v5, %v3118_v28  ;;  %v5979_v15 = vcombine.low %v2948_v53, %v2949_v33  ;;  %v10100_v28 = vld [vmem:[#allocation35_spill] sm:$0xff] }
 0x167   : > { %6501 = vmatmul.mubr.msk.bf16.gmra.mrb[4].mxu1 %vm10086_vm15, %v3087_v37  ;;  %vm10096_vm15 = vmmov %vm10085_vm5  ;;  %v4990_v37 = vshrl.u32 %v6107_v42, 16  ;;  %v8935_v50 = vor.u32 %v3130_v58, %v3127_v60  ;;  %v4988_v41 = vrot.slane %v4986_v45, 1  ;;  %vm10097_vm2 = vcmp.ne.s16.totalorder %v7612_v25, 0 }
 0x168   : > { %6653 = vmatmul.mubr.msk.bf16.gmra.mrb[20].mxu0 %vm10066_vm0, %v10087_v6  ;;  %6504 = vmatprep.mubr.msk.bf16.mxu1 %vm10090_vm4, %v3096_v29  ;;  %v3114_v59 = vsel %vm10096_vm15, %v3104_v35, %v3113_v54  ;;  %v4866_v29 = vsel %vm10097_vm2, %v7177_v7, 0  ;;  %vm10098_vm0 = vnez %v9662_v19  ;;  %v3134_v62 = vshrl.u32 %v5978_v52, 16 }
 0x169   : > { %6656 = vmatprep.mubr.msk.bf16.mxu0 %vm10092_vm11, %v10091_v49  ;;  %v4867_v31 = vsel %vm10098_vm0, %v8822_v26, 0  ;;  %v3137_v18 = vshll.u32 %v5978_v52, 16  ;;  %v2950_v35 = vsel %vm9910_vm9, %v8450_v36, 0  ;;  %vm10099_vm3 = vnez %v9845_v10  ;;  %vm10101_vm11 = vmmov %vm10090_vm4 }
 0x16a   : > { %v2951_v42 = vsel %vm10099_vm3, %v8473_v51, 0  ;;  %v4984_v25 = vor.u32 %v4983_v47, %v4979_v4  ;;  %v4994_v1 = vshll.u32 %v6108_v57, 16  ;;  %v3143_v19 = vshrl.u32 %v5979_v15, 16  ;;  %vm10104_vm9 = vmmov %vm10085_vm5 }
 0x16b   : > { %v6109_v26 = vcombine.low %v4866_v29, %v4867_v31  ;;  %v2952_v36 = vsel %vm8445_vm7, %v8495_v8, 0  ;;  %v2953_v10 = vsel %vm8468_vm6, %v8523_v24, 0  ;;  %v3123_v51 = vsel %vm10104_vm9, %v3113_v54, %v3122_v56  ;;  %vm10111_vm0 = vmmov %vm10103_vm1 }
 0x16c   : > { %v6088_v11 = vcombine.low %v8963_v3, %v8690_v22  ;;  %v3146_v43 = vshll.u32 %v5979_v15, 16  ;;  %v5980_v5 = vcombine.low %v2950_v35, %v2951_v42  ;;  %v3132_v60 = vsel %vm10105_vm13, %v3122_v56, %v8935_v50  ;;  %vm10112_vm3 = vmmov %vm10111_vm0  ;;  %v10122_v42 = vld [vmem:[#allocation84_spill] sm:$0xff] }
 0x16d   : > { %v4992_v30 = vor.u32 %v4990_v37, %v4988_v41  ;;  %v3136_v16 = vrot.slane %v3134_v62, 3  ;;  %v3139_v48 = vrot.slane %v3137_v18, 4  ;;  %v4996_v8 = vrot.slane %v4994_v1, 1  ;;  %v10119_v62 = vld [vmem:[#allocation80_spill] sm:$0xff]  ;;  %v10120_v18 = vld [vmem:[#allocation82_spill] sm:$0xff] }
 0x16e   : > { %vm10106_vm7 = vcmp.ne.s16.totalorder %v9902_v55, 0  ;;  %vm10107_vm6 = vnez %v9907_v9  ;;  %v5981_v54 = vcombine.low %v2952_v36, %v2953_v10  ;;  %vm10108_vm5 = vsmask.f32 7424 }
 0x16f   : > { %6505 = vmatmul.mubr.msk.bf16.gmra.mrb[8].mxu1 %vm10090_vm4, %v3105_v27  ;;  %v4868_v20 = vsel %vm10106_vm7, %v8828_v39, 0  ;;  %v4869_v24 = vsel %vm10107_vm6, %v8836_v14, 0  ;;  %v4989_v12 = vsel %vm10108_vm5, %v4984_v25, %v4988_v41  ;;  %v3145_v2 = vrot.slane %v3143_v19, 3  ;;  %vm10113_vm4 = vmmov %vm10108_vm5 }
 0x170   : > { %6657 = vmatmul.mubr.msk.bf16.gmra.mrb[24].mxu0 %vm10101_vm11, %v10100_v28  ;;  %6508 = vmatprep.mubr.msk.bf16.mxu1 %vm10102_vm10, %v3114_v59  ;;  %v4998_v58 = vshrl.u32 %v6108_v57, 16  ;;  %v5002_v45 = vshll.u32 %v6109_v26, 16  ;;  %v3148_v53 = vrot.slane %v3146_v43, 4  ;;  %v3152_v33 = vshrl.u32 %v5980_v5, 16  ;;  %vm10114_vm11 = vmmov %vm10111_vm0  ;;  %v10117_v57 = vld [vmem:[#allocation85_spill] sm:$0xff]  ;;  %v10127_v43 = vld [vmem:[#allocation38_spill] sm:$0xff] }
 0x171   : > { %6660 = vmatprep.mubr.msk.bf16.mxu0 %vm10103_vm1, %v8930_v46  ;;  %vm10109_vm15 = vcmp.ne.s16.totalorder %v9913_v32, 0  ;;  %vm10110_vm2 = vnez %v9919_v21  ;;  %v3155_v39 = vshll.u32 %v5980_v5, 16  ;;  %v6110_v27 = vcombine.low %v4868_v20, %v4869_v24  ;;  %vm10115_vm10 = vmmov %vm10111_vm0  ;;  %v10131_v20 = vld [vmem:[#allocation37_spill] sm:$0xff] }
 0x172   : > { %v4870_v52 = vsel %vm10109_vm15, %v8842_v38, 0  ;;  %v4871_v55 = vsel %vm10110_vm2, %v8851_v61, 0  ;;  %v3140_v9 = vor.u32 %v3139_v48, %v3136_v16  ;;  %v4997_v14 = vsel %vm10113_vm4, %v4992_v30, %v4996_v8  ;;  %vm10130_vm6 = vmmov %vm10113_vm4 }
 0x173   : > { %v3161_v4 = vshrl.u32 %v5981_v54, 16  ;;  %v3164_v47 = vshll.u32 %v5981_v54, 16  ;;  %v5000_v32 = vor.u32 %v4998_v58, %v4996_v8  ;;  %v8987_v38 = vcombine.low %v4870_v52, %v4871_v55  ;;  %v7179_v54 = vld [vmem:[%s7289_s25 + $0x50] sm:$0xf]  ;;  %vm10135_vm2 = vmmov %vm10111_vm0 }
 0x174   : > { %v2954_v61 = vsel %vm8489_vm12, %v8534_v63, 0  ;;  %v2955_v56 = vsel %vm8513_vm8, %v10117_v57, 0  ;;  %v3149_v37 = vor.u32 %v3148_v53, %v3145_v2  ;;  %v5004_v15 = vrot.slane %v5002_v45, 1  ;;  %vm10124_vm12 = vmmov %vm10105_vm13 }
 0x175   : > { %v3154_v41 = vrot.slane %v3152_v33, 3  ;;  %v5006_v7 = vshrl.u32 %v6109_v26, 16  ;;  %v3157_v29 = vrot.slane %v3155_v39, 4  ;;  %v5010_v31 = vshll.u32 %v6110_v27, 16  ;;  %vm10129_vm7 = vmmov %vm10124_vm12  ;;  %v10138_v39 = vld [vmem:[#allocation6_spill] sm:$0xff] }
 0x176   : > { %vm10121_vm1 = vnez %v10120_v18  ;;  %vm10123_vm9 = vnez %v10122_v42  ;;  %v3141_v63 = vsel %vm10124_vm12, %v8935_v50, %v3140_v9  ;;  %v3163_v1 = vrot.slane %v3161_v4, 3  ;;  %vm10137_vm4 = vmmov %vm10111_vm0  ;;  %v10148_v42 = vld [vmem:[#allocation42_spill] sm:$0xff] }
 0x177   : > { %6509 = vmatmul.mubr.msk.bf16.gmra.mrb[12].mxu1 %vm10111_vm0, %v3123_v51  ;;  %v2956_v35 = vsel %vm10121_vm1, %v10119_v62, 0  ;;  %v2957_v25 = vsel %vm10123_vm9, %v8780_v44, 0  ;;  %v3166_v19 = vrot.slane %v3164_v47, 4  ;;  %v5982_v36 = vcombine.low %v2954_v61, %v2955_v56  ;;  %v10125_v51 = vld [vmem:[#allocation33_spill] sm:$0xff]  ;;  %vm10141_vm1 = vmmov %vm10130_vm6  ;;  %v7180_v56 = vld [vmem:[%s7289_s25 + $0x54] sm:$0xf] }
 0x178   : > { %6661 = vmatmul.mubr.msk.bf16.gmra.mrb[28].mxu0 %vm10112_vm3, %v6088_v11  ;;  %6512 = vmatprep.mubr.msk.bf16.mxu1 %vm10114_vm11, %v3132_v60  ;;  %v5014_v10 = vshrl.u32 %v6110_v27, 16  ;;  %v5018_v26 = vshll.u32 %v8987_v38, 16  ;;  %vm10126_vm8 = vcmp.ne.s16.totalorder %v10125_v51, 0  ;;  %vm10128_vm13 = vnez %v10127_v43  ;;  %vm10136_vm3 = vmmov %vm10111_vm0 }
 0x179   : > { %6666 = vmatprep.mubr.msk.bf16.mxu0 %vm10115_vm10, %v4989_v12  ;;  %v4872_v11 = vsel %vm10126_vm8, %v8857_v40, 0  ;;  %v4873_v5 = vsel %vm10128_vm13, %v8868_v34, 0  ;;  %v3150_v60 = vsel %vm10129_vm7, %v3140_v9, %v3149_v37  ;;  %v5005_v30 = vsel %vm10130_vm6, %v5000_v32, %v5004_v15  ;;  %v10133_v12 = vld [vmem:[#allocation40_spill] sm:$0xff]  ;;  %vm10140_vm10 = vmmov %vm10129_vm7 }
 0x17a   : > { %v5008_v16 = vor.u32 %v5006_v7, %v5004_v15  ;;  %v5983_v50 = vcombine.low %v2956_v35, %v2957_v25  ;;  %v3158_v48 = vor.u32 %v3157_v29, %v3154_v41  ;;  %v5012_v8 = vrot.slane %v5010_v31, 1  ;;  %vm10142_vm9 = vmmov %vm10129_vm7  ;;  %v10144_v15 = vld [vmem:[#allocation39_spill] sm:$0xff]  ;;  %v7181_v7 = vld [vmem:[%s7289_s25 + $0x58] sm:$0xf] }
 0x17b   : > { %vm10132_vm5 = vcmp.ne.s16.totalorder %v10131_v20, 0  ;;  %vm10134_vm15 = vnez %v10133_v12  ;;  %v3167_v34 = vor.u32 %v3166_v19, %v3163_v1  ;;  %v3170_v2 = vshrl.u32 %v5982_v36, 16  ;;  %vm10143_vm12 = vmmov %vm10141_vm1  ;;  %v7182_v35 = vld [vmem:[%s7289_s25 + $0x5c] sm:$0xf]  ;;  %v10150_v1 = vld [vmem:[#allocation44_spill] sm:$0xff] }
 0x17c   : > { %v4874_v24 = vsel %vm10132_vm5, %v8874_v17, 0  ;;  %v4875_v40 = vsel %vm10134_vm15, %v7179_v54, 0  ;;  %v3173_v58 = vshll.u32 %v5982_v36, 16  ;;  %v6112_v45 = vcombine.low %v4872_v11, %v4873_v5  ;;  %vm10152_vm5 = vmmov %vm10111_vm0  ;;  %v7184_v12 = vld [vmem:[%s7289_s25 + $0x64] sm:$0xf] }
 0x17d   : > { %v5016_v53 = vor.u32 %v5014_v10, %v5012_v8  ;;  %v5020_v33 = vrot.slane %v5018_v26, 1  ;;  %v3179_v17 = vshrl.u32 %v5983_v50, 16  ;;  %v3182_v52 = vshll.u32 %v5983_v50, 16  ;;  %vm10153_vm15 = vmmov %vm10111_vm0 }
 0x17e   : > { %v9022_v55 = vcombine.low %v4874_v24, %v4875_v40  ;;  %vm10139_vm11 = vcmp.ne.s16.totalorder %v10138_v39, 0  ;;  %v3159_v9 = vsel %vm10140_vm10, %v3149_v37, %v3158_v48  ;;  %v5022_v4 = vshrl.u32 %v8987_v38, 16  ;;  %v10146_v37 = vld [vmem:[#allocation41_spill] sm:$0xff]  ;;  %v10157_v40 = vld [vmem:[#allocation43_spill] sm:$0xff] }
 0x17f   : > { %6513 = vmatmul.mubr.msk.bf16.gmra.mrb[16].mxu1 %vm10135_vm2, %v3141_v63  ;;  %v2958_v27 = vsel %vm10139_vm11, %v8926_v23, 0  ;;  %v3168_v47 = vsel %vm10142_vm9, %v3158_v48, %v3167_v34  ;;  %v3172_v32 = vrot.slane %v3170_v2, 3  ;;  %v3175_v21 = vrot.slane %v3173_v58, 4  ;;  %v7183_v63 = vld [vmem:[%s7289_s25 + $0x60] sm:$0xf]  ;;  %vm10154_vm2 = vmmov %vm10111_vm0 }
 0x180   : > { %6667 = vmatmul.mubr.msk.bf16.vlgmr.msra.gmra.mrb[0].mxu0 %vm10111_vm0, %v4997_v14  ;;  %6516 = vmatprep.mubr.msk.bf16.mxu1 %vm10136_vm3, %v3150_v60  ;;  %v5013_v14 = vsel %vm10141_vm1, %v5008_v16, %v5012_v8  ;;  %v5026_v61 = vshll.u32 %v6112_v45, 16  ;;  %v5021_v57 = vsel %vm10143_vm12, %v5016_v53, %v5020_v33  ;;  %v5984_v59 = vcombine.low %v2958_v27, %v2958_v27  ;;  %vm10155_vm3 = vmmov %vm10142_vm9  ;;  %v7185_v58 = vld [vmem:[%s7289_s25 + $0x68] sm:$0xf]  ;;  %v7186_v39 = vld [vmem:[%s7289_s25 + $0x6c] sm:$0xf] }
 0x181   : > { %6670 = vmatprep.mubr.msk.bf16.mxu0 %vm10137_vm4, %v5005_v30  ;;  %vm10145_vm8 = vcmp.ne.s16.totalorder %v10144_v15, 0  ;;  %vm10147_vm13 = vnez %v10146_v37  ;;  %v3181_v31 = vrot.slane %v3179_v17, 3  ;;  %v3184_v62 = vrot.slane %v3182_v52, 4  ;;  %vm10156_vm4 = vmmov %vm10141_vm1  ;;  %v10163_v27 = vld [vmem:[#allocation21_spill] sm:$0xff] }
 0x182   : > { %v4876_v41 = vsel %vm10145_vm8, %v7180_v56, 0  ;;  %v4877_v29 = vsel %vm10147_vm13, %v7181_v7, 0  ;;  %v5030_v38 = vshrl.u32 %v6112_v45, 16  ;;  %v5034_v18 = vshll.u32 %v9022_v55, 16  ;;  %v10159_v45 = vld [vmem:[#allocation3_spill] sm:$0xff]  ;;  %vm10161_vm1 = vmmov %vm10155_vm3 }
 0x183   : > { %vm10149_vm7 = vcmp.ne.s16.totalorder %v10148_v42, 0  ;;  %vm10151_vm6 = vnez %v10150_v1  ;;  %v3176_v36 = vor.u32 %v3175_v21, %v3172_v32  ;;  %v5024_v10 = vor.u32 %v5022_v4, %v5020_v33  ;;  %vm10162_vm9 = vmmov %vm10156_vm4  ;;  %v7190_v1 = vld [vmem:[%s7289_s25 + $0x7c] sm:$0xf] }
 0x184   : > { %v4878_v25 = vsel %vm10149_vm7, %v7182_v35, 0  ;;  %v4879_v19 = vsel %vm10151_vm6, %v7183_v63, 0  ;;  %v5028_v26 = vrot.slane %v5026_v61, 1  ;;  %v6114_v51 = vcombine.low %v4876_v41, %v4877_v29  ;;  %vm10167_vm13 = vmmov %vm10111_vm0  ;;  %v7188_v29 = vld [vmem:[%s7289_s25 + $0x74] sm:$0xf] }
 0x185   : > { %v3188_v11 = vshrl.u32 %v5984_v59, 16  ;;  %v3191_v43 = vshll.u32 %v5984_v59, 16  ;;  %v3185_v5 = vor.u32 %v3184_v62, %v3181_v31  ;;  %v5036_v30 = vrot.slane %v5034_v18, 1  ;;  %vm10168_vm7 = vmmov %vm10111_vm0  ;;  %v10173_v31 = vld [vmem:[#allocation48_spill] sm:$0xff]  ;;  %v10175_v18 = vld [vmem:[#allocation51_spill] sm:$0xff] }
 0x186   : > { %v5032_v60 = vor.u32 %v5030_v38, %v5028_v26  ;;  %v6115_v16 = vcombine.low %v4878_v25, %v4879_v19  ;;  %v3177_v50 = vsel %vm10155_vm3, %v3167_v34, %v3176_v36  ;;  %v5029_v48 = vsel %vm10156_vm4, %v5024_v10, %v5028_v26  ;;  %vm10169_vm6 = vmmov %vm10111_vm0  ;;  %v7189_v38 = vld [vmem:[%s7289_s25 + $0x78] sm:$0xf]  ;;  %v10178_v19 = vld [vmem:[#allocation50_spill] sm:$0xff] }
 0x187   : > { %6517 = vmatmul.mubr.msk.bf16.gmra.mrb[20].mxu1 %vm10152_vm5, %v3159_v9  ;;  %v5038_v8 = vshrl.u32 %v9022_v55, 16  ;;  %v5042_v20 = vshll.u32 %v6114_v51, 16  ;;  %v3190_v24 = vrot.slane %v3188_v11, 3  ;;  %v3193_v54 = vrot.slane %v3191_v43, 4  ;;  %v7187_v9 = vld [vmem:[%s7289_s25 + $0x70] sm:$0xf]  ;;  %vm10170_vm5 = vmmov %vm10111_vm0 }
 0x188   : > { %6671 = vmatmul.mubr.msk.bf16.gmra.mrb[4].mxu0 %vm10153_vm15, %v5013_v14  ;;  %6520 = vmatprep.mubr.msk.bf16.mxu1 %vm10154_vm2, %v3168_v47  ;;  %vm10158_vm11 = vcmp.ne.s16.totalorder %v10157_v40, 0  ;;  %vm10160_vm10 = vnez %v10159_v45  ;;  %v3186_v33 = vsel %vm10161_vm1, %v3176_v36, %v3185_v5  ;;  %v5037_v34 = vsel %vm10162_vm9, %v5032_v60, %v5036_v30  ;;  %v10165_v14 = vld [vmem:[#allocation22_spill] sm:$0xff]  ;;  %vm10171_vm15 = vmmov %vm10161_vm1 }
 0x189   : > { %6674 = vmatprep.mubr.msk.bf16.mxu0 %vm10111_vm0, %v5021_v57  ;;  %v4880_v2 = vsel %vm10158_vm11, %v7184_v12, 0  ;;  %v4881_v53 = vsel %vm10160_vm10, %v7185_v58, 0  ;;  %v5046_v17 = vshrl.u32 %v6114_v51, 16  ;;  %v5050_v52 = vshll.u32 %v6115_v16, 16  ;;  %vm10172_vm2 = vmmov %vm10156_vm4  ;;  %v7191_v10 = vld [vmem:[%s7289_s25 + $0x80] sm:$0xf] }
 0x18a   : > { %vm10164_vm12 = vcmp.ne.s16.totalorder %v10163_v27, 0  ;;  %vm10166_vm8 = vnez %v10165_v14  ;;  %v5044_v47 = vrot.slane %v5042_v20, 1  ;;  %v6116_v32 = vcombine.low %v4880_v2, %v4881_v53  ;;  %vm10177_vm4 = vmmov %vm10172_vm2  ;;  %v10189_v12 = vld [vmem:[#allocation60_spill] sm:$0xff]  ;;  %v10192_v53 = vld [vmem:[#allocation61_spill] sm:$0xff] }
 0x18b   : > { %v4882_v55 = vsel %vm10164_vm12, %v7186_v39, 0  ;;  %v4883_v4 = vsel %vm10166_vm8, %v7187_v9, 0  ;;  %v3194_v21 = vor.u32 %v3193_v54, %v3190_v24  ;;  %v5040_v61 = vor.u32 %v5038_v8, %v5036_v30  ;;  %vm10181_vm10 = vmmov %vm10170_vm5  ;;  %v10187_v24 = vld [vmem:[#allocation57_spill] sm:$0xff]  ;;  %v234_v9 = vld [vmem:[%s7289_s25 + $0x94] sm:$0xf] }
 0x18c   : > { %v5048_v57 = vor.u32 %v5046_v17, %v5044_v47  ;;  %v5052_v59 = vrot.slane %v5050_v52, 1  ;;  %v6117_v56 = vcombine.low %v4882_v55, %v4883_v4  ;;  %v5054_v15 = vshrl.u32 %v6115_v16, 16  ;;  %vm10182_vm1 = vmmov %vm10170_vm5  ;;  %v10198_v52 = vld [vmem:[#allocation25_spill] sm:$0xff] }
 0x18d   : > { %v5058_v41 = vshll.u32 %v6116_v32, 16  ;;  %v3195_v7 = vsel %vm10171_vm15, %v3185_v5, %v3194_v21  ;;  %v5045_v37 = vsel %vm10172_vm2, %v5040_v61, %v5044_v47  ;;  %vm10174_vm0 = vcmp.ne.s16.totalorder %v10173_v31, 0  ;;  %v10183_v5 = vld [vmem:[#allocation20_spill] sm:$0xff]  ;;  %vm10184_vm9 = vmmov %vm10182_vm1  ;;  %v10202_v21 = vld [vmem:[#allocation69_spill] sm:$0xff] }
 0x18e   : > { %v4884_v62 = vsel %vm10174_vm0, %v7188_v29, 0  ;;  %vm10176_vm3 = vnez %v10175_v18  ;;  %v5053_v42 = vsel %vm10177_vm4, %v5048_v57, %v5052_v59  ;;  %v5062_v25 = vshrl.u32 %v6116_v32, 16  ;;  %vm10185_vm12 = vmmov %vm10182_vm1 }
 0x18f   : > { %6521 = vmatmul.mubr.msk.bf16.gmra.mrb[24].mxu1 %vm10167_vm13, %v3177_v50  ;;  %v4885_v35 = vsel %vm10176_vm3, %v7189_v38, 0  ;;  %v5066_v63 = vshll.u32 %v6117_v56, 16  ;;  %vm10179_vm11 = vcmp.ne.s16.totalorder %v10178_v19, 0  ;;  %v4887_v51 = vsel %vm9991_vm14, %v7191_v10, 0  ;;  %vm10186_vm8 = vmmov %vm10172_vm2 }
 0x190   : > { %6675 = vmatmul.mubr.msk.bf16.gmra.mrb[8].mxu0 %vm10168_vm7, %v5029_v48  ;;  %6524 = vmatprep.mubr.msk.bf16.mxu1 %vm10169_vm6, %v3186_v33  ;;  %v4886_v36 = vsel %vm10179_vm11, %v7190_v1, 0  ;;  %v5060_v11 = vrot.slane %v5058_v41, 1  ;;  %v6118_v43 = vcombine.low %v4884_v62, %v4885_v35  ;;  %v5056_v60 = vor.u32 %v5054_v15, %v5052_v59  ;;  %vm10191_vm7 = vmmov %vm10172_vm2 }
 0x191   : > { %6678 = vmatprep.mubr.msk.bf16.mxu0 %vm10170_vm5, %v5037_v34  ;;  %v5068_v16 = vrot.slane %v5066_v63, 1  ;;  %v6119_v50 = vcombine.low %v4886_v36, %v4887_v51  ;;  %v5070_v20 = vshrl.u32 %v6117_v56, 16  ;;  %vm10188_vm14 = vcmp.ne.s16.totalorder %v10187_v24, 0  ;;  %v10194_v34 = vld [vmem:[#allocation68_spill] sm:$0xff]  ;;  %vm10196_vm15 = vmmov %vm10182_vm1 }
 0x192   : > { %v5064_v30 = vor.u32 %v5062_v25, %v5060_v11  ;;  %v5074_v48 = vshll.u32 %v6118_v43, 16  ;;  %v5061_v8 = vsel %vm10186_vm8, %v5056_v60, %v5060_v11  ;;  %v4888_v54 = vsel %vm10188_vm14, %v8780_v44, 0  ;;  %vm10197_vm2 = vmmov %vm10182_vm1 }
 0x193   : > { %vm10190_vm13 = vnez %v10189_v12  ;;  %v5078_v58 = vshrl.u32 %v6118_v43, 16  ;;  %v5082_v45 = vshll.u32 %v6119_v50, 16  ;;  %vm10193_vm6 = vcmp.ne.s16.totalorder %v10192_v53, 0  ;;  %vm10199_vm0 = vmmov %vm10182_vm1 }
 0x194   : > { %v4889_v40 = vsel %vm10190_vm13, %v8926_v23, 0  ;;  %v5069_v2 = vsel %vm10191_vm7, %v5064_v30, %v5068_v16  ;;  %v4890_v33 = vsel %vm10193_vm6, %v8963_v3, 0  ;;  %vm10195_vm5 = vnez %v10194_v34  ;;  %vm10200_vm3 = vmmov %vm10199_vm0 }
 0x195   : > { %v4891_v17 = vsel %vm10195_vm5, %v8690_v22, 0  ;;  %v5076_v44 = vrot.slane %v5074_v48, 1  ;;  %v6120_v23 = vcombine.low %v4888_v54, %v4889_v40  ;;  %v5072_v39 = vor.u32 %v5070_v20, %v5068_v16  ;;  %vm10201_vm11 = vmmov %vm10177_vm4 }
 0x196   : > { %v5084_v55 = vrot.slane %v5082_v45, 1  ;;  %v6121_v3 = vcombine.low %v4890_v33, %v4891_v17  ;;  %v5086_v4 = vshrl.u32 %v6119_v50, 16  ;;  %vm10207_vm8 = vmmov %vm10199_vm0 }
 0x197   : > { %6525 = vmatmul.mubr.msk.bf16.gmra.mrb[28].mxu1 %vm10181_vm10, %v3195_v7  ;;  %v5080_v27 = vor.u32 %v5078_v58, %v5076_v44  ;;  %v5090_v14 = vshll.u32 %v6120_v23, 16  ;;  %v5077_v22 = vsel %vm10177_vm4, %v5072_v39, %v5076_v44  ;;  %v5094_v47 = vshrl.u32 %v6120_v23, 16  ;;  %vm10208_vm14 = vmmov %vm10177_vm4 }
 0x198   : > { %6679 = vmatmul.mubr.msk.bf16.gmra.mrb[12].mxu0 %vm10182_vm1, %v5045_v37  ;;  %6546 = vmatprep.mubr.msk.bf16.mxu1 %vm10184_vm9, %v10183_v5  ;;  %v5098_v32 = vshll.u32 %v6121_v3, 16  ;;  %vm10203_vm10 = vnez %v10202_v21  ;;  %vm10204_vm1 = vmmov %vm10199_vm0  ;;  %v5088_v59 = vor.u32 %v5086_v4, %v5084_v55  ;;  %v5102_v37 = vshrl.u32 %v6121_v3, 16  ;;  %v9146_v5 = vld [vmem:[%s9394_s2] ss:$0 sm:$0xff] }
 0x199   : > { %6682 = vmatprep.mubr.msk.bf16.mxu0 %vm10185_vm12, %v5053_v42  ;;  %v4892_v61 = vsel %vm10203_vm10, %v234_v9, 0  ;;  %vm10205_vm9 = vmmov %vm10199_vm0  ;;  %v5092_v57 = vrot.slane %v5090_v14, 1 }
 0x19a   : > { %vm10206_vm12 = vmmov %vm10199_vm0  ;;  %v6122_v56 = vcombine.low %v4892_v61, %v4892_v61  ;;  %v5100_v41 = vrot.slane %v5098_v32, 1 }
 0x19b   : > { %v5096_v15 = vor.u32 %v5094_v47, %v5092_v57  ;;  %v5093_v7 = vsel %vm10208_vm14, %v5088_v59, %v5092_v57  ;;  %vm10209_vm13 = vmmov %vm10177_vm4 }
 0x19c   : > { %v5106_v29 = vshll.u32 %v6122_v56, 16  ;;  %vm10210_vm7 = vmmov %vm10199_vm0 }
 0x19d   : > { %v5101_v31 = vsel %vm10209_vm13, %v5096_v15, %v5100_v41  ;;  %vm10211_vm6 = vmmov %vm10199_vm0 }
 0x19e   : > { %vm10212_vm5 = vmmov %vm10199_vm0 }
 0x19f   : > { %6547 = vmatmul.mubr.msk.bf16.vlgmr.msra.gmra.mrb[16].mxu1 %vm10196_vm15, %v10065_v13  ;;  %v5085_v13 = vsel %vm10201_vm11, %v5080_v27, %v5084_v55  ;;  %vm10213_vm15 = vmmov %vm10199_vm0 }
 0x1a0   : > { %6683 = vmatmul.mubr.msk.bf16.gmra.mrb[16].mxu0 %vm10197_vm2, %v5061_v8  ;;  %6550 = vmatprep.mubr.msk.bf16.mxu1 %vm10199_vm0, %v10198_v52  ;;  %vm10214_vm2 = vmmov %vm10177_vm4  ;;  %vm5745_vm4 = vcmask 60416  }
 0x1a1   : > { %6686 = vmatprep.mubr.msk.bf16.mxu0 %vm10200_vm3, %v5069_v2  ;;  %vm10215_vm3 = vmmov %vm10199_vm0 }
 0x1a7   : > { %6551 = vmatmul.mubr.msk.bf16.gmra.mrb[20].mxu1 %vm10204_vm1, %v10078_v0  ;;  %v5104_v0 = vor.u32 %v5102_v37, %v5100_v41 }
 0x1a8   : > { %6687 = vmatmul.mubr.msk.bf16.gmra.mrb[20].mxu0 %vm10205_vm9, %v5077_v22  ;;  %6554 = vmatprep.mubr.msk.bf16.mxu1 %vm10206_vm12, %v10087_v6  ;;  %v5108_v6 = vrot.slane %v5106_v29, 1 }
 0x1a9   : > { %6690 = vmatprep.mubr.msk.bf16.mxu0 %vm10207_vm8, %v5085_v13 }
 0x1aa   : > { %v5109_v62 = vsel %vm10214_vm2, %v5104_v0, %v5108_v6 }
 0x1af   : > { %6555 = vmatmul.mubr.msk.bf16.gmra.mrb[24].mxu1 %vm10210_vm7, %v10091_v49 }
 0x1b0   : > { %6691 = vmatmul.mubr.msk.bf16.gmra.mrb[24].mxu0 %vm10211_vm6, %v5093_v7  ;;  %6558 = vmatprep.mubr.msk.bf16.mxu1 %vm10212_vm5, %v10100_v28 }
 0x1b1   : > { %6694 = vmatprep.mubr.msk.bf16.mxu0 %vm10213_vm15, %v5101_v31 }
 0x1b7   : > { %6559 = vmatmul.mubr.msk.bf16.gmra.mrb[28].mxu1 %vm10199_vm0, %v8930_v46 }
 0x1b8   : > { %6695 = vmatmul.mubr.msk.bf16.gmra.mrb[28].mxu0 %vm10215_vm3, %v5109_v62 }
 0x232   : > { %v6498_v38 = vpop.f32.mrb[0].mxu1 }
 0x233   : > { %v3281_v18 = vpop.f32.mrb[1].mxu1 }
 0x234   : > { %v6499_v35 = vpop.f32.mrb[2].mxu1 }
 0x235   : > { %v3284_v49 = vpop.f32.mrb[3].mxu1 }
 0x23a   : > { %v6502_v42 = vpop.f32.mrb[4].mxu1 }
 0x23b   : > { %v3297_v25 = vpop.f32.mrb[5].mxu1 }
 0x23c   : > { %v6503_v63 = vpop.f32.mrb[6].mxu1 }
 0x23d   : > { %v3300_v1 = vpop.f32.mrb[7].mxu1 }
 0x242   : > { %v6506_v28 = vpop.f32.mrb[8].mxu1 }
 0x243   : > { %v3313_v19 = vpop.f32.mrb[9].mxu1 }
 0x244   : > { %v6507_v36 = vpop.f32.mrb[10].mxu1 }
 0x245   : > { %v9133_v10 = vpop.f32.mrb[11].mxu1 }
 0x24a   : > { %v9135_v26 = vpop.f32.mrb[12].mxu1 }
 0x24b   : > { %v9137_v51 = vpop.f32.mrb[13].mxu1 }
 0x24c   : > { %v9139_v46 = vpop.f32.mrb[14].mxu1 }
 0x24d   : > { %v9141_v11 = vpop.f32.mrb[15].mxu1 }
 0x253   : > { %v6668_v43 = vpop.f32.mrb[0].mxu0 }
 0x254   : > { %v6700_v60 = vadd.f32 %v6668_v43, %v6498_v38  ;;  %v5195_v30 = vpop.f32.mrb[1].mxu0 }
 0x255   : > { %v6701_v16 = vadd.f32 %v5195_v30, %v3281_v18  ;;  %v6669_v50 = vpop.f32.mrb[2].mxu0 }
 0x256   : > { %v9149_v48 = vadd.f32 %v6700_v60, %v9146_v5  ;;  %v6702_v8 = vadd.f32 %v6669_v50, %v6499_v35  ;;  %v5198_v20 = vpop.f32.mrb[3].mxu0 }
 0x257   : > { %v9152_v24 = vadd.f32 %v6701_v16, %v9146_v5  ;;  %v6703_v54 = vadd.f32 %v5198_v20, %v3284_v49 }
 0x258   : > { %v6142_v12 = vmul.f32 -1.442695, %v9149_v48  ;;  %v9156_v40 = vadd.f32 %v6702_v8, %v9146_v5 }
 0x259   : > { %v6140_v2 = vmul.f32 -1.442695, %v9152_v24  ;;  %v9160_v58 = vadd.f32 %v6703_v54, %v9146_v5 }
 0x25a   : > { %7002 = vpow2.f32 %v6142_v12  ;;  %v6143_v45 = vmul.f32 -1.442695, %v9156_v40 }
 0x25b   : > { %7004 = vpow2.f32 %v6140_v2  ;;  %v6141_v53 = vmul.f32 -1.442695, %v9160_v58  ;;  %v6672_v33 = vpop.f32.mrb[4].mxu0 }
 0x25c   : > { %7006 = vpow2.f32 %v6143_v45  ;;  %v6704_v34 = vadd.f32 %v6672_v33, %v6502_v42  ;;  %v5211_v17 = vpop.f32.mrb[5].mxu0 }
 0x25d   : > { %7008 = vpow2.f32 %v6141_v53  ;;  %v6705_v44 = vadd.f32 %v5211_v17, %v3297_v25  ;;  %v6673_v23 = vpop.f32.mrb[6].mxu0 }
 0x25e   : > { %v9165_v52 = vadd.f32 %v6704_v34, %v9146_v5  ;;  %v6706_v39 = vadd.f32 %v6673_v23, %v6503_v63  ;;  %v5214_v27 = vpop.f32.mrb[7].mxu0 }
 0x25f   : > { %v9168_v55 = vadd.f32 %v6705_v44, %v9146_v5  ;;  %v6707_v3 = vadd.f32 %v5214_v27, %v3300_v1 }
 0x260   : > { %v6146_v9 = vmul.f32 -1.442695, %v9165_v52  ;;  %v9172_v14 = vadd.f32 %v6706_v39, %v9146_v5 }
 0x261   : > { %v6144_v22 = vmul.f32 -1.442695, %v9168_v55  ;;  %v9176_v4 = vadd.f32 %v6707_v3, %v9146_v5 }
 0x262   : > { %7010 = vpow2.f32 %v6146_v9  ;;  %v6147_v13 = vmul.f32 -1.442695, %v9172_v14 }
 0x263   : > { %7012 = vpow2.f32 %v6144_v22  ;;  %v6145_v47 = vmul.f32 -1.442695, %v9176_v4  ;;  %v6676_v32 = vpop.f32.mrb[8].mxu0 }
 0x264   : > { %v7003_v21 = vpop.eup %7002  ;;  %7014 = vpow2.f32 %v6147_v13  ;;  %v6708_v61 = vadd.f32 %v6676_v32, %v6506_v28  ;;  %v5227_v57 = vpop.f32.mrb[9].mxu0 }
 0x265   : > { %v7005_v59 = vpop.eup %7004  ;;  %v5491_v56 = vadd.f32 1.0, %v7003_v21  ;;  %7016 = vpow2.f32 %v6145_v47  ;;  %v6709_v15 = vadd.f32 %v5227_v57, %v3313_v19  ;;  %v6677_v41 = vpop.f32.mrb[10].mxu0 }
 0x266   : > { %v7007_v7 = vpop.eup %7006  ;;  %v5489_v37 = vadd.f32 1.0, %v7005_v59  ;;  %v9181_v29 = vadd.f32 %v6708_v61, %v9146_v5  ;;  %v6710_v31 = vadd.f32 %v6677_v41, %v6507_v36  ;;  %v5230_v0 = vpop.f32.mrb[11].mxu0 }
 0x267   : > { %v7009_v6 = vpop.eup %7008  ;;  %7018 = vrcp.f32 %v5491_v56  ;;  %v5492_v62 = vadd.f32 1.0, %v7007_v7  ;;  %v9184_v38 = vadd.f32 %v6709_v15, %v9146_v5  ;;  %v6711_v18 = vadd.f32 %v5230_v0, %v9133_v10 }
 0x268   : > { %7020 = vrcp.f32 %v5489_v37  ;;  %v5490_v35 = vadd.f32 1.0, %v7009_v6  ;;  %v6150_v49 = vmul.f32 -1.442695, %v9181_v29  ;;  %v9189_v42 = vadd.f32 %v6710_v31, %v9146_v5 }
 0x269   : > { %7022 = vrcp.f32 %v5492_v62  ;;  %v6148_v25 = vmul.f32 -1.442695, %v9184_v38  ;;  %v9193_v63 = vadd.f32 %v6711_v18, %v9146_v5 }
 0x26a   : > { %7024 = vrcp.f32 %v5490_v35  ;;  %v6151_v1 = vmul.f32 -1.442695, %v9189_v42 }
 0x26b   : > { %7026 = vpow2.f32 %v6150_v49  ;;  %v6149_v28 = vmul.f32 -1.442695, %v9193_v63  ;;  %v6680_v19 = vpop.f32.mrb[12].mxu0 }
 0x26c   : > { %v7011_v36 = vpop.eup %7010  ;;  %7028 = vpow2.f32 %v6148_v25  ;;  %v6712_v10 = vadd.f32 %v6680_v19, %v9135_v26  ;;  %v5243_v43 = vpop.f32.mrb[13].mxu0 }
 0x26d   : > { %v7013_v60 = vpop.eup %7012  ;;  %v5495_v30 = vadd.f32 1.0, %v7011_v36  ;;  %7030 = vpow2.f32 %v6151_v1  ;;  %v6713_v16 = vadd.f32 %v5243_v43, %v9137_v51  ;;  %v6681_v50 = vpop.f32.mrb[14].mxu0 }
 0x26e   : > { %v7015_v8 = vpop.eup %7014  ;;  %v5493_v20 = vadd.f32 1.0, %v7013_v60  ;;  %7032 = vpow2.f32 %v6149_v28  ;;  %v9200_v54 = vadd.f32 %v6712_v10, %v9146_v5  ;;  %v6714_v12 = vadd.f32 %v6681_v50, %v9139_v46  ;;  %v5246_v2 = vpop.f32.mrb[15].mxu0 }
 0x26f   : > { %v7017_v45 = vpop.eup %7016  ;;  %7034 = vrcp.f32 %v5495_v30  ;;  %v5496_v26 = vadd.f32 1.0, %v7015_v8  ;;  %v9204_v53 = vadd.f32 %v6713_v16, %v9146_v5  ;;  %v6715_v33 = vadd.f32 %v5246_v2, %v9141_v11 }
 0x270   : > { %7036 = vrcp.f32 %v5493_v20  ;;  %v5494_v51 = vadd.f32 1.0, %v7017_v45  ;;  %v6154_v34 = vmul.f32 -1.442695, %v9200_v54  ;;  %v9210_v17 = vadd.f32 %v6714_v12, %v9146_v5 }
 0x271   : > { %v7019_v44 = vpop.eup %7018  ;;  %7038 = vrcp.f32 %v5496_v26  ;;  %v6152_v46 = vmul.f32 -1.442695, %v9204_v53  ;;  %v9214_v23 = vadd.f32 %v6715_v33, %v9146_v5 }
 0x272   : > { %v7021_v39 = vpop.eup %7020  ;;  %v5587_v27 = vmul.f32 %v7019_v44, %v9149_v48  ;;  %7040 = vrcp.f32 %v5494_v51  ;;  %v6155_v11 = vmul.f32 -1.442695, %v9210_v17  ;;  %v6548_v13 = vpop.f32.mrb[16].mxu1 }
 0x273   : > { %v7023_v3 = vpop.eup %7022  ;;  %v5585_v9 = vmul.f32 %v7021_v39, %v9152_v24  ;;  %7042 = vpow2.f32 %v6154_v34  ;;  %v6153_v22 = vmul.f32 -1.442695, %v9214_v23  ;;  %v6684_v47 = vpop.f32.mrb[16].mxu0 }
 0x274   : > { %v7025_v32 = vpop.eup %7024  ;;  %v6209_v48 = vpack.c.bf16 %v5587_v27, %v5587_v27  ;;  %v5588_v21 = vmul.f32 %v7023_v3, %v9156_v40  ;;  %7044 = vpow2.f32 %v6152_v46  ;;  %v6716_v61 = vadd.f32 %v6684_v47, %v6548_v13  ;;  %v3551_v57 = vpop.f32.mrb[17].mxu1 }
 0x275   : > { %v5259_v59 = vpop.f32.mrb[17].mxu0  ;;  %v7027_v56 = vpop.eup %7026  ;;  %v6207_v15 = vpack.c.bf16 %v5585_v9, %v5585_v9  ;;  %v5586_v41 = vmul.f32 %v7025_v32, %v9160_v58  ;;  %7046 = vpow2.f32 %v6155_v11 }
 0x276   : > { %v6717_v24 = vadd.f32 %v5259_v59, %v3551_v57  ;;  %v6549_v7 = vpop.f32.mrb[18].mxu1  ;;  %v6685_v37 = vpop.f32.mrb[18].mxu0  ;;  %5748 = vst.msk [vmem:[%s9221_s19 + $0x8] sm:$0xf] %vm5745_vm4, %v6209_v48  ;;  %v6210_v0 = vpack.c.bf16 %v5588_v21, %v5588_v21  ;;  %v5499_v6 = vadd.f32 1.0, %v7027_v56  ;;  %7048 = vpow2.f32 %v6153_v22 }
 0x277   : > { %v7029_v31 = vpop.eup %7028  ;;  %v9230_v40 = vadd.f32 %v6716_v61, %v9146_v5  ;;  %v3554_v62 = vpop.f32.mrb[19].mxu1  ;;  %5746 = vst.msk [vmem:[%s9221_s19] sm:$0xf] %vm5745_vm4, %v6207_v15  ;;  %v6208_v58 = vpack.c.bf16 %v5586_v41, %v5586_v41  ;;  %v6718_v1 = vadd.f32 %v6685_v37, %v6549_v7 }
 0x278   : > { %v5262_v18 = vpop.f32.mrb[19].mxu0  ;;  %v7031_v35 = vpop.eup %7030  ;;  %v5497_v49 = vadd.f32 1.0, %v7029_v31  ;;  %v9235_v25 = vadd.f32 %v6717_v24, %v9146_v5  ;;  %5749 = vst.msk [vmem:[%s9221_s19 + $0xc] sm:$0xf] %vm5745_vm4, %v6210_v0  ;;  %7050 = vrcp.f32 %v5499_v6 }
 0x279   : > { %v7033_v28 = vpop.eup %7032  ;;  %v5500_v19 = vadd.f32 1.0, %v7031_v35  ;;  %v6158_v36 = vmul.f32 -1.442695, %v9230_v40  ;;  %v6719_v10 = vadd.f32 %v5262_v18, %v3554_v62  ;;  %5747 = vst.msk [vmem:[%s9221_s19 + $0x4] sm:$0xf] %vm5745_vm4, %v6208_v58  ;;  %v9244_v16 = vadd.f32 %v6718_v1, %v9146_v5 }
 0x27a   : > { %v7035_v43 = vpop.eup %7034  ;;  %7052 = vrcp.f32 %v5497_v49  ;;  %v5498_v60 = vadd.f32 1.0, %v7033_v28  ;;  %v6156_v30 = vmul.f32 -1.442695, %v9235_v25  ;;  %v6552_v26 = vpop.f32.mrb[20].mxu1 }
 0x27b   : > { %v7037_v50 = vpop.eup %7036  ;;  %v5591_v8 = vmul.f32 %v7035_v43, %v9165_v52  ;;  %7054 = vrcp.f32 %v5500_v19  ;;  %v9248_v20 = vadd.f32 %v6719_v10, %v9146_v5  ;;  %v6159_v45 = vmul.f32 -1.442695, %v9244_v16  ;;  %v6688_v33 = vpop.f32.mrb[20].mxu0 }
 0x27c   : > { %v7039_v12 = vpop.eup %7038  ;;  %v5589_v2 = vmul.f32 %v7037_v50, %v9168_v55  ;;  %7056 = vrcp.f32 %v5498_v60  ;;  %v3567_v46 = vpop.f32.mrb[21].mxu1  ;;  %v6720_v3 = vadd.f32 %v6688_v33, %v6552_v26 }
 0x27d   : > { %v7041_v51 = vpop.eup %7040  ;;  %v6213_v34 = vpack.c.bf16 %v5591_v8, %v5591_v8  ;;  %v5592_v44 = vmul.f32 %v7039_v12, %v9172_v14  ;;  %7058 = vpow2.f32 %v6158_v36  ;;  %v6157_v52 = vmul.f32 -1.442695, %v9248_v20  ;;  %v5275_v39 = vpop.f32.mrb[21].mxu0 }
 0x27e   : > { %v7043_v27 = vpop.eup %7042  ;;  %v6211_v11 = vpack.c.bf16 %v5589_v2, %v5589_v2  ;;  %v5590_v55 = vmul.f32 %v7041_v51, %v9176_v4  ;;  %7060 = vpow2.f32 %v6156_v30  ;;  %v6553_v9 = vpop.f32.mrb[22].mxu1  ;;  %v6721_v32 = vadd.f32 %v5275_v39, %v3567_v46 }
 0x27f   : > { %v6689_v22 = vpop.f32.mrb[22].mxu0  ;;  %v7045_v13 = vpop.eup %7044  ;;  %5752 = vst.msk [vmem:[%s9221_s19 + $0x18] sm:$0xf] %vm5745_vm4, %v6213_v34  ;;  %v6214_v47 = vpack.c.bf16 %v5592_v44, %v5592_v44  ;;  %v5503_v14 = vadd.f32 1.0, %v7043_v27  ;;  %7062 = vpow2.f32 %v6159_v45  ;;  %v9260_v59 = vadd.f32 %v6720_v3, %v9146_v5 }
 0x280   : > { %v3570_v48 = vpop.f32.mrb[23].mxu1  ;;  %v5278_v21 = vpop.f32.mrb[23].mxu0  ;;  %5750 = vst.msk [vmem:[%s9221_s19 + $0x10] sm:$0xf] %vm5745_vm4, %v6211_v11  ;;  %v6212_v57 = vpack.c.bf16 %v5590_v55, %v5590_v55  ;;  %v5501_v4 = vadd.f32 1.0, %v7045_v13  ;;  %7064 = vpow2.f32 %v6157_v52  ;;  %v9265_v41 = vadd.f32 %v6721_v32, %v9146_v5 }
 0x281   : > { %v7047_v61 = vpop.eup %7046  ;;  %5753 = vst.msk [vmem:[%s9221_s19 + $0x1c] sm:$0xf] %vm5745_vm4, %v6214_v47  ;;  %7066 = vrcp.f32 %v5503_v14  ;;  %v6722_v24 = vadd.f32 %v6689_v22, %v6553_v9  ;;  %v6162_v37 = vmul.f32 -1.442695, %v9260_v59  ;;  %v6723_v31 = vadd.f32 %v5278_v21, %v3570_v48 }
 0x282   : > { %v7049_v56 = vpop.eup %7048  ;;  %v5504_v15 = vadd.f32 1.0, %v7047_v61  ;;  %5751 = vst.msk [vmem:[%s9221_s19 + $0x14] sm:$0xf] %vm5745_vm4, %v6212_v57  ;;  %7068 = vrcp.f32 %v5501_v4  ;;  %v6160_v6 = vmul.f32 -1.442695, %v9265_v41  ;;  %v6556_v49 = vpop.f32.mrb[24].mxu1 }
 0x283   : > { %v5502_v7 = vadd.f32 1.0, %v7049_v56  ;;  %v7051_v0 = vpop.eup %7050  ;;  %v9272_v62 = vadd.f32 %v6722_v24, %v9146_v5  ;;  %v9276_v58 = vadd.f32 %v6723_v31, %v9146_v5  ;;  %v6692_v1 = vpop.f32.mrb[24].mxu0 }
 0x284   : > { %7070 = vrcp.f32 %v5504_v15  ;;  %v7053_v18 = vpop.eup %7052  ;;  %v5595_v35 = vmul.f32 %v7051_v0, %v9181_v29  ;;  %v6724_v10 = vadd.f32 %v6692_v1, %v6556_v49  ;;  %v3583_v43 = vpop.f32.mrb[25].mxu1 }
 0x285   : > { %7072 = vrcp.f32 %v5502_v7  ;;  %v7055_v28 = vpop.eup %7054  ;;  %v5593_v19 = vmul.f32 %v7053_v18, %v9184_v38  ;;  %v6163_v36 = vmul.f32 -1.442695, %v9272_v62  ;;  %v5291_v60 = vpop.f32.mrb[25].mxu0  ;;  %v6161_v8 = vmul.f32 -1.442695, %v9276_v58 }
 0x286   : > { %7074 = vpow2.f32 %v6162_v37  ;;  %v7057_v30 = vpop.eup %7056  ;;  %v6217_v50 = vpack.c.bf16 %v5595_v35, %v5595_v35  ;;  %v5596_v29 = vmul.f32 %v7055_v28, %v9189_v42  ;;  %v6557_v12 = vpop.f32.mrb[26].mxu1  ;;  %v9284_v33 = vadd.f32 %v6724_v10, %v9146_v5 }
 0x287   : > { %7076 = vpow2.f32 %v6160_v6  ;;  %v6693_v2 = vpop.f32.mrb[26].mxu0  ;;  %v7059_v45 = vpop.eup %7058  ;;  %v6215_v26 = vpack.c.bf16 %v5593_v19, %v5593_v19  ;;  %v5594_v38 = vmul.f32 %v7057_v30, %v9193_v63  ;;  %v6725_v46 = vadd.f32 %v5291_v60, %v3583_v43 }
 0x288   : > { %7078 = vpow2.f32 %v6163_v36  ;;  %v3586_v51 = vpop.f32.mrb[27].mxu1  ;;  %v5294_v34 = vpop.f32.mrb[27].mxu0  ;;  %5756 = vst.msk [vmem:[%s9221_s19 + $0x28] sm:$0xf] %vm5745_vm4, %v6217_v50  ;;  %v6218_v42 = vpack.c.bf16 %v5596_v29, %v5596_v29  ;;  %v5507_v52 = vadd.f32 1.0, %v7059_v45  ;;  %v6726_v55 = vadd.f32 %v6693_v2, %v6557_v12 }
 0x289   : > { %v7061_v44 = vpop.eup %7060  ;;  %7080 = vpow2.f32 %v6161_v8  ;;  %5754 = vst.msk [vmem:[%s9221_s19 + $0x20] sm:$0xf] %vm5745_vm4, %v6215_v26  ;;  %v6216_v27 = vpack.c.bf16 %v5594_v38, %v5594_v38  ;;  %v6166_v11 = vmul.f32 -1.442695, %v9284_v33  ;;  %v9294_v22 = vadd.f32 %v6725_v46, %v9146_v5 }
 0x28a   : > { %v7063_v39 = vpop.eup %7062  ;;  %v5505_v63 = vadd.f32 1.0, %v7061_v44  ;;  %5757 = vst.msk [vmem:[%s9221_s19 + $0x2c] sm:$0xf] %vm5745_vm4, %v6218_v42  ;;  %7082 = vrcp.f32 %v5507_v52  ;;  %v6727_v13 = vadd.f32 %v5294_v34, %v3586_v51  ;;  %v9299_v32 = vadd.f32 %v6726_v55, %v9146_v5  ;;  %v6560_v4 = vpop.f32.mrb[28].mxu1 }
 0x28b   : > { %v7065_v3 = vpop.eup %7064  ;;  %v5508_v9 = vadd.f32 1.0, %v7063_v39  ;;  %5755 = vst.msk [vmem:[%s9221_s19 + $0x24] sm:$0xf] %vm5745_vm4, %v6216_v27  ;;  %v6164_v61 = vmul.f32 -1.442695, %v9294_v22  ;;  %v6696_v56 = vpop.f32.mrb[28].mxu0 }
 0x28c   : > { %v7067_v47 = vpop.eup %7066  ;;  %7084 = vrcp.f32 %v5505_v63  ;;  %v5506_v14 = vadd.f32 1.0, %v7065_v3  ;;  %v9304_v57 = vadd.f32 %v6727_v13, %v9146_v5  ;;  %v6167_v7 = vmul.f32 -1.442695, %v9299_v32  ;;  %v3599_v31 = vpop.f32.mrb[29].mxu1 }
 0x28d   : > { %v7069_v48 = vpop.eup %7068  ;;  %v5599_v21 = vmul.f32 %v7067_v47, %v9200_v54  ;;  %7086 = vrcp.f32 %v5508_v9  ;;  %v6728_v37 = vadd.f32 %v6696_v56, %v6560_v4  ;;  %v5307_v0 = vpop.f32.mrb[29].mxu0 }
 0x28e   : > { %v7071_v15 = vpop.eup %7070  ;;  %v5597_v24 = vmul.f32 %v7069_v48, %v9204_v53  ;;  %7088 = vrcp.f32 %v5506_v14  ;;  %v6165_v35 = vmul.f32 -1.442695, %v9304_v57  ;;  %v6561_v49 = vpop.f32.mrb[30].mxu1  ;;  %v6729_v50 = vadd.f32 %v5307_v0, %v3599_v31 }
 0x28f   : > { %v7073_v6 = vpop.eup %7072  ;;  %v6221_v54 = vpack.c.bf16 %v5599_v21, %v5599_v21  ;;  %v5600_v18 = vmul.f32 %v7071_v15, %v9210_v17  ;;  %7090 = vpow2.f32 %v6166_v11  ;;  %v6697_v1 = vpop.f32.mrb[30].mxu0  ;;  %v9312_v36 = vadd.f32 %v6728_v37, %v9146_v5 }
 0x290   : > { %v7075_v28 = vpop.eup %7074  ;;  %v6219_v19 = vpack.c.bf16 %v5597_v24, %v5597_v24  ;;  %v5598_v53 = vmul.f32 %v7073_v6, %v9214_v23  ;;  %7092 = vpow2.f32 %v6164_v61  ;;  %v3602_v10 = vpop.f32.mrb[31].mxu1  ;;  %v9322_v26 = vadd.f32 %v6729_v50, %v9146_v5 }
 0x291   : > { %v5310_v43 = vpop.f32.mrb[31].mxu0  ;;  %v7077_v60 = vpop.eup %7076  ;;  %5760 = vst.msk [vmem:[%s9221_s19 + $0x38] sm:$0xf] %vm5745_vm4, %v6221_v54  ;;  %v6222_v17 = vpack.c.bf16 %v5600_v18, %v5600_v18  ;;  %v5511_v30 = vadd.f32 1.0, %v7075_v28  ;;  %7094 = vpow2.f32 %v6167_v7  ;;  %v6170_v12 = vmul.f32 -1.442695, %v9312_v36 }
 0x292   : > { %v7079_v29 = vpop.eup %7078  ;;  %5758 = vst.msk [vmem:[%s9221_s19 + $0x30] sm:$0xf] %vm5745_vm4, %v6219_v19  ;;  %v6220_v8 = vpack.c.bf16 %v5598_v53, %v5598_v53  ;;  %v5509_v23 = vadd.f32 1.0, %v7077_v60  ;;  %7096 = vpow2.f32 %v6165_v35  ;;  %v6730_v38 = vadd.f32 %v6697_v1, %v6561_v49 }
 0x293   : > { %v7081_v2 = vpop.eup %7080  ;;  %5761 = vst.msk [vmem:[%s9221_s19 + $0x3c] sm:$0xf] %vm5745_vm4, %v6222_v17  ;;  %7098 = vrcp.f32 %v5511_v30  ;;  %v5512_v45 = vadd.f32 1.0, %v7079_v29  ;;  %v6731_v34 = vadd.f32 %v5310_v43, %v3602_v10  ;;  %v6168_v42 = vmul.f32 -1.442695, %v9322_v26 }
 0x294   : > { %5759 = vst.msk [vmem:[%s9221_s19 + $0x34] sm:$0xf] %vm5745_vm4, %v6220_v8  ;;  %7100 = vrcp.f32 %v5509_v23  ;;  %v5510_v51 = vadd.f32 1.0, %v7081_v2  ;;  %v7083_v44 = vpop.eup %7082  ;;  %v9328_v52 = vadd.f32 %v6730_v38, %v9146_v5 }
 0x295   : > { %7102 = vrcp.f32 %v5512_v45  ;;  %v5603_v39 = vmul.f32 %v7083_v44, %v9230_v40  ;;  %v9332_v27 = vadd.f32 %v6731_v34, %v9146_v5 }
 0x296   : > { %v7085_v46 = vpop.eup %7084  ;;  %7104 = vrcp.f32 %v5510_v51  ;;  %v6171_v55 = vmul.f32 -1.442695, %v9328_v52 }
 0x297   : > { %v7087_v63 = vpop.eup %7086  ;;  %v5601_v11 = vmul.f32 %v7085_v46, %v9235_v25  ;;  %7106 = vpow2.f32 %v6170_v12  ;;  %v6225_v9 = vpack.c.bf16 %v5603_v39, %v5603_v39  ;;  %v6169_v40 = vmul.f32 -1.442695, %v9332_v27 }
 0x298   : > { %v7089_v3 = vpop.eup %7088  ;;  %v5604_v13 = vmul.f32 %v7087_v63, %v9244_v16  ;;  %7108 = vpow2.f32 %v6168_v42 }
 0x299   : > { %v7091_v47 = vpop.eup %7090  ;;  %v6223_v14 = vpack.c.bf16 %v5601_v11, %v5601_v11  ;;  %v5602_v5 = vmul.f32 %v7089_v3, %v9248_v20  ;;  %7110 = vpow2.f32 %v6171_v55  ;;  %5764 = vst.msk [vmem:[%s9221_s19 + $0x48] sm:$0xf] %vm5745_vm4, %v6225_v9 }
 0x29a   : > { %v7093_v48 = vpop.eup %7092  ;;  %v6226_v25 = vpack.c.bf16 %v5604_v13, %v5604_v13  ;;  %v5515_v21 = vadd.f32 1.0, %v7091_v47  ;;  %7112 = vpow2.f32 %v6169_v40 }
 0x29b   : > { %v7095_v61 = vpop.eup %7094  ;;  %5762 = vst.msk [vmem:[%s9221_s19 + $0x40] sm:$0xf] %vm5745_vm4, %v6223_v14  ;;  %v6224_v16 = vpack.c.bf16 %v5602_v5, %v5602_v5  ;;  %v5513_v4 = vadd.f32 1.0, %v7093_v48 }
 0x29c   : > { %v7097_v56 = vpop.eup %7096  ;;  %5765 = vst.msk [vmem:[%s9221_s19 + $0x4c] sm:$0xf] %vm5745_vm4, %v6226_v25  ;;  %7114 = vrcp.f32 %v5515_v21  ;;  %v5516_v15 = vadd.f32 1.0, %v7095_v61 }
 0x29d   : > { %v7099_v24 = vpop.eup %7098  ;;  %5763 = vst.msk [vmem:[%s9221_s19 + $0x44] sm:$0xf] %vm5745_vm4, %v6224_v16  ;;  %7116 = vrcp.f32 %v5513_v4  ;;  %v5514_v20 = vadd.f32 1.0, %v7097_v56 }
 0x29e   : > { %v7101_v7 = vpop.eup %7100  ;;  %v5607_v37 = vmul.f32 %v7099_v24, %v9260_v59  ;;  %7118 = vrcp.f32 %v5516_v15 }
 0x29f   : > { %v7103_v31 = vpop.eup %7102  ;;  %v5605_v0 = vmul.f32 %v7101_v7, %v9265_v41  ;;  %7120 = vrcp.f32 %v5514_v20 }
 0x2a0   : > { %v7105_v6 = vpop.eup %7104  ;;  %v6229_v54 = vpack.c.bf16 %v5607_v37, %v5607_v37  ;;  %v5608_v18 = vmul.f32 %v7103_v31, %v9272_v62 }
 0x2a1   : > { %v7107_v35 = vpop.eup %7106  ;;  %v6227_v49 = vpack.c.bf16 %v5605_v0, %v5605_v0  ;;  %v5606_v1 = vmul.f32 %v7105_v6, %v9276_v58 }
 0x2a2   : > { %v7109_v28 = vpop.eup %7108  ;;  %5768 = vst.msk [vmem:[%s9221_s19 + $0x58] sm:$0xf] %vm5745_vm4, %v6229_v54  ;;  %v6230_v59 = vpack.c.bf16 %v5608_v18, %v5608_v18  ;;  %v5519_v19 = vadd.f32 1.0, %v7107_v35 }
 0x2a3   : > { %v7111_v53 = vpop.eup %7110  ;;  %5766 = vst.msk [vmem:[%s9221_s19 + $0x50] sm:$0xf] %vm5745_vm4, %v6227_v49  ;;  %v6228_v41 = vpack.c.bf16 %v5606_v1, %v5606_v1  ;;  %v5517_v10 = vadd.f32 1.0, %v7109_v28 }
 0x2a4   : > { %v7113_v43 = vpop.eup %7112  ;;  %5769 = vst.msk [vmem:[%s9221_s19 + $0x5c] sm:$0xf] %vm5745_vm4, %v6230_v59  ;;  %7122 = vrcp.f32 %v5519_v19  ;;  %v5520_v62 = vadd.f32 1.0, %v7111_v53 }
 0x2a5   : > { %5767 = vst.msk [vmem:[%s9221_s19 + $0x54] sm:$0xf] %vm5745_vm4, %v6228_v41  ;;  %7124 = vrcp.f32 %v5517_v10  ;;  %v5518_v58 = vadd.f32 1.0, %v7113_v43 }
 0x2a6   : > { %v7115_v60 = vpop.eup %7114  ;;  %7126 = vrcp.f32 %v5520_v62 }
 0x2a7   : > { %v7117_v17 = vpop.eup %7116  ;;  %v5611_v30 = vmul.f32 %v7115_v60, %v9284_v33  ;;  %7128 = vrcp.f32 %v5518_v58 }
 0x2a8   : > { %v7119_v50 = vpop.eup %7118  ;;  %v5609_v29 = vmul.f32 %v7117_v17, %v9294_v22 }
 0x2a9   : > { %v7121_v8 = vpop.eup %7120  ;;  %v6233_v23 = vpack.c.bf16 %v5611_v30, %v5611_v30  ;;  %v5612_v12 = vmul.f32 %v7119_v50, %v9299_v32 }
 0x2aa   : > { %v6231_v2 = vpack.c.bf16 %v5609_v29, %v5609_v29  ;;  %v5610_v45 = vmul.f32 %v7121_v8, %v9304_v57 }
 0x2ab   : > { %5772 = vst.msk [vmem:[%s9221_s19 + $0x68] sm:$0xf] %vm5745_vm4, %v6233_v23  ;;  %v6234_v38 = vpack.c.bf16 %v5612_v12, %v5612_v12 }
 0x2ac   : > { %5770 = vst.msk [vmem:[%s9221_s19 + $0x60] sm:$0xf] %vm5745_vm4, %v6231_v2  ;;  %v6232_v51 = vpack.c.bf16 %v5610_v45, %v5610_v45 }
 0x2ad   : > { %5773 = vst.msk [vmem:[%s9221_s19 + $0x6c] sm:$0xf] %vm5745_vm4, %v6234_v38 }
 0x2ae   : > { %v7123_v33 = vpop.eup %7122  ;;  %5771 = vst.msk [vmem:[%s9221_s19 + $0x64] sm:$0xf] %vm5745_vm4, %v6232_v51 }
 0x2af   : > { %v7125_v22 = vpop.eup %7124  ;;  %v5615_v32 = vmul.f32 %v7123_v33, %v9312_v36 }
 0x2b0   : > { %v7127_v34 = vpop.eup %7126  ;;  %v5613_v57 = vmul.f32 %v7125_v22, %v9322_v26 }
 0x2b1   : > { %v7129_v44 = vpop.eup %7128  ;;  %v6237_v42 = vpack.c.bf16 %v5615_v32, %v5615_v32  ;;  %v5616_v46 = vmul.f32 %v7127_v34, %v9328_v52 }
 0x2b2   : > { %v6235_v39 = vpack.c.bf16 %v5613_v57, %v5613_v57  ;;  %v5614_v63 = vmul.f32 %v7129_v44, %v9332_v27 }
 0x2b3   : > { %5776 = vst.msk [vmem:[%s9221_s19 + $0x78] sm:$0xf] %vm5745_vm4, %v6237_v42  ;;  %v6238_v11 = vpack.c.bf16 %v5616_v46, %v5616_v46 }
 0x2b4   : > { %5774 = vst.msk [vmem:[%s9221_s19 + $0x70] sm:$0xf] %vm5745_vm4, %v6235_v39  ;;  %v6236_v55 = vpack.c.bf16 %v5614_v63, %v5614_v63 }
 0x2b5   : > { %5777 = vst.msk [vmem:[%s9221_s19 + $0x7c] sm:$0xf] %vm5745_vm4, %v6238_v11 }
 0x2b6   : > { %5775 = vst.msk [vmem:[%s9221_s19 + $0x74] sm:$0xf] %vm5745_vm4, %v6236_v55 }
 0x2b7 PF: > { %s13_s14 = sadd.s32 1, %s7214_s14   ;;  %s10216_s12 = smov %s7210_s13 }
 0x2b8   : > { %p10_p5 = scmp.ge.s32.totalorder %s13_s14, 4   ;;  %s10217_s13 = smov %s10219_s15 }
 0x2ba   :  { %12 = sbr.rel (!%p10_p5) target bundleno = 2 (0x2), region = 70 }

</bundles_post_ra>
